<compile_context>
chip_gen: v5e
topology: v5e:2x2
jax: 0.10.0
libtpu: 0.0.40
codegen_flags: <defaults>
</compile_context>

<pallas_src>
import functools

import jax
import jax.numpy as jnp
from jax.experimental import pallas as pl
from jax.experimental.pallas import tpu as pltpu

IMAGE_SIZE = (28, 28)
NUM_CLASSES = 10
LATENT_SIZE = 32                              # latent_size_linear (demo value)
H1, H2, H3 = 256, 512, 1024
OUT_DIM = IMAGE_SIZE[0] * IMAGE_SIZE[1]       # 784
OUT_PAD = 896                                 # 7 * 128 : lane-dense output
IN_PAD = 128                                  # padded K for layer 1


def _round_up(x, m):
    return ((x + m - 1) // m) * m


def _leaky_relu(x, slope=0.2):
    return jnp.where(x >= 0, x, slope * x)


def generator_kernel(x_ref,
                     w1_ref, b1_ref,
                     w2_ref, b2_ref,
                     w3_ref, b3_ref,
                     w4_ref, b4_ref,
                     out_ref):
    """Fused MLP: (tb, IN_PAD) -> (tb, OUT_PAD), LeakyReLU(0.2) x3 + Tanh.

    Dots take bf16 operands (full MXU rate) with f32 accumulation; bias add,
    LeakyReLU and tanh are done in f32.
    """
    h = jnp.dot(x_ref[...], w1_ref[...],
                preferred_element_type=jnp.float32) + b1_ref[...]
    h = _leaky_relu(h)

    h = jnp.dot(h.astype(jnp.bfloat16), w2_ref[...],
                preferred_element_type=jnp.float32) + b2_ref[...]
    h = _leaky_relu(h)

    h = jnp.dot(h.astype(jnp.bfloat16), w3_ref[...],
                preferred_element_type=jnp.float32) + b3_ref[...]
    h = _leaky_relu(h)

    h = jnp.dot(h.astype(jnp.bfloat16), w4_ref[...],
                preferred_element_type=jnp.float32) + b4_ref[...]
    out_ref[...] = jnp.tanh(h).astype(out_ref.dtype)


def init_params(key, latent_size=LATENT_SIZE, num_classes=NUM_CLASSES):
    """Deterministic synthetic f32 parameters (same shapes as the PyTorch module)."""
    in_dim = latent_size + num_classes
    dims = [(in_dim, H1), (H1, H2), (H2, H3), (H3, OUT_DIM)]
    params = []
    for d_in, d_out in dims:
        kw, kb, key = jax.random.split(key, 3)
        scale = 1.0 / jnp.sqrt(jnp.float32(d_in))
        w = jax.random.uniform(kw, (d_in, d_out), jnp.float32, -scale, scale)
        b = jax.random.uniform(kb, (1, d_out), jnp.float32, -scale, scale)
        params.extend([w, b])
    return tuple(params)


@functools.partial(jax.jit, static_argnames=("batch_tile",))
def generator_forward(latent, labels, params, *, batch_tile=256):
    """Pallas-backed forward pass of the Generator.

    latent: (B, LATENT_SIZE) float32
    labels: (B,) int32 class ids in [0, NUM_CLASSES)
    returns: (B, 1, 28, 28) float32
    """
    (w1, b1, w2, b2, w3, b3, w4, b4) = params
    B = latent.shape[0]

    # Glue: one-hot + concat (matches F.one_hot + torch.cat(dim=1)).
    one_hot = jax.nn.one_hot(labels, NUM_CLASSES, dtype=latent.dtype)
    x = jnp.concatenate([latent, one_hot], axis=1)            # (B, 42)
    in_dim = x.shape[1]

    # Pad K (42 -> 128) with zeros on both x columns and w1 rows: no-op math,
    # aligned MXU K feed.  Pad N of the last layer (784 -> 896) so the output
    # tile is lane-dense (no masked partial stores); sliced back below.
    x_p = jnp.pad(x, ((0, 0), (0, IN_PAD - in_dim))).astype(jnp.bfloat16)
    w1_p = jnp.pad(w1, ((0, IN_PAD - in_dim), (0, 0)))
    w4_p = jnp.pad(w4, ((0, 0), (0, OUT_PAD - OUT_DIM)))
    b4_p = jnp.pad(b4, ((0, 0), (0, OUT_PAD - OUT_DIM)))

    # bf16 weights: halves weight DMA and runs the MXU at full rate.
    # Biases stay f32 (added to the f32 accumulator).
    w1b = w1_p.astype(jnp.bfloat16)
    w2b = w2.astype(jnp.bfloat16)
    w3b = w3.astype(jnp.bfloat16)
    w4b = w4_p.astype(jnp.bfloat16)

    # Batch tile: big enough to fill the MXU M-dim, rounded for small demos.
    # NOTE: when B % tb != 0 the last grid step computes on padded rows; tanh
    # keeps them bounded and only in-bounds rows are written back.
    tb = min(batch_tile, _round_up(B, 8))
    grid = (pl.cdiv(B, tb),)

    def full_spec(shape):
        # Constant-index (resident) block: whole weight / bias array.
        return pl.BlockSpec(shape, lambda i: (0,) * len(shape))

    out_flat = pl.pallas_call(
        generator_kernel,
        out_shape=jax.ShapeDtypeStruct((B, OUT_PAD), jnp.float32),
        grid=grid,
        in_specs=[
            pl.BlockSpec((tb, IN_PAD), lambda i: (i, 0)),     # x tile over batch
            full_spec(w1b.shape), full_spec(b1.shape),
            full_spec(w2b.shape), full_spec(b2.shape),
            full_spec(w3b.shape), full_spec(b3.shape),
            full_spec(w4b.shape), full_spec(b4_p.shape),
        ],
        out_specs=pl.BlockSpec((tb, OUT_PAD), lambda i: (i, 0)),
        compiler_params=pltpu.CompilerParams(
            dimension_semantics=("parallel",),
            vmem_limit_bytes=32 * 1024 * 1024,   # fits v7x's 64 MiB VMEM
        ),
    )(x_p, w1b, b1, w2b, b2, w3b, b3, w4b, b4_p)

    # Drop the lane padding, then PyTorch: out.view(B, 1, 28, 28)  (NCHW).
    return out_flat[:, :OUT_DIM].reshape(B, 1, IMAGE_SIZE[0], IMAGE_SIZE[1])


def _reference_forward(latent, labels, params):
    """Pure-JAX f32 reference (mirrors the PyTorch module exactly)."""
    (w1, b1, w2, b2, w3, b3, w4, b4) = params
    one_hot = jax.nn.one_hot(labels, NUM_CLASSES, dtype=latent.dtype)
    h = jnp.concatenate([latent, one_hot], axis=1)
    h = _leaky_relu(h @ w1 + b1)
    h = _leaky_relu(h @ w2 + b2)
    h = _leaky_relu(h @ w3 + b3)
    h = jnp.tanh(h @ w4 + b4)
    return h.reshape(latent.shape[0], 1, IMAGE_SIZE[0], IMAGE_SIZE[1])


if __name__ == "__main__":
    key = jax.random.PRNGKey(0)
    k_params, k_latent, k_labels = jax.random.split(key, 3)

    B = 8
    params = init_params(k_params)
    latent = jax.random.normal(k_latent, (B, LATENT_SIZE), jnp.float32)
    labels = jax.random.randint(k_labels, (B,), 0, NUM_CLASSES, jnp.int32)

    out = generator_forward(latent, labels, params)
    out = jax.block_until_ready(out)

    ref = _reference_forward(latent, labels, params)
    assert out.shape == (B, 1, 28, 28), out.shape
    # bf16 weights/activation-inputs inside the kernel -> loosened tolerance
    # vs. the pure-f32 reference (observed error is ~1e-3 on tanh outputs).
    assert jnp.allclose(out, ref, atol=2e-2, rtol=2e-2), "mismatch vs reference"

    print("KERNEL_OK")
</pallas_src>

<mosaic_0001>
module attributes {stable_mosaic.version = 11 : i64} {
  func.func @generator_kernel(%arg0: i32, %arg1: memref<8x128xbf16, #tpu.memory_space<vmem>>, %arg2: memref<128x256xbf16, #tpu.memory_space<vmem>>, %arg3: memref<1x256xf32, #tpu.memory_space<vmem>>, %arg4: memref<256x512xbf16, #tpu.memory_space<vmem>>, %arg5: memref<1x512xf32, #tpu.memory_space<vmem>>, %arg6: memref<512x1024xbf16, #tpu.memory_space<vmem>>, %arg7: memref<1x1024xf32, #tpu.memory_space<vmem>>, %arg8: memref<1024x896xbf16, #tpu.memory_space<vmem>>, %arg9: memref<1x896xf32, #tpu.memory_space<vmem>>, %arg10: memref<8x896xf32, #tpu.memory_space<vmem>>) attributes {dimension_semantics = [#tpu.dimension_semantics<parallel>], iteration_bounds = array<i64: 1>, scalar_prefetch = 0 : i64, scratch_operands = 0 : i64, tpu.core_type = #tpu.core_type<tc>, window_params = [{transform_indices = @transform_0, window_bounds = array<i64: 8, 128>}, {pipeline_mode = #tpu.pipeline_mode<synchronous>, transform_indices = @transform_1, window_bounds = array<i64: 128, 256>}, {pipeline_mode = #tpu.pipeline_mode<synchronous>, transform_indices = @transform_2, window_bounds = array<i64: 1, 256>}, {pipeline_mode = #tpu.pipeline_mode<synchronous>, transform_indices = @transform_3, window_bounds = array<i64: 256, 512>}, {pipeline_mode = #tpu.pipeline_mode<synchronous>, transform_indices = @transform_4, window_bounds = array<i64: 1, 512>}, {pipeline_mode = #tpu.pipeline_mode<synchronous>, transform_indices = @transform_5, window_bounds = array<i64: 512, 1024>}, {pipeline_mode = #tpu.pipeline_mode<synchronous>, transform_indices = @transform_6, window_bounds = array<i64: 1, 1024>}, {pipeline_mode = #tpu.pipeline_mode<synchronous>, transform_indices = @transform_7, window_bounds = array<i64: 1024, 896>}, {pipeline_mode = #tpu.pipeline_mode<synchronous>, transform_indices = @transform_8, window_bounds = array<i64: 1, 896>}, {transform_indices = @transform_9, window_bounds = array<i64: 8, 896>}]} {
    %c0 = arith.constant 0 : index
    %c0_0 = arith.constant 0 : index
    %0 = vector.load %arg1[%c0, %c0_0] : memref<8x128xbf16, #tpu.memory_space<vmem>>, vector<8x128xbf16>
    %c0_1 = arith.constant 0 : index
    %c0_2 = arith.constant 0 : index
    %1 = vector.load %arg2[%c0_1, %c0_2] : memref<128x256xbf16, #tpu.memory_space<vmem>>, vector<128x256xbf16>
    %cst = arith.constant dense<0.000000e+00> : vector<8x256xf32>
    %2 = tpu.matmul %0, %1, %cst {dimension_numbers = #tpu.dot_dimension_numbers<[1], [0], [0], [1], [0, 0, 1, 1], [], []>} : vector<8x128xbf16>, vector<128x256xbf16>, vector<8x256xf32> -> vector<8x256xf32>
    %c0_3 = arith.constant 0 : index
    %c0_4 = arith.constant 0 : index
    %3 = vector.load %arg3[%c0_3, %c0_4] : memref<1x256xf32, #tpu.memory_space<vmem>>, vector<1x256xf32>
    %4 = vector.broadcast %3 : vector<1x256xf32> to vector<8x256xf32>
    %5 = arith.addf %2, %4 : vector<8x256xf32>
    %cst_5 = arith.constant 0.000000e+00 : f32
    %6 = vector.broadcast %cst_5 : f32 to vector<8x256xf32>
    %7 = arith.cmpf oge, %5, %6 : vector<8x256xf32>
    %cst_6 = arith.constant 2.000000e-01 : f32
    %8 = vector.broadcast %cst_6 : f32 to vector<8x256xf32>
    %9 = arith.mulf %8, %5 : vector<8x256xf32>
    %10 = arith.select %7, %5, %9 : vector<8x256xi1>, vector<8x256xf32>
    %11 = arith.truncf %10 : vector<8x256xf32> to vector<8x256xbf16>
    %c0_7 = arith.constant 0 : index
    %c0_8 = arith.constant 0 : index
    %12 = vector.load %arg4[%c0_7, %c0_8] : memref<256x512xbf16, #tpu.memory_space<vmem>>, vector<256x512xbf16>
    %cst_9 = arith.constant dense<0.000000e+00> : vector<8x512xf32>
    %13 = tpu.matmul %11, %12, %cst_9 {dimension_numbers = #tpu.dot_dimension_numbers<[1], [0], [0], [1], [0, 0, 1, 1], [], []>} : vector<8x256xbf16>, vector<256x512xbf16>, vector<8x512xf32> -> vector<8x512xf32>
    %c0_10 = arith.constant 0 : index
    %c0_11 = arith.constant 0 : index
    %14 = vector.load %arg5[%c0_10, %c0_11] : memref<1x512xf32, #tpu.memory_space<vmem>>, vector<1x512xf32>
    %15 = vector.broadcast %14 : vector<1x512xf32> to vector<8x512xf32>
    %16 = arith.addf %13, %15 : vector<8x512xf32>
    %cst_12 = arith.constant 0.000000e+00 : f32
    %17 = vector.broadcast %cst_12 : f32 to vector<8x512xf32>
    %18 = arith.cmpf oge, %16, %17 : vector<8x512xf32>
    %cst_13 = arith.constant 2.000000e-01 : f32
    %19 = vector.broadcast %cst_13 : f32 to vector<8x512xf32>
    %20 = arith.mulf %19, %16 : vector<8x512xf32>
    %21 = arith.select %18, %16, %20 : vector<8x512xi1>, vector<8x512xf32>
    %22 = arith.truncf %21 : vector<8x512xf32> to vector<8x512xbf16>
    %c0_14 = arith.constant 0 : index
    %c0_15 = arith.constant 0 : index
    %23 = vector.load %arg6[%c0_14, %c0_15] : memref<512x1024xbf16, #tpu.memory_space<vmem>>, vector<512x1024xbf16>
    %cst_16 = arith.constant dense<0.000000e+00> : vector<8x1024xf32>
    %24 = tpu.matmul %22, %23, %cst_16 {dimension_numbers = #tpu.dot_dimension_numbers<[1], [0], [0], [1], [0, 0, 1, 1], [], []>} : vector<8x512xbf16>, vector<512x1024xbf16>, vector<8x1024xf32> -> vector<8x1024xf32>
    %c0_17 = arith.constant 0 : index
    %c0_18 = arith.constant 0 : index
    %25 = vector.load %arg7[%c0_17, %c0_18] : memref<1x1024xf32, #tpu.memory_space<vmem>>, vector<1x1024xf32>
    %26 = vector.broadcast %25 : vector<1x1024xf32> to vector<8x1024xf32>
    %27 = arith.addf %24, %26 : vector<8x1024xf32>
    %cst_19 = arith.constant 0.000000e+00 : f32
    %28 = vector.broadcast %cst_19 : f32 to vector<8x1024xf32>
    %29 = arith.cmpf oge, %27, %28 : vector<8x1024xf32>
    %cst_20 = arith.constant 2.000000e-01 : f32
    %30 = vector.broadcast %cst_20 : f32 to vector<8x1024xf32>
    %31 = arith.mulf %30, %27 : vector<8x1024xf32>
    %32 = arith.select %29, %27, %31 : vector<8x1024xi1>, vector<8x1024xf32>
    %33 = arith.truncf %32 : vector<8x1024xf32> to vector<8x1024xbf16>
    %c0_21 = arith.constant 0 : index
    %c0_22 = arith.constant 0 : index
    %34 = vector.load %arg8[%c0_21, %c0_22] : memref<1024x896xbf16, #tpu.memory_space<vmem>>, vector<1024x896xbf16>
    %cst_23 = arith.constant dense<0.000000e+00> : vector<8x896xf32>
    %35 = tpu.matmul %33, %34, %cst_23 {dimension_numbers = #tpu.dot_dimension_numbers<[1], [0], [0], [1], [0, 0, 1, 1], [], []>} : vector<8x1024xbf16>, vector<1024x896xbf16>, vector<8x896xf32> -> vector<8x896xf32>
    %c0_24 = arith.constant 0 : index
    %c0_25 = arith.constant 0 : index
    %36 = vector.load %arg9[%c0_24, %c0_25] : memref<1x896xf32, #tpu.memory_space<vmem>>, vector<1x896xf32>
    %37 = vector.broadcast %36 : vector<1x896xf32> to vector<8x896xf32>
    %38 = arith.addf %35, %37 : vector<8x896xf32>
    %39 = math.tanh %38 : vector<8x896xf32>
    %c0_26 = arith.constant 0 : index
    %c0_27 = arith.constant 0 : index
    %40 = vector.load %arg10[%c0_26, %c0_27] : memref<8x896xf32, #tpu.memory_space<vmem>>, vector<8x896xf32>
    tpu.vector_store %arg10[%c0_26, %c0_27], %39 {strides = array<i32>} : memref<8x896xf32, #tpu.memory_space<vmem>>, vector<8x896xf32>,
    return
  }
  func.func @transform_0(%arg0: i32) -> (i32, i32) {
    %c0_i32 = arith.constant 0 : i32
    %c0_i32_0 = arith.constant 0 : i32
    return %arg0, %c0_i32 : i32, i32
  }
  func.func @transform_1(%arg0: i32) -> (i32, i32) {
    %c0_i32 = arith.constant 0 : i32
    %c0_i32_0 = arith.constant 0 : i32
    %c0_i32_1 = arith.constant 0 : i32
    return %c0_i32, %c0_i32_0 : i32, i32
  }
  func.func @transform_2(%arg0: i32) -> (i32, i32) {
    %c0_i32 = arith.constant 0 : i32
    %c0_i32_0 = arith.constant 0 : i32
    %c0_i32_1 = arith.constant 0 : i32
    return %c0_i32, %c0_i32_0 : i32, i32
  }
  func.func @transform_3(%arg0: i32) -> (i32, i32) {
    %c0_i32 = arith.constant 0 : i32
    %c0_i32_0 = arith.constant 0 : i32
    %c0_i32_1 = arith.constant 0 : i32
    return %c0_i32, %c0_i32_0 : i32, i32
  }
  func.func @transform_4(%arg0: i32) -> (i32, i32) {
    %c0_i32 = arith.constant 0 : i32
    %c0_i32_0 = arith.constant 0 : i32
    %c0_i32_1 = arith.constant 0 : i32
    return %c0_i32, %c0_i32_0 : i32, i32
  }
  func.func @transform_5(%arg0: i32) -> (i32, i32) {
    %c0_i32 = arith.constant 0 : i32
    %c0_i32_0 = arith.constant 0 : i32
    %c0_i32_1 = arith.constant 0 : i32
    return %c0_i32, %c0_i32_0 : i32, i32
  }
  func.func @transform_6(%arg0: i32) -> (i32, i32) {
    %c0_i32 = arith.constant 0 : i32
    %c0_i32_0 = arith.constant 0 : i32
    %c0_i32_1 = arith.constant 0 : i32
    return %c0_i32, %c0_i32_0 : i32, i32
  }
  func.func @transform_7(%arg0: i32) -> (i32, i32) {
    %c0_i32 = arith.constant 0 : i32
    %c0_i32_0 = arith.constant 0 : i32
    %c0_i32_1 = arith.constant 0 : i32
    return %c0_i32, %c0_i32_0 : i32, i32
  }
  func.func @transform_8(%arg0: i32) -> (i32, i32) {
    %c0_i32 = arith.constant 0 : i32
    %c0_i32_0 = arith.constant 0 : i32
    %c0_i32_1 = arith.constant 0 : i32
    return %c0_i32, %c0_i32_0 : i32, i32
  }
  func.func @transform_9(%arg0: i32) -> (i32, i32) {
    %c0_i32 = arith.constant 0 : i32
    %c0_i32_0 = arith.constant 0 : i32
    return %arg0, %c0_i32 : i32, i32
  }
}

</mosaic_0001>

<bundles_post_ra>
// kernel: generator_forward.1
= control target key start
LH: loop header
LB: loop body
LE: loop exit
PB: predicated region body
PF: predicated region fallthrough
CT: control target
= control target key end

     0   :  { %s15273_s1 = inlined_call_operand.vmem [shape: bf16[128,256], index: 1, kind: input, shape index: {}]   ;;  %s15274_s3 = inlined_call_operand.vmem [shape: bf16[256,512], index: 3, kind: input, shape index: {}]   ;;  %s15275_s0 = inlined_call_operand.vmem [shape: bf16[8,128], index: 0, kind: input, shape index: {}]   ;;  %s15276_s2 = inlined_call_operand.vmem [shape: f32[1,256], index: 2, kind: input, shape index: {}]   ;;  %s15277_s5 = inlined_call_operand.vmem [shape: bf16[512,1024], index: 5, kind: input, shape index: {}]   ;;  %s15278_s4 = inlined_call_operand.vmem [shape: f32[1,512], index: 4, kind: input, shape index: {}]   ;;  %s15279_s6 = inlined_call_operand.vmem [shape: f32[1,1024], index: 6, kind: input, shape index: {}]   ;;  %s15280_s7 = inlined_call_operand.vmem [shape: bf16[1024,896], index: 7, kind: input, shape index: {}]   ;;  %s15281_s8 = inlined_call_operand.vmem [shape: f32[1,896], index: 8, kind: input, shape index: {}]   ;;  %s15282_s9 = inlined_call_operand.vmem [shape: f32[8,896], index: 9, kind: output, shape index: {}]  }
   0x1   :  { %v6321_v0 = vld [vmem:[%s15273_s1 + $0x70] sm:$0xf]  ;;  %v9414_v1 = vld [vmem:[%s15273_s1 + $0x74] sm:$0xf0]  ;;  %v9413_v2 = vld [vmem:[%s15273_s1 + $0x74] sm:$0xf] }
   0x2   :  { %v6322_v3 = vor.u32 %v9414_v1, %v6321_v0  ;;  %v6323_v4 = vld [vmem:[%s15273_s1 + $0x78] sm:$0xf0]  ;;  %v6313_v5 = vld [vmem:[%s15273_s1 + $0x60] sm:$0xf]  ;;  %v9412_v6 = vld [vmem:[%s15273_s1 + $0x64] sm:$0xf0] }
   0x3   :  { %v6326_v7 = vor.u32 %v9413_v2, %v6323_v4  ;;  %v9411_v8 = vld [vmem:[%s15273_s1 + $0x64] sm:$0xf]  ;;  %v6315_v9 = vld [vmem:[%s15273_s1 + $0x68] sm:$0xf0]  ;;  %v6314_v10 = vor.u32 %v9412_v6, %v6313_v5  ;;  %v6305_v12 = vld [vmem:[%s15273_s1 + $0x50] sm:$0xf] }
   0x4   :  { %135 = vmatpush.bf16.msra.mxu0 %v6322_v3  ;;  %v6318_v11 = vor.u32 %v9411_v8, %v6315_v9  ;;  %v9410_v13 = vld [vmem:[%s15273_s1 + $0x54] sm:$0xf0]  ;;  %v9409_v14 = vld [vmem:[%s15273_s1 + $0x54] sm:$0xf]  ;;  %v6307_v15 = vld [vmem:[%s15273_s1 + $0x58] sm:$0xf0] }
   0x5   :  { %148 = vmatpush.bf16.msra.mxu1 %v6326_v7  ;;  %v6306_v16 = vor.u32 %v9410_v13, %v6305_v12  ;;  %v6310_v17 = vor.u32 %v9409_v14, %v6307_v15  ;;  %v6297_v18 = vld [vmem:[%s15273_s1 + $0x40] sm:$0xf]  ;;  %v9408_v19 = vld [vmem:[%s15273_s1 + $0x44] sm:$0xf0]  ;;  %v9407_v20 = vld [vmem:[%s15273_s1 + $0x44] sm:$0xf] }
   0x6   :  { %v6299_v21 = vld [vmem:[%s15273_s1 + $0x48] sm:$0xf0]  ;;  %v6298_v22 = vor.u32 %v9408_v19, %v6297_v18  ;;  %v6441_v23 = vld [vmem:[%s15274_s3 + $0xe0] sm:$0xf]  ;;  %v9445_v24 = vld [vmem:[%s15274_s3 + $0xec] sm:$0xf0] }
   0x7   :  { %v6569_v25 = vld [vmem:[%s15274_s3 + $0x1e0] sm:$0xf]  ;;  %v6302_v26 = vor.u32 %v9407_v20, %v6299_v21  ;;  %v6289_v27 = vld [vmem:[%s15273_s1 + $0x30] sm:$0xf]  ;;  %v9406_v28 = vld [vmem:[%s15273_s1 + $0x34] sm:$0xf0]  ;;  %v6442_v29 = vor.u32 %v9445_v24, %v6441_v23 }
   0x8   :  { %136 = vmatpush.bf16.msra.mxu0 %v6314_v10  ;;  %v9477_v30 = vld [vmem:[%s15274_s3 + $0x1ec] sm:$0xf0]  ;;  %v9405_v31 = vld [vmem:[%s15273_s1 + $0x34] sm:$0xf]  ;;  %v6291_v32 = vld [vmem:[%s15273_s1 + $0x38] sm:$0xf0]  ;;  %v6290_v38 = vor.u32 %v9406_v28, %v6289_v27 }
   0x9   :  { %149 = vmatpush.bf16.msra.mxu1 %v6318_v11  ;;  %v6570_v33 = vor.u32 %v9477_v30, %v6569_v25  ;;  %v6425_v34 = vld [vmem:[%s15274_s3 + $0xc0] sm:$0xf]  ;;  %563 = vmatpush.bf16.msra.mxu2 %v6442_v29  ;;  %v9441_v35 = vld [vmem:[%s15274_s3 + $0xcc] sm:$0xf0]  ;;  %v9404_v40 = vld [vmem:[%s15273_s1 + $0x24] sm:$0xf0]  ;;  %v6294_v43 = vor.u32 %v9405_v31, %v6291_v32 }
   0xa   :  { %v6553_v36 = vld [vmem:[%s15274_s3 + $0x1c0] sm:$0xf]  ;;  %v9473_v37 = vld [vmem:[%s15274_s3 + $0x1cc] sm:$0xf0]  ;;  %v6426_v41 = vor.u32 %v9441_v35, %v6425_v34  ;;  %v9403_v44 = vld [vmem:[%s15273_s1 + $0x24] sm:$0xf] }
   0xb   :  { %v6281_v39 = vld [vmem:[%s15273_s1 + $0x20] sm:$0xf]  ;;  %576 = vmatpush.bf16.msra.mxu3 %v6570_v33  ;;  %v6554_v42 = vor.u32 %v9473_v37, %v6553_v36  ;;  %v9437_v46 = vld [vmem:[%s15274_s3 + $0xac] sm:$0xf0]  ;;  %v6283_v47 = vld [vmem:[%s15273_s1 + $0x28] sm:$0xf0] }
   0xc   :  { %137 = vmatpush.bf16.msra.mxu0 %v6306_v16  ;;  %v6409_v45 = vld [vmem:[%s15274_s3 + $0xa0] sm:$0xf]  ;;  %v9469_v49 = vld [vmem:[%s15274_s3 + $0x1ac] sm:$0xf0]  ;;  %v6282_v51 = vor.u32 %v9404_v40, %v6281_v39  ;;  %v6286_v56 = vor.u32 %v9403_v44, %v6283_v47  ;;  %v9402_v57 = vld [vmem:[%s15273_s1 + $0x14] sm:$0xf0] }
   0xd   :  { %150 = vmatpush.bf16.msra.mxu1 %v6310_v17  ;;  %v6537_v48 = vld [vmem:[%s15274_s3 + $0x1a0] sm:$0xf]  ;;  %564 = vmatpush.bf16.msra.mxu2 %v6426_v41  ;;  %v6410_v50 = vor.u32 %v9437_v46, %v6409_v45  ;;  %v6273_v52 = vld [vmem:[%s15273_s1 + $0x10] sm:$0xf]  ;;  %v9401_v60 = vld [vmem:[%s15273_s1 + $0x14] sm:$0xf] }
   0xe   :  { %v6538_v53 = vor.u32 %v9469_v49, %v6537_v48  ;;  %v6393_v54 = vld [vmem:[%s15274_s3 + $0x80] sm:$0xf]  ;;  %v9433_v55 = vld [vmem:[%s15274_s3 + $0x8c] sm:$0xf0]  ;;  %v6275_v61 = vld [vmem:[%s15273_s1 + $0x18] sm:$0xf0]  ;;  %v6274_v0 = vor.u32 %v9402_v57, %v6273_v52 }
   0xf   :  { %577 = vmatpush.bf16.msra.mxu3 %v6554_v42  ;;  %v6521_v58 = vld [vmem:[%s15274_s3 + $0x180] sm:$0xf]  ;;  %v9465_v59 = vld [vmem:[%s15274_s3 + $0x18c] sm:$0xf0]  ;;  %v6394_v63 = vor.u32 %v9433_v55, %v6393_v54  ;;  %v9400_v1 = vld [vmem:[%s15273_s1 + $0x4] sm:$0xf0]  ;;  %v6278_v5 = vor.u32 %v9401_v60, %v6275_v61 }
  0x10   :  { %138 = vmatpush.bf16.msra.mxu0 %v6298_v22  ;;  %v6265_v62 = vld [vmem:[%s15273_s1] sm:$0xf]  ;;  %v6522_v2 = vor.u32 %v9465_v59, %v6521_v58  ;;  %v9429_v4 = vld [vmem:[%s15274_s3 + $0x6c] sm:$0xf0]  ;;  %v9399_v6 = vld [vmem:[%s15273_s1 + $0x4] sm:$0xf] }
  0x11   :  { %151 = vmatpush.bf16.msra.mxu1 %v6302_v26  ;;  %565 = vmatpush.bf16.msra.mxu2 %v6410_v50  ;;  %v6377_v3 = vld [vmem:[%s15274_s3 + $0x60] sm:$0xf]  ;;  %v9461_v8 = vld [vmem:[%s15274_s3 + $0x16c] sm:$0xf0]  ;;  %v6267_v9 = vld [vmem:[%s15273_s1 + $0x8] sm:$0xf0]  ;;  %v6266_v15 = vor.u32 %v9400_v1, %v6265_v62 }
  0x12   :  { %v6505_v7 = vld [vmem:[%s15274_s3 + $0x160] sm:$0xf]  ;;  %v9443_v10 = vld [vmem:[%s15274_s3 + $0xe4] sm:$0xf]  ;;  %v6443_v11 = vld [vmem:[%s15274_s3 + $0xf0] sm:$0xf0]  ;;  %v6378_v14 = vor.u32 %v9429_v4, %v6377_v3  ;;  %v6270_v19 = vor.u32 %v9399_v6, %v6267_v9 }
  0x13   :  { %578 = vmatpush.bf16.msra.mxu3 %v6538_v53  ;;  %v9475_v12 = vld [vmem:[%s15274_s3 + $0x1e4] sm:$0xf]  ;;  %v6571_v13 = vld [vmem:[%s15274_s3 + $0x1f0] sm:$0xf0]  ;;  %v6506_v16 = vor.u32 %v9461_v8, %v6505_v7  ;;  %v6361_v17 = vld [vmem:[%s15274_s3 + $0x40] sm:$0xf]  ;;  %v6446_v20 = vor.u32 %v9443_v10, %v6443_v11 }
  0x14   :  { %139 = vmatpush.bf16.msra.mxu0 %v6290_v38  ;;  %v9425_v18 = vld [vmem:[%s15274_s3 + $0x4c] sm:$0xf0]  ;;  %v6489_v21 = vld [vmem:[%s15274_s3 + $0x140] sm:$0xf]  ;;  %v6574_v23 = vor.u32 %v9475_v12, %v6571_v13  ;;  %v9439_v24 = vld [vmem:[%s15274_s3 + $0xc4] sm:$0xf] }
  0x15   :  { %152 = vmatpush.bf16.msra.mxu1 %v6294_v43  ;;  %566 = vmatpush.bf16.msra.mxu2 %v6394_v63  ;;  %v9457_v22 = vld [vmem:[%s15274_s3 + $0x14c] sm:$0xf0]  ;;  %v6427_v25 = vld [vmem:[%s15274_s3 + $0xd0] sm:$0xf0]  ;;  %v9471_v26 = vld [vmem:[%s15274_s3 + $0x1c4] sm:$0xf]  ;;  %v6362_v28 = vor.u32 %v9425_v18, %v6361_v17 }
  0x16   :  { %v6555_v27 = vld [vmem:[%s15274_s3 + $0x1d0] sm:$0xf0]  ;;  %v32_v29 = vld [vmem:[%s15275_s0] sm:$0xf]  ;;  %v6490_v30 = vor.u32 %v9457_v22, %v6489_v21  ;;  %v9421_v32 = vld [vmem:[%s15274_s3 + $0x2c] sm:$0xf0]  ;;  %v6430_v33 = vor.u32 %v9439_v24, %v6427_v25 }
  0x17   :  { %579 = vmatpush.bf16.msra.mxu3 %v6522_v2  ;;  %v6345_v31 = vld [vmem:[%s15274_s3 + $0x20] sm:$0xf]  ;;  %v9453_v35 = vld [vmem:[%s15274_s3 + $0x12c] sm:$0xf0]  ;;  %v6558_v36 = vor.u32 %v9471_v26, %v6555_v27  ;;  %v9435_v37 = vld [vmem:[%s15274_s3 + $0xa4] sm:$0xf] }
  0x18   :  { %140 = vmatpush.bf16.msra.mxu0 %v6282_v51  ;;  %v6473_v34 = vld [vmem:[%s15274_s3 + $0x120] sm:$0xf]  ;;  %v6411_v38 = vld [vmem:[%s15274_s3 + $0xb0] sm:$0xf0]  ;;  %v9467_v39 = vld [vmem:[%s15274_s3 + $0x1a4] sm:$0xf]  ;;  %v6346_v41 = vor.u32 %v9421_v32, %v6345_v31 }
  0x19   :  { %153 = vmatpush.bf16.msra.mxu1 %v6286_v56  ;;  %567 = vmatpush.bf16.msra.mxu2 %v6378_v14  ;;  %v6539_v40 = vld [vmem:[%s15274_s3 + $0x1b0] sm:$0xf0]  ;;  %v9431_v42 = vld [vmem:[%s15274_s3 + $0x84] sm:$0xf]  ;;  %v6474_v43 = vor.u32 %v9453_v35, %v6473_v34  ;;  %v6329_v44 = vld [vmem:[%s15274_s3] sm:$0xf]  ;;  %v6414_v47 = vor.u32 %v9435_v37, %v6411_v38 }
  0x1a   :  { %v9417_v45 = vld [vmem:[%s15274_s3 + $0xc] sm:$0xf0]  ;;  %v6457_v46 = vld [vmem:[%s15274_s3 + $0x100] sm:$0xf]  ;;  %v6449_v49 = vld [vmem:[%s15274_s3 + $0xe8] sm:$0xf]  ;;  %v6542_v51 = vor.u32 %v9467_v39, %v6539_v40 }
  0x1b   :  { %580 = vmatpush.bf16.msra.mxu3 %v6506_v16  ;;  %v9449_v48 = vld [vmem:[%s15274_s3 + $0x10c] sm:$0xf0]  ;;  %v9446_v50 = vld [vmem:[%s15274_s3 + $0xf4] sm:$0xf0]  ;;  %v6395_v52 = vld [vmem:[%s15274_s3 + $0x90] sm:$0xf0]  ;;  %v6330_v57 = vor.u32 %v9417_v45, %v6329_v44 }
  0x1c   :  { %141 = vmatpush.bf16.msra.mxu0 %v6274_v0  ;;  %v6577_v53 = vld [vmem:[%s15274_s3 + $0x1e8] sm:$0xf]  ;;  %v9478_v54 = vld [vmem:[%s15274_s3 + $0x1f4] sm:$0xf0]  ;;  %v9463_v55 = vld [vmem:[%s15274_s3 + $0x184] sm:$0xf]  ;;  %v6458_v58 = vor.u32 %v9449_v48, %v6457_v46  ;;  %v6450_v59 = vor.u32 %v9446_v50, %v6449_v49  ;;  %v6398_v60 = vor.u32 %v9431_v42, %v6395_v52 }
  0x1d   :  { %154 = vmatpush.bf16.msra.mxu1 %v6278_v5  ;;  %568 = vmatpush.bf16.msra.mxu2 %v6362_v28  ;;  %v6523_v56 = vld [vmem:[%s15274_s3 + $0x190] sm:$0xf0]  ;;  %v9427_v61 = vld [vmem:[%s15274_s3 + $0x64] sm:$0xf]  ;;  %v6578_v62 = vor.u32 %v9478_v54, %v6577_v53  ;;  %v6433_v63 = vld [vmem:[%s15274_s3 + $0xc8] sm:$0xf] }
  0x1e   :  { %v9442_v0 = vld [vmem:[%s15274_s3 + $0xd4] sm:$0xf0]  ;;  %v6526_v1 = vor.u32 %v9463_v55, %v6523_v56  ;;  %v6379_v2 = vld [vmem:[%s15274_s3 + $0x70] sm:$0xf0]  ;;  %v6561_v3 = vld [vmem:[%s15274_s3 + $0x1c8] sm:$0xf] }
  0x1f   :  { %581 = vmatpush.bf16.msra.mxu3 %v6490_v30  ;;  %v9474_v4 = vld [vmem:[%s15274_s3 + $0x1d4] sm:$0xf0]  ;;  %v9459_v5 = vld [vmem:[%s15274_s3 + $0x164] sm:$0xf]  ;;  %v6507_v6 = vld [vmem:[%s15274_s3 + $0x170] sm:$0xf0]  ;;  %v6434_v7 = vor.u32 %v9442_v0, %v6433_v63  ;;  %v6382_v8 = vor.u32 %v9427_v61, %v6379_v2 }
  0x20   :  { %142 = vmatpush.bf16.msra.mxu0 %v6266_v15  ;;  %v6562_v9 = vor.u32 %v9474_v4, %v6561_v3  ;;  %v6510_v10 = vor.u32 %v9459_v5, %v6507_v6  ;;  %v9423_v11 = vld [vmem:[%s15274_s3 + $0x44] sm:$0xf]  ;;  %v6363_v12 = vld [vmem:[%s15274_s3 + $0x50] sm:$0xf0]  ;;  %v9444_v27 = vld [vmem:[%s15274_s3 + $0xec] sm:$0xf] }
  0x21   :  { %155 = vmatpush.bf16.msra.mxu1 %v6270_v19  ;;  %569 = vmatpush.bf16.msra.mxu2 %v6346_v41  ;;  %v9455_v13 = vld [vmem:[%s15274_s3 + $0x144] sm:$0xf]  ;;  %v6491_v14 = vld [vmem:[%s15274_s3 + $0x150] sm:$0xf0]  ;;  %v6366_v15 = vor.u32 %v9423_v11, %v6363_v12  ;;  %v6451_v28 = vld [vmem:[%s15274_s3 + $0xf8] sm:$0xf0] }
  0x22   :  { %v6494_v16 = vor.u32 %v9455_v13, %v6491_v14  ;;  %v9419_v17 = vld [vmem:[%s15274_s3 + $0x24] sm:$0xf]  ;;  %v6347_v18 = vld [vmem:[%s15274_s3 + $0x30] sm:$0xf0]  ;;  %v6579_v30 = vld [vmem:[%s15274_s3 + $0x1f8] sm:$0xf0] }
  0x23   :  { %143 = vmatmul.bf16.vlgmr.msra.gmra.mxu0 %v32_v29  ;;  %582 = vmatpush.bf16.msra.mxu3 %v6474_v43  ;;  %v9451_v19 = vld [vmem:[%s15274_s3 + $0x124] sm:$0xf]  ;;  %v6350_v21 = vor.u32 %v9419_v17, %v6347_v18  ;;  %v6331_v24 = vld [vmem:[%s15274_s3 + $0x10] sm:$0xf0]  ;;  %v9440_v35 = vld [vmem:[%s15274_s3 + $0xcc] sm:$0xf] }
  0x24   :  { %589 = vmatpush.bf16.msrb.mxu0 %v6446_v20  ;;  %156 = vmatmul.bf16.vlgmr.msra.gmra.mxu1 %v32_v29  ;;  %v6475_v20 = vld [vmem:[%s15274_s3 + $0x130] sm:$0xf0]  ;;  %v9447_v25 = vld [vmem:[%s15274_s3 + $0x104] sm:$0xf]  ;;  %v9476_v29 = vld [vmem:[%s15274_s3 + $0x1ec] sm:$0xf] }
  0x25   :  { %602 = vmatpush.bf16.msrb.mxu1 %v6574_v23  ;;  %570 = vmatpush.bf16.msra.mxu2 %v6330_v57  ;;  %v6478_v22 = vor.u32 %v9451_v19, %v6475_v20  ;;  %v9415_v23 = vld [vmem:[%s15274_s3 + $0x4] sm:$0xf]  ;;  %v6459_v26 = vld [vmem:[%s15274_s3 + $0x110] sm:$0xf0]  ;;  %v6582_v34 = vor.u32 %v9476_v29, %v6579_v30  ;;  %v9472_v37 = vld [vmem:[%s15274_s3 + $0x1cc] sm:$0xf] }
  0x26   :  { %v6334_v31 = vor.u32 %v9415_v23, %v6331_v24  ;;  %v6462_v32 = vor.u32 %v9447_v25, %v6459_v26  ;;  %v6563_v38 = vld [vmem:[%s15274_s3 + $0x1d8] sm:$0xf0]  ;;  %v6417_v41 = vld [vmem:[%s15274_s3 + $0xa8] sm:$0xf]  ;;  %v9438_v42 = vld [vmem:[%s15274_s3 + $0xb4] sm:$0xf0] }
  0x27   :  { %583 = vmatpush.bf16.msra.mxu3 %v6458_v58  ;;  %v6566_v40 = vor.u32 %v9472_v37, %v6563_v38  ;;  %v6545_v43 = vld [vmem:[%s15274_s3 + $0x1a8] sm:$0xf]  ;;  %v6418_v44 = vor.u32 %v9438_v42, %v6417_v41  ;;  %v9470_v45 = vld [vmem:[%s15274_s3 + $0x1b4] sm:$0xf0]  ;;  %v9436_v46 = vld [vmem:[%s15274_s3 + $0xac] sm:$0xf] }
  0x28   :  { %590 = vmatpush.bf16.msrb.mxu0 %v6430_v33  ;;  %v6454_v33 = vor.u32 %v9444_v27, %v6451_v28  ;;  %v6419_v48 = vld [vmem:[%s15274_s3 + $0xb8] sm:$0xf0]  ;;  %v9468_v49 = vld [vmem:[%s15274_s3 + $0x1ac] sm:$0xf]  ;;  %v6401_v53 = vld [vmem:[%s15274_s3 + $0x88] sm:$0xf] }
  0x29   :  { %603 = vmatpush.bf16.msrb.mxu1 %v6558_v36  ;;  %615 = vmatpush.bf16.msrb.mxu2 %v6450_v59  ;;  %v6435_v36 = vld [vmem:[%s15274_s3 + $0xd8] sm:$0xf0]  ;;  %v9434_v54 = vld [vmem:[%s15274_s3 + $0x94] sm:$0xf0]  ;;  %v6529_v55 = vld [vmem:[%s15274_s3 + $0x188] sm:$0xf] }
  0x2a   :  { %v6438_v39 = vor.u32 %v9440_v35, %v6435_v36  ;;  %v6547_v50 = vld [vmem:[%s15274_s3 + $0x1b8] sm:$0xf0]  ;;  %v6402_v56 = vor.u32 %v9434_v54, %v6401_v53  ;;  %v9466_v57 = vld [vmem:[%s15274_s3 + $0x194] sm:$0xf0]  ;;  %v9432_v58 = vld [vmem:[%s15274_s3 + $0x8c] sm:$0xf] }
  0x2b   :  { %628 = vmatpush.bf16.msrb.mxu3 %v6578_v62  ;;  %v6550_v52 = vor.u32 %v9468_v49, %v6547_v50  ;;  %v6403_v59 = vld [vmem:[%s15274_s3 + $0x98] sm:$0xf0]  ;;  %v9464_v62 = vld [vmem:[%s15274_s3 + $0x18c] sm:$0xf]  ;;  %v9430_v2 = vld [vmem:[%s15274_s3 + $0x74] sm:$0xf0] }
  0x2c   :  { %591 = vmatpush.bf16.msrb.mxu0 %v6414_v47  ;;  %v6546_v47 = vor.u32 %v9470_v45, %v6545_v43  ;;  %v6406_v61 = vor.u32 %v9432_v58, %v6403_v59  ;;  %v6531_v63 = vld [vmem:[%s15274_s3 + $0x198] sm:$0xf0]  ;;  %v6513_v3 = vld [vmem:[%s15274_s3 + $0x168] sm:$0xf]  ;;  %v9462_v5 = vld [vmem:[%s15274_s3 + $0x174] sm:$0xf0] }
  0x2d   :  { %604 = vmatpush.bf16.msrb.mxu1 %v6542_v51  ;;  %616 = vmatpush.bf16.msrb.mxu2 %v6434_v7  ;;  %v6422_v51 = vor.u32 %v9436_v46, %v6419_v48  ;;  %v6534_v0 = vor.u32 %v9464_v62, %v6531_v63  ;;  %v9428_v6 = vld [vmem:[%s15274_s3 + $0x6c] sm:$0xf]  ;;  %v6387_v7 = vld [vmem:[%s15274_s3 + $0x78] sm:$0xf0]  ;;  %v6369_v12 = vld [vmem:[%s15274_s3 + $0x48] sm:$0xf] }
  0x2e   :  { %v6515_v11 = vld [vmem:[%s15274_s3 + $0x178] sm:$0xf0]  ;;  %v9426_v14 = vld [vmem:[%s15274_s3 + $0x54] sm:$0xf0]  ;;  %v9424_v19 = vld [vmem:[%s15274_s3 + $0x4c] sm:$0xf] }
  0x2f   :  { %629 = vmatpush.bf16.msrb.mxu3 %v6562_v9  ;;  %v6390_v9 = vor.u32 %v9428_v6, %v6387_v7  ;;  %v6370_v17 = vor.u32 %v9426_v14, %v6369_v12  ;;  %v6371_v20 = vld [vmem:[%s15274_s3 + $0x58] sm:$0xf0]  ;;  %v6353_v24 = vld [vmem:[%s15274_s3 + $0x28] sm:$0xf]  ;;  %v9422_v25 = vld [vmem:[%s15274_s3 + $0x34] sm:$0xf0] }
  0x30   :  { %592 = vmatpush.bf16.msrb.mxu0 %v6398_v60  ;;  %v6530_v60 = vor.u32 %v9466_v57, %v6529_v55  ;;  %v6499_v23 = vld [vmem:[%s15274_s3 + $0x158] sm:$0xf0]  ;;  %v6481_v27 = vld [vmem:[%s15274_s3 + $0x128] sm:$0xf]  ;;  %v9454_v28 = vld [vmem:[%s15274_s3 + $0x134] sm:$0xf0]  ;;  %v6354_v30 = vor.u32 %v9422_v25, %v6353_v24 }
  0x31   :  { %605 = vmatpush.bf16.msrb.mxu1 %v6526_v1  ;;  %617 = vmatpush.bf16.msrb.mxu2 %v6418_v44  ;;  %v6385_v1 = vld [vmem:[%s15274_s3 + $0x68] sm:$0xf]  ;;  %v9420_v29 = vld [vmem:[%s15274_s3 + $0x2c] sm:$0xf]  ;;  %v9418_v36 = vld [vmem:[%s15274_s3 + $0x14] sm:$0xf0] }
  0x32   :  { %v6386_v4 = vor.u32 %v9430_v2, %v6385_v1  ;;  %v6337_v35 = vld [vmem:[%s15274_s3 + $0x8] sm:$0xf]  ;;  %v9416_v41 = vld [vmem:[%s15274_s3 + $0xc] sm:$0xf]  ;;  %v6339_v42 = vld [vmem:[%s15274_s3 + $0x18] sm:$0xf0] }
  0x33   :  { %630 = vmatpush.bf16.msrb.mxu3 %v6546_v47  ;;  %v9448_v43 = vld [vmem:[%s15274_s3 + $0x10c] sm:$0xf]  ;;  %v6467_v44 = vld [vmem:[%s15274_s3 + $0x118] sm:$0xf0]  ;;  %v6338_v45 = vor.u32 %v9418_v36, %v6337_v35  ;;  %v6342_v47 = vor.u32 %v9416_v41, %v6339_v42  ;;  %v49_v49 = vld [vmem:[%s15276_s2] sm:$0x3] }
  0x34   :  { %593 = vmatpush.bf16.msrb.mxu0 %v6382_v8  ;;  %v6514_v8 = vor.u32 %v9462_v5, %v6513_v3  ;;  %v6470_v48 = vor.u32 %v9448_v43, %v6467_v44  ;;  %v51_v50 = vperm.slane %v49_v49, 0  ;;  %v7065_v55 = vld [vmem:[%s15277_s5 + $0x3c0] sm:$0xf] }
  0x35   :  { %606 = vmatpush.bf16.msrb.mxu1 %v6510_v10  ;;  %618 = vmatpush.bf16.msrb.mxu2 %v6402_v56  ;;  %v9460_v10 = vld [vmem:[%s15274_s3 + $0x16c] sm:$0xf]  ;;  %v9603_v56 = vld [vmem:[%s15277_s5 + $0x3dc] sm:$0xf0] }
  0x36   :  { %v6518_v13 = vor.u32 %v9460_v10, %v6515_v11  ;;  %v6809_v57 = vld [vmem:[%s15277_s5 + $0x1c0] sm:$0xf]  ;;  %v7066_v5 = vor.u32 %v9603_v56, %v7065_v55 }
  0x37   :  { %631 = vmatpush.bf16.msrb.mxu3 %v6530_v60  ;;  %v9539_v59 = vld [vmem:[%s15277_s5 + $0x1dc] sm:$0xf0] }
  0x38   :  { %594 = vmatpush.bf16.msrb.mxu0 %v6366_v15  ;;  %v6497_v15 = vld [vmem:[%s15274_s3 + $0x148] sm:$0xf]  ;;  %v7577_v60 = vld [vmem:[%s15277_s5 + $0x7c0] sm:$0xf] }
  0x39   :  { %607 = vmatpush.bf16.msrb.mxu1 %v6494_v16  ;;  %619 = vmatpush.bf16.msrb.mxu2 %v6386_v4  ;;  %v9458_v16 = vld [vmem:[%s15274_s3 + $0x154] sm:$0xf0]  ;;  %v7321_v63 = vld [vmem:[%s15277_s5 + $0x5c0] sm:$0xf] }
  0x3a   :  { %v6498_v18 = vor.u32 %v9458_v16, %v6497_v15  ;;  %v9667_v1 = vld [vmem:[%s15277_s5 + $0x5dc] sm:$0xf0] }
  0x3b   :  { %632 = vmatpush.bf16.msrb.mxu3 %v6514_v8  ;;  %v7033_v6 = vld [vmem:[%s15277_s5 + $0x380] sm:$0xf]  ;;  %v6810_v8 = vor.u32 %v9539_v59, %v6809_v57  ;;  %v7322_v14 = vor.u32 %v9667_v1, %v7321_v63 }
  0x3c   :  { %595 = vmatpush.bf16.msrb.mxu0 %v6350_v21  ;;  %v9456_v21 = vld [vmem:[%s15274_s3 + $0x14c] sm:$0xf]  ;;  %v9595_v7 = vld [vmem:[%s15277_s5 + $0x39c] sm:$0xf0] }
  0x3d   :  { %608 = vmatpush.bf16.msrb.mxu1 %v6478_v22  ;;  %v6374_v22 = vor.u32 %v9424_v19, %v6371_v20  ;;  %v6502_v26 = vor.u32 %v9456_v21, %v6499_v23  ;;  %620 = vmatpush.bf16.msrb.mxu2 %v6370_v17  ;;  %v6777_v10 = vld [vmem:[%s15277_s5 + $0x180] sm:$0xf]  ;;  %v7034_v20 = vor.u32 %v9595_v7, %v7033_v6 }
  0x3e   :  { %v9531_v11 = vld [vmem:[%s15277_s5 + $0x19c] sm:$0xf0] }
  0x3f   :  { %633 = vmatpush.bf16.msrb.mxu3 %v6498_v18  ;;  %v9723_v16 = vld [vmem:[%s15277_s5 + $0x79c] sm:$0xf0]  ;;  %v6778_v23 = vor.u32 %v9531_v11, %v6777_v10 }
  0x40   :  { %596 = vmatpush.bf16.msrb.mxu0 %v6334_v31  ;;  %v6355_v31 = vld [vmem:[%s15274_s3 + $0x38] sm:$0xf0]  ;;  %v7289_v17 = vld [vmem:[%s15277_s5 + $0x580] sm:$0xf] }
  0x41   :  { %609 = vmatpush.bf16.msrb.mxu1 %v6462_v32  ;;  %v9452_v32 = vld [vmem:[%s15274_s3 + $0x12c] sm:$0xf]  ;;  %v6358_v37 = vor.u32 %v9420_v29, %v6355_v31  ;;  %621 = vmatpush.bf16.msrb.mxu2 %v6354_v30  ;;  %v9659_v18 = vld [vmem:[%s15277_s5 + $0x59c] sm:$0xf0] }
  0x42   :  { %v7001_v21 = vld [vmem:[%s15277_s5 + $0x340] sm:$0xf] }
  0x43   :  { %v6745_v24 = vld [vmem:[%s15277_s5 + $0x140] sm:$0xf] }
  0x44   :  { %641 = vmatpush.bf16.msra.mxu0 %v6454_v33  ;;  %v6483_v33 = vld [vmem:[%s15274_s3 + $0x138] sm:$0xf0]  ;;  %v9523_v25 = vld [vmem:[%s15277_s5 + $0x15c] sm:$0xf0] }
  0x45   :  { %654 = vmatpush.bf16.msra.mxu1 %v6582_v34  ;;  %v6482_v34 = vor.u32 %v9454_v28, %v6481_v27  ;;  %v6486_v38 = vor.u32 %v9452_v32, %v6483_v33  ;;  %622 = vmatpush.bf16.msrb.mxu2 %v6338_v45  ;;  %v7513_v27 = vld [vmem:[%s15277_s5 + $0x740] sm:$0xf]  ;;  %v7290_v28 = vor.u32 %v9659_v18, %v7289_v17 }
  0x46   :  { %v9715_v29 = vld [vmem:[%s15277_s5 + $0x75c] sm:$0xf0]  ;;  %v6746_v35 = vor.u32 %v9523_v25, %v6745_v24  ;;  %v7067_v25 = vld [vmem:[%s15277_s5 + $0x3e0] sm:$0xf0] }
  0x47   :  { %634 = vmatpush.bf16.msrb.mxu3 %v6482_v34  ;;  %v7257_v30 = vld [vmem:[%s15277_s5 + $0x540] sm:$0xf] }
  0x48   :  { %642 = vmatpush.bf16.msra.mxu0 %v6438_v39  ;;  %v6465_v39 = vld [vmem:[%s15274_s3 + $0x108] sm:$0xf]  ;;  %v9651_v31 = vld [vmem:[%s15277_s5 + $0x55c] sm:$0xf0] }
  0x49   :  { %655 = vmatpush.bf16.msra.mxu1 %v6566_v40  ;;  %v9450_v40 = vld [vmem:[%s15274_s3 + $0x114] sm:$0xf0]  ;;  %v6969_v33 = vld [vmem:[%s15277_s5 + $0x300] sm:$0xf] }
  0x4a   :  { %v6466_v46 = vor.u32 %v9450_v40, %v6465_v39  ;;  %v9579_v34 = vld [vmem:[%s15277_s5 + $0x31c] sm:$0xf0]  ;;  %v7258_v40 = vor.u32 %v9651_v31, %v7257_v30 }
  0x4b   :  { %v6713_v36 = vld [vmem:[%s15277_s5 + $0x100] sm:$0xf]  ;;  %v6970_v44 = vor.u32 %v9579_v34, %v6969_v33  ;;  %v7579_v33 = vld [vmem:[%s15277_s5 + $0x7e0] sm:$0xf0] }
  0x4c   :  { %643 = vmatpush.bf16.msra.mxu0 %v6422_v51  ;;  %635 = vmatpush.bf16.msrb.mxu3 %v6466_v46  ;;  %v52_v51 = vperm.slane %v49_v49, 1  ;;  %v7481_v39 = vld [vmem:[%s15277_s5 + $0x700] sm:$0xf] }
  0x4d   :  { %656 = vmatpush.bf16.msra.mxu1 %v6550_v52  ;;  %v9707_v41 = vld [vmem:[%s15277_s5 + $0x71c] sm:$0xf0] }
  0x4e   :  { %v7225_v42 = vld [vmem:[%s15277_s5 + $0x500] sm:$0xf] }
  0x4f   :  { %v9643_v43 = vld [vmem:[%s15277_s5 + $0x51c] sm:$0xf0] }
  0x50   :  { %644 = vmatpush.bf16.msra.mxu0 %v6406_v61  ;;  %v9731_v61 = vld [vmem:[%s15277_s5 + $0x7dc] sm:$0xf0] }
  0x51   :  { %657 = vmatpush.bf16.msra.mxu1 %v6534_v0  ;;  %v7578_v12 = vor.u32 %v9731_v61, %v7577_v60  ;;  %v6937_v45 = vld [vmem:[%s15277_s5 + $0x2c0] sm:$0xf] }
  0x52   :  { %v9571_v46 = vld [vmem:[%s15277_s5 + $0x2dc] sm:$0xf0] }
  0x53   :  { %v9507_v49 = vld [vmem:[%s15277_s5 + $0xdc] sm:$0xf0]  ;;  %v6938_v56 = vor.u32 %v9571_v46, %v6937_v45  ;;  %v7003_v45 = vld [vmem:[%s15277_s5 + $0x360] sm:$0xf0] }
  0x54   :  { %645 = vmatpush.bf16.msra.mxu0 %v6390_v9  ;;  %v9635_v55 = vld [vmem:[%s15277_s5 + $0x4dc] sm:$0xf0]  ;;  %v9519_v46 = vld [vmem:[%s15277_s5 + $0x144] sm:$0xf] }
  0x55   :  { %658 = vmatpush.bf16.msra.mxu1 %v6518_v13  ;;  %v7545_v13 = vld [vmem:[%s15277_s5 + $0x780] sm:$0xf] }
  0x56   :  { %v6905_v57 = vld [vmem:[%s15277_s5 + $0x280] sm:$0xf] }
  0x57   :  { %v6649_v60 = vld [vmem:[%s15277_s5 + $0x80] sm:$0xf] }
  0x58   :  { %646 = vmatpush.bf16.msra.mxu0 %v6374_v22  ;;  %v9587_v22 = vld [vmem:[%s15277_s5 + $0x35c] sm:$0xf0] }
  0x59   :  { %659 = vmatpush.bf16.msra.mxu1 %v6502_v26  ;;  %v7546_v26 = vor.u32 %v9723_v16, %v7545_v13  ;;  %v7002_v32 = vor.u32 %v9587_v22, %v7001_v21  ;;  %v9499_v61 = vld [vmem:[%s15277_s5 + $0x9c] sm:$0xf0] }
  0x5a   :  { %v7417_v63 = vld [vmem:[%s15277_s5 + $0x680] sm:$0xf]  ;;  %v6650_v7 = vor.u32 %v9499_v61, %v6649_v60  ;;  %v6907_v60 = vld [vmem:[%s15277_s5 + $0x2a0] sm:$0xf0] }
  0x5b   :  { %v9691_v1 = vld [vmem:[%s15277_s5 + $0x69c] sm:$0xf0]  ;;  %v9719_v61 = vld [vmem:[%s15277_s5 + $0x784] sm:$0xf] }
  0x5c   :  { %647 = vmatpush.bf16.msra.mxu0 %v6358_v37  ;;  %v9515_v37 = vld [vmem:[%s15277_s5 + $0x11c] sm:$0xf0]  ;;  %v7418_v10 = vor.u32 %v9691_v1, %v7417_v63  ;;  %v7547_v63 = vld [vmem:[%s15277_s5 + $0x7a0] sm:$0xf0] }
  0x5d   :  { %660 = vmatpush.bf16.msra.mxu1 %v6486_v38  ;;  %v7514_v38 = vor.u32 %v9715_v29, %v7513_v27  ;;  %v9555_v6 = vld [vmem:[%s15277_s5 + $0x25c] sm:$0xf0]  ;;  %v6811_v27 = vld [vmem:[%s15277_s5 + $0x1e0] sm:$0xf0] }
  0x5e   :  { %v7385_v11 = vld [vmem:[%s15277_s5 + $0x640] sm:$0xf] }
  0x5f   :  { %v9683_v13 = vld [vmem:[%s15277_s5 + $0x65c] sm:$0xf0] }
  0x60   :  { %648 = vmatpush.bf16.msra.mxu0 %v6342_v47  ;;  %v6714_v47 = vor.u32 %v9515_v37, %v6713_v36  ;;  %v6841_v17 = vld [vmem:[%s15277_s5 + $0x200] sm:$0xf]  ;;  %v7035_v37 = vld [vmem:[%s15277_s5 + $0x3a0] sm:$0xf0] }
  0x61   :  { %661 = vmatpush.bf16.msra.mxu1 %v6470_v48  ;;  %v6681_v48 = vld [vmem:[%s15277_s5 + $0xc0] sm:$0xf] }
  0x62   :  { %v6682_v59 = vor.u32 %v9507_v49, %v6681_v48  ;;  %v9547_v18 = vld [vmem:[%s15277_s5 + $0x21c] sm:$0xf0]  ;;  %v9575_v49 = vld [vmem:[%s15277_s5 + $0x304] sm:$0xf] }
  0x63   :  { %v6585_v21 = vld [vmem:[%s15277_s5] sm:$0xf]  ;;  %v6842_v30 = vor.u32 %v9547_v18, %v6841_v17  ;;  %v6651_v17 = vld [vmem:[%s15277_s5 + $0xa0] sm:$0xf0] }
  0x64   :  { %v9483_v22 = vld [vmem:[%s15277_s5 + $0x1c] sm:$0xf0]  ;;  %v9655_v18 = vld [vmem:[%s15277_s5 + $0x584] sm:$0xf] }
  0x65   :  { %v9675_v29 = vld [vmem:[%s15277_s5 + $0x61c] sm:$0xf0]  ;;  %v6586_v31 = vor.u32 %v9483_v22, %v6585_v21  ;;  %v9543_v22 = vld [vmem:[%s15277_s5 + $0x204] sm:$0xf] }
  0x66   :  { %v9611_v1 = vld [vmem:[%s15277_s5 + $0x41c] sm:$0xf0] }
  0xa0   :  { %v144_v52 = vpop.f32.mrf.mxu0 }
  0xa1   :  { %v145_v53 = vadd.f32 %v144_v52, %v51_v50  ;;  %v157_v54 = vpop.f32.mrf.mxu1  ;;  %v7482_v50 = vor.u32 %v9707_v41, %v7481_v39  ;;  %v7226_v52 = vor.u32 %v9643_v43, %v7225_v42  ;;  %v6779_v39 = vld [vmem:[%s15277_s5 + $0x1a0] sm:$0xf0] }
  0xa2   :  { %v158_v58 = vadd.f32 %v157_v54, %v52_v51  ;;  %v7449_v51 = vld [vmem:[%s15277_s5 + $0x6c0] sm:$0xf]  ;;  %v9583_v43 = vld [vmem:[%s15277_s5 + $0x344] sm:$0xf] }
  0xa3   :  { %vm161_vm0 = vcmp.ge.f32.partialorder %v145_v53, 0.0  ;;  %v163_v62 = vmul.f32 0.2, %v145_v53  ;;  %v7193_v54 = vld [vmem:[%s15277_s5 + $0x4c0] sm:$0xf]  ;;  %v7006_v48 = vor.u32 %v9583_v43, %v7003_v45 }
  0xa4   :  { %vm162_vm1 = vcmp.ge.f32.partialorder %v158_v58, 0.0  ;;  %v164_v0 = vmul.f32 0.2, %v158_v58  ;;  %v9687_v43 = vld [vmem:[%s15277_s5 + $0x684] sm:$0xf] }
  0xa5   :  { %v165_v2 = vsel %vm161_vm0, %v145_v53, %v163_v62  ;;  %v9699_v53 = vld [vmem:[%s15277_s5 + $0x6dc] sm:$0xf0] }
  0xa6   :  { %v10760_v3 = vpack.c.bf16 %v165_v2, %v165_v2  ;;  %v166_v4 = vsel %vm162_vm1, %v158_v58, %v164_v0  ;;  %v9563_v58 = vld [vmem:[%s15277_s5 + $0x29c] sm:$0xf0]  ;;  %v7450_v62 = vor.u32 %v9699_v53, %v7449_v51  ;;  %v7194_v0 = vor.u32 %v9635_v55, %v7193_v54  ;;  %v6971_v51 = vld [vmem:[%s15277_s5 + $0x320] sm:$0xf0] }
  0xa7   :  { %v10768_v9 = vpack.c.bf16 %v166_v4, %v166_v4  ;;  %v7161_v2 = vld [vmem:[%s15277_s5 + $0x480] sm:$0xf]  ;;  %v6715_v53 = vld [vmem:[%s15277_s5 + $0x120] sm:$0xf0]  ;;  %v6974_v54 = vor.u32 %v9575_v49, %v6971_v51 }
  0xa8   :  { %v146_v15 = vpop.f32.mrf.mxu0  ;;  %571 = vmatmul.bf16.vlgmr.msra.gmra.mxu2 %v10760_v3  ;;  %597 = vmatmul.bf16.vlgmr.msrb.gmra.mxu0 %v10760_v3  ;;  %v9627_v4 = vld [vmem:[%s15277_s5 + $0x49c] sm:$0xf0]  ;;  %v9679_v49 = vld [vmem:[%s15277_s5 + $0x644] sm:$0xf] }
  0xa9   :  { %v159_v19 = vpop.f32.mrf.mxu1  ;;  %584 = vmatmul.bf16.vlgmr.msra.gmra.mxu3 %v10768_v9  ;;  %610 = vmatmul.bf16.vlgmr.msrb.gmra.mxu1 %v10768_v9  ;;  %v9619_v15 = vld [vmem:[%s15277_s5 + $0x45c] sm:$0xf0] }
  0xaa   :  { %2250 = vmatpush.bf16.msra.mxu3 %v7066_v5  ;;  %2237 = vmatpush.bf16.msra.mxu2 %v6810_v8  ;;  %v6906_v5 = vor.u32 %v9563_v58, %v6905_v57  ;;  %v6617_v8 = vld [vmem:[%s15277_s5 + $0x40] sm:$0xf]  ;;  %v6939_v57 = vld [vmem:[%s15277_s5 + $0x2e0] sm:$0xf0] }
  0xab   :  { %2276 = vmatpush.bf16.msrb.mxu1 %v7578_v12  ;;  %2263 = vmatpush.bf16.msrb.mxu0 %v7322_v14  ;;  %v7162_v12 = vor.u32 %v9627_v4, %v7161_v2  ;;  %v7129_v14 = vld [vmem:[%s15277_s5 + $0x440] sm:$0xf]  ;;  %v7550_v2 = vor.u32 %v9719_v61, %v7547_v63  ;;  %v9607_v63 = vld [vmem:[%s15277_s5 + $0x404] sm:$0xf] }
  0xac   :  { %v7130_v24 = vor.u32 %v9619_v15, %v7129_v14  ;;  %v7515_v14 = vld [vmem:[%s15277_s5 + $0x760] sm:$0xf0] }
  0xae   :  { %2251 = vmatpush.bf16.msra.mxu3 %v7034_v20  ;;  %2238 = vmatpush.bf16.msra.mxu2 %v6778_v23  ;;  %v9599_v20 = vld [vmem:[%s15277_s5 + $0x3c4] sm:$0xf]  ;;  %v7386_v23 = vor.u32 %v9683_v13, %v7385_v11 }
  0xaf   :  { %2277 = vmatpush.bf16.msrb.mxu1 %v7546_v26  ;;  %2264 = vmatpush.bf16.msrb.mxu0 %v7290_v28  ;;  %v9535_v26 = vld [vmem:[%s15277_s5 + $0x1c4] sm:$0xf]  ;;  %v7353_v28 = vld [vmem:[%s15277_s5 + $0x600] sm:$0xf]  ;;  %v7070_v34 = vor.u32 %v9599_v20, %v7067_v25 }
  0xb0   :  { %v6814_v36 = vor.u32 %v9535_v26, %v6811_v27  ;;  %v6875_v11 = vld [vmem:[%s15277_s5 + $0x260] sm:$0xf0] }
  0xb1   :  { %v7291_v20 = vld [vmem:[%s15277_s5 + $0x5a0] sm:$0xf0] }
  0xb2   :  { %2252 = vmatpush.bf16.msra.mxu3 %v7002_v32  ;;  %2239 = vmatpush.bf16.msra.mxu2 %v6746_v35  ;;  %v9727_v32 = vld [vmem:[%s15277_s5 + $0x7c4] sm:$0xf]  ;;  %v7294_v21 = vor.u32 %v9655_v18, %v7291_v20  ;;  %v9596_v18 = vld [vmem:[%s15277_s5 + $0x3a4] sm:$0xf0] }
  0xb3   :  { %2278 = vmatpush.bf16.msrb.mxu1 %v7514_v38  ;;  %2265 = vmatpush.bf16.msrb.mxu0 %v7258_v40  ;;  %v9591_v35 = vld [vmem:[%s15277_s5 + $0x384] sm:$0xf]  ;;  %v7354_v40 = vor.u32 %v9675_v29, %v7353_v28  ;;  %v7582_v41 = vor.u32 %v9727_v32, %v7579_v33 }
  0xb4   :  { %v9527_v38 = vld [vmem:[%s15277_s5 + $0x184] sm:$0xf]  ;;  %v7038_v42 = vor.u32 %v9591_v35, %v7035_v37 }
  0xb5   :  { %v7483_v26 = vld [vmem:[%s15277_s5 + $0x720] sm:$0xf0] }
  0xb6   :  { %2253 = vmatpush.bf16.msra.mxu3 %v6970_v44  ;;  %2240 = vmatpush.bf16.msra.mxu2 %v6714_v47  ;;  %v6782_v44 = vor.u32 %v9527_v38, %v6779_v39  ;;  %v6747_v47 = vld [vmem:[%s15277_s5 + $0x160] sm:$0xf0] }
  0xb7   :  { %2279 = vmatpush.bf16.msrb.mxu1 %v7482_v50  ;;  %2266 = vmatpush.bf16.msrb.mxu0 %v7226_v52  ;;  %v6750_v50 = vor.u32 %v9519_v46, %v6747_v47  ;;  %v9511_v52 = vld [vmem:[%s15277_s5 + $0x104] sm:$0xf] }
  0xb8   :  { %623 = vmatmul.bf16.vlgmr.msrb.gmra.mxu2 %v10760_v3  ;;  %649 = vmatmul.bf16.vlgmr.msra.gmra.mxu0 %v10760_v3  ;;  %v6873_v3 = vld [vmem:[%s15277_s5 + $0x240] sm:$0xf]  ;;  %v6718_v55 = vor.u32 %v9511_v52, %v6715_v53  ;;  %v9487_v28 = vld [vmem:[%s15277_s5 + $0x44] sm:$0xf] }
  0xb9   :  { %636 = vmatmul.bf16.vlgmr.msrb.gmra.mxu3 %v10768_v9  ;;  %662 = vmatmul.bf16.vlgmr.msra.gmra.mxu1 %v10768_v9  ;;  %v9491_v9 = vld [vmem:[%s15277_s5 + $0x5c] sm:$0xf0]  ;;  %v6874_v16 = vor.u32 %v9555_v6, %v6873_v3  ;;  %v6683_v3 = vld [vmem:[%s15277_s5 + $0xe0] sm:$0xf0] }
  0xba   :  { %2254 = vmatpush.bf16.msra.mxu3 %v6938_v56  ;;  %2241 = vmatpush.bf16.msra.mxu2 %v6682_v59  ;;  %v6618_v19 = vor.u32 %v9491_v9, %v6617_v8  ;;  %v9567_v56 = vld [vmem:[%s15277_s5 + $0x2c4] sm:$0xf] }
  0xbb   :  { %2280 = vmatpush.bf16.msrb.mxu1 %v7450_v62  ;;  %2267 = vmatpush.bf16.msrb.mxu0 %v7194_v0  ;;  %v6942_v58 = vor.u32 %v9567_v56, %v6939_v57  ;;  %v9559_v59 = vld [vmem:[%s15277_s5 + $0x284] sm:$0xf]  ;;  %v7097_v0 = vld [vmem:[%s15277_s5 + $0x400] sm:$0xf] }
  0xbc   :  { %v6910_v62 = vor.u32 %v9559_v59, %v6907_v60  ;;  %v7098_v4 = vor.u32 %v9611_v1, %v7097_v0  ;;  %v9663_v6 = vld [vmem:[%s15277_s5 + $0x5c4] sm:$0xf]  ;;  %v11129_v60 = vld [vmem:[%s15278_s4] sm:$0xf] }
  0xbd   :  { %v7323_v8 = vld [vmem:[%s15277_s5 + $0x5e0] sm:$0xf0] }
  0xbe   :  { %2255 = vmatpush.bf16.msra.mxu3 %v6906_v5  ;;  %2242 = vmatpush.bf16.msra.mxu2 %v6650_v7  ;;  %v9503_v5 = vld [vmem:[%s15277_s5 + $0xc4] sm:$0xf]  ;;  %v7326_v9 = vor.u32 %v9663_v6, %v7323_v8  ;;  %v235_v6 = vperm.slane %v11129_v60, 0  ;;  %v9604_v8 = vld [vmem:[%s15277_s5 + $0x3e4] sm:$0xf0] }
  0xbf   :  { %2281 = vmatpush.bf16.msrb.mxu1 %v7418_v10  ;;  %2268 = vmatpush.bf16.msrb.mxu0 %v7162_v12  ;;  %v6686_v7 = vor.u32 %v9503_v5, %v6683_v3  ;;  %v9551_v10 = vld [vmem:[%s15277_s5 + $0x244] sm:$0xf] }
  0xc0   :  { %v9711_v12 = vld [vmem:[%s15277_s5 + $0x744] sm:$0xf]  ;;  %v6878_v13 = vor.u32 %v9551_v10, %v6875_v11 }
  0xc1   :  { %v7518_v15 = vor.u32 %v9711_v12, %v7515_v14  ;;  %v6619_v29 = vld [vmem:[%s15277_s5 + $0x60] sm:$0xf0] }
  0xc2   :  { %2256 = vmatpush.bf16.msra.mxu3 %v6874_v16  ;;  %2243 = vmatpush.bf16.msra.mxu2 %v6618_v19  ;;  %v9495_v16 = vld [vmem:[%s15277_s5 + $0x84] sm:$0xf] }
  0xc3   :  { %2282 = vmatpush.bf16.msrb.mxu1 %v7386_v23  ;;  %2269 = vmatpush.bf16.msrb.mxu0 %v7130_v24  ;;  %v6654_v19 = vor.u32 %v9495_v16, %v6651_v17  ;;  %v6843_v23 = vld [vmem:[%s15277_s5 + $0x220] sm:$0xf0]  ;;  %v7041_v17 = vld [vmem:[%s15277_s5 + $0x388] sm:$0xf] }
  0xc4   :  { %v9703_v24 = vld [vmem:[%s15277_s5 + $0x704] sm:$0xf]  ;;  %v6846_v25 = vor.u32 %v9543_v22, %v6843_v23  ;;  %v9540_v22 = vld [vmem:[%s15277_s5 + $0x1e4] sm:$0xf0] }
  0xc5   :  { %v7486_v27 = vor.u32 %v9703_v24, %v7483_v26  ;;  %v7259_v32 = vld [vmem:[%s15277_s5 + $0x560] sm:$0xf0]  ;;  %v7042_v24 = vor.u32 %v9596_v18, %v7041_v17  ;;  %v9588_v26 = vld [vmem:[%s15277_s5 + $0x364] sm:$0xf0] }
  0xc6   :  { %2257 = vmatpush.bf16.msra.mxu3 %v6842_v30  ;;  %2244 = vmatpush.bf16.msra.mxu2 %v6586_v31  ;;  %v9647_v30 = vld [vmem:[%s15277_s5 + $0x544] sm:$0xf]  ;;  %v6622_v31 = vor.u32 %v9487_v28, %v6619_v29  ;;  %v238_v28 = vperm.slane %v11129_v60, 3  ;;  %v9716_v17 = vld [vmem:[%s15277_s5 + $0x764] sm:$0xf0] }
  0xc7   :  { %2283 = vmatpush.bf16.msrb.mxu1 %v7354_v40  ;;  %2270 = vmatpush.bf16.msrb.mxu0 %v7098_v4  ;;  %v7262_v33 = vor.u32 %v9647_v30, %v7259_v32  ;;  %v7451_v35 = vld [vmem:[%s15277_s5 + $0x6e0] sm:$0xf0]  ;;  %v6785_v32 = vld [vmem:[%s15277_s5 + $0x188] sm:$0xf] }
  0xc8   :  { %v9479_v37 = vld [vmem:[%s15277_s5 + $0x4] sm:$0xf] }
  0xc9   :  { %v6587_v38 = vld [vmem:[%s15277_s5 + $0x20] sm:$0xf0] }
  0xca   :  { %2302 = vmatpush.bf16.msrb.mxu3 %v7070_v34  ;;  %2289 = vmatpush.bf16.msrb.mxu2 %v6814_v36  ;;  %v9695_v34 = vld [vmem:[%s15277_s5 + $0x6c4] sm:$0xf]  ;;  %v6590_v40 = vor.u32 %v9479_v37, %v6587_v38  ;;  %v6977_v37 = vld [vmem:[%s15277_s5 + $0x308] sm:$0xf] }
  0xcb   :  { %2328 = vmatpush.bf16.msra.mxu1 %v7582_v41  ;;  %2315 = vmatpush.bf16.msra.mxu0 %v7326_v9  ;;  %v7454_v36 = vor.u32 %v9695_v34, %v7451_v35  ;;  %v9639_v39 = vld [vmem:[%s15277_s5 + $0x504] sm:$0xf]  ;;  %v9580_v38 = vld [vmem:[%s15277_s5 + $0x324] sm:$0xf0] }
  0xcc   :  { %v7227_v41 = vld [vmem:[%s15277_s5 + $0x520] sm:$0xf0] }
  0xcd   :  { %v9631_v46 = vld [vmem:[%s15277_s5 + $0x4c4] sm:$0xf] }
  0xce   :  { %2303 = vmatpush.bf16.msrb.mxu3 %v7038_v42  ;;  %2290 = vmatpush.bf16.msrb.mxu2 %v6782_v44  ;;  %v7230_v42 = vor.u32 %v9639_v39, %v7227_v41  ;;  %v7419_v44 = vld [vmem:[%s15277_s5 + $0x6a0] sm:$0xf0] }
  0xcf   :  { %2329 = vmatpush.bf16.msra.mxu1 %v7550_v2  ;;  %2316 = vmatpush.bf16.msra.mxu0 %v7294_v21  ;;  %v7422_v45 = vor.u32 %v9687_v43, %v7419_v44  ;;  %v7195_v47 = vld [vmem:[%s15277_s5 + $0x4e0] sm:$0xf0]  ;;  %v6817_v21 = vld [vmem:[%s15277_s5 + $0x1c8] sm:$0xf] }
  0xd0   :  { %v9623_v52 = vld [vmem:[%s15277_s5 + $0x484] sm:$0xf]  ;;  %v6818_v29 = vor.u32 %v9540_v22, %v6817_v21  ;;  %v9524_v43 = vld [vmem:[%s15277_s5 + $0x164] sm:$0xf0] }
  0xd1   :  { %v7163_v53 = vld [vmem:[%s15277_s5 + $0x4a0] sm:$0xf0]  ;;  %v6657_v21 = vld [vmem:[%s15277_s5 + $0x88] sm:$0xf] }
  0xd2   :  { %2304 = vmatpush.bf16.msrb.mxu3 %v7006_v48  ;;  %2291 = vmatpush.bf16.msrb.mxu2 %v6750_v50  ;;  %v7198_v48 = vor.u32 %v9631_v46, %v7195_v47  ;;  %v7387_v50 = vld [vmem:[%s15277_s5 + $0x660] sm:$0xf0]  ;;  %v6978_v46 = vor.u32 %v9580_v38, %v6977_v37  ;;  %v6945_v47 = vld [vmem:[%s15277_s5 + $0x2c8] sm:$0xf]  ;;  %v9600_v37 = vld [vmem:[%s15277_s5 + $0x3cc] sm:$0xf] }
  0xd3   :  { %2330 = vmatpush.bf16.msra.mxu1 %v7518_v15  ;;  %2317 = vmatpush.bf16.msra.mxu0 %v7262_v33  ;;  %v7390_v51 = vor.u32 %v9679_v49, %v7387_v50  ;;  %v7355_v56 = vld [vmem:[%s15277_s5 + $0x620] sm:$0xf0]  ;;  %v9532_v33 = vld [vmem:[%s15277_s5 + $0x1a4] sm:$0xf0]  ;;  %v7075_v38 = vld [vmem:[%s15277_s5 + $0x3e8] sm:$0xf0] }
  0xd4   :  { %v7131_v59 = vld [vmem:[%s15277_s5 + $0x460] sm:$0xf0]  ;;  %v6786_v41 = vor.u32 %v9532_v33, %v6785_v32  ;;  %v7585_v49 = vld [vmem:[%s15277_s5 + $0x7c8] sm:$0xf] }
  0xd5   :  { %v7099_v0 = vld [vmem:[%s15277_s5 + $0x420] sm:$0xf0]  ;;  %v9732_v50 = vld [vmem:[%s15277_s5 + $0x7e4] sm:$0xf0] }
  0xd6   :  { %2305 = vmatpush.bf16.msrb.mxu3 %v6974_v54  ;;  %2292 = vmatpush.bf16.msrb.mxu2 %v6718_v55  ;;  %v7166_v54 = vor.u32 %v9623_v52, %v7163_v53  ;;  %v9671_v55 = vld [vmem:[%s15277_s5 + $0x604] sm:$0xf]  ;;  %v7102_v1 = vor.u32 %v9607_v63, %v7099_v0  ;;  %v9564_v0 = vld [vmem:[%s15277_s5 + $0x2a4] sm:$0xf0] }
  0xd7   :  { %2331 = vmatpush.bf16.msra.mxu1 %v7486_v27  ;;  %2318 = vmatpush.bf16.msra.mxu0 %v7230_v42  ;;  %v7358_v57 = vor.u32 %v9671_v55, %v7355_v56  ;;  %v6753_v42 = vld [vmem:[%s15277_s5 + $0x148] sm:$0xf] }
  0xd8   :  { %v6754_v52 = vor.u32 %v9524_v43, %v6753_v42  ;;  %v9516_v55 = vld [vmem:[%s15277_s5 + $0x124] sm:$0xf0] }
  0xd9   :  { %v9548_v32 = vld [vmem:[%s15277_s5 + $0x224] sm:$0xf0] }
  0xda   :  { %2306 = vmatpush.bf16.msrb.mxu3 %v6942_v58  ;;  %2293 = vmatpush.bf16.msrb.mxu2 %v6686_v7  ;;  %v9615_v58 = vld [vmem:[%s15277_s5 + $0x444] sm:$0xf]  ;;  %v7073_v7 = vld [vmem:[%s15277_s5 + $0x3c8] sm:$0xf] }
  0xdb   :  { %2332 = vmatpush.bf16.msra.mxu1 %v7454_v36  ;;  %2319 = vmatpush.bf16.msra.mxu0 %v7198_v48  ;;  %v7134_v61 = vor.u32 %v9615_v58, %v7131_v59  ;;  %v7074_v14 = vor.u32 %v9604_v8, %v7073_v7  ;;  %v9572_v48 = vld [vmem:[%s15277_s5 + $0x2e4] sm:$0xf0] }
  0xdc   :  { %v6946_v59 = vor.u32 %v9572_v48, %v6945_v47  ;;  %v9508_v7 = vld [vmem:[%s15277_s5 + $0xe4] sm:$0xf0] }
  0xdd   :  { %v7329_v8 = vld [vmem:[%s15277_s5 + $0x5c8] sm:$0xf] }
  0xde   :  { %2307 = vmatpush.bf16.msrb.mxu3 %v6910_v62  ;;  %2294 = vmatpush.bf16.msrb.mxu2 %v6654_v19  ;;  %v236_v62 = vperm.slane %v11129_v60, 1  ;;  %v7489_v33 = vld [vmem:[%s15277_s5 + $0x708] sm:$0xf] }
  0xdf   :  { %2333 = vmatpush.bf16.msra.mxu1 %v7422_v45  ;;  %2320 = vmatpush.bf16.msra.mxu0 %v7166_v54  ;;  %v237_v45 = vperm.slane %v11129_v60, 2  ;;  %v6721_v54 = vld [vmem:[%s15277_s5 + $0x108] sm:$0xf]  ;;  %v7586_v60 = vor.u32 %v9732_v50, %v7585_v49  ;;  %v9592_v50 = vld [vmem:[%s15277_s5 + $0x38c] sm:$0xf] }
  0xe0   :  { %v9652_v42 = vld [vmem:[%s15277_s5 + $0x564] sm:$0xf0] }
  0xe1   :  { %v9700_v47 = vld [vmem:[%s15277_s5 + $0x6e4] sm:$0xf0] }
  0xe2   :  { %2308 = vmatpush.bf16.msrb.mxu3 %v6878_v13  ;;  %2295 = vmatpush.bf16.msrb.mxu2 %v6622_v31 }
  0xe3   :  { %2334 = vmatpush.bf16.msra.mxu1 %v7390_v51  ;;  %2321 = vmatpush.bf16.msra.mxu0 %v7134_v61  ;;  %v6913_v61 = vld [vmem:[%s15277_s5 + $0x288] sm:$0xf] }
  0xe6   :  { %2309 = vmatpush.bf16.msrb.mxu3 %v6846_v25  ;;  %2296 = vmatpush.bf16.msrb.mxu2 %v6590_v40  ;;  %v7009_v25 = vld [vmem:[%s15277_s5 + $0x348] sm:$0xf] }
  0xe7   :  { %2335 = vmatpush.bf16.msra.mxu1 %v7358_v57  ;;  %2322 = vmatpush.bf16.msra.mxu0 %v7102_v1  ;;  %v7010_v35 = vor.u32 %v9588_v26, %v7009_v25  ;;  %v7553_v1 = vld [vmem:[%s15277_s5 + $0x788] sm:$0xf] }
  0xe8   :  { %v7297_v25 = vld [vmem:[%s15277_s5 + $0x588] sm:$0xf] }
  0xe9   :  { %v9660_v26 = vld [vmem:[%s15277_s5 + $0x5a4] sm:$0xf0] }
 0x125   :  { %v598_v2 = vpop.f32.mrf.mxu0 }
 0x126   :  { %v599_v4 = vadd.f32 %v598_v2, %v236_v62  ;;  %v611_v5 = vpop.f32.mrf.mxu1  ;;  %v9724_v2 = vld [vmem:[%s15277_s5 + $0x7a4] sm:$0xf0] }
 0x128   :  { %v612_v3 = vadd.f32 %v611_v5, %v599_v4 }
 0x12a   :  { %vm668_vm2 = vcmp.ge.f32.partialorder %v612_v3, 0.0  ;;  %v672_v9 = vmul.f32 0.2, %v612_v3 }
 0x12b   :  { %v572_v10 = vpop.f32.mrf.mxu2 }
 0x12c   :  { %v676_v11 = vsel %vm668_vm2, %v612_v3, %v672_v9  ;;  %v573_v12 = vadd.f32 %v572_v10, %v235_v6  ;;  %v585_v13 = vpop.f32.mrf.mxu3  ;;  %v6722_v3 = vor.u32 %v9516_v55, %v6721_v54  ;;  %v6689_v6 = vld [vmem:[%s15277_s5 + $0xc8] sm:$0xf] }
 0x12d   :  { %v11145_v15 = vpack.c.bf16 %v676_v11, %v676_v11  ;;  %v600_v16 = vpop.f32.mrf.mxu0  ;;  %v9668_v9 = vld [vmem:[%s15277_s5 + $0x5e4] sm:$0xf0]  ;;  %v6914_v11 = vor.u32 %v9564_v0, %v6913_v61 }
 0x12e   :  { %v586_v19 = vadd.f32 %v585_v13, %v573_v12  ;;  %v613_v20 = vpop.f32.mrf.mxu1  ;;  %v7554_v12 = vor.u32 %v9724_v2, %v7553_v1  ;;  %v6881_v13 = vld [vmem:[%s15277_s5 + $0x248] sm:$0xf]  ;;  %v9584_v1 = vld [vmem:[%s15277_s5 + $0x34c] sm:$0xf] }
 0x12f   :  { %2258 = vmatmul.bf16.vlgmr.msra.gmra.mxu3 %v11145_v15  ;;  %v7521_v16 = vld [vmem:[%s15277_s5 + $0x748] sm:$0xf]  ;;  %v7330_v20 = vor.u32 %v9668_v9, %v7329_v8  ;;  %v7011_v2 = vld [vmem:[%s15277_s5 + $0x368] sm:$0xf0] }
 0x130   :  { %vm667_vm3 = vcmp.ge.f32.partialorder %v586_v19, 0.0  ;;  %v671_v23 = vmul.f32 0.2, %v586_v19  ;;  %2354 = vmatpush.bf16.msra.mxu3 %v7074_v14  ;;  %v9556_v14 = vld [vmem:[%s15277_s5 + $0x264] sm:$0xf0]  ;;  %v7014_v9 = vor.u32 %v9584_v1, %v7011_v2 }
 0x131   :  { %v7233_v54 = vld [vmem:[%s15277_s5 + $0x508] sm:$0xf]  ;;  %v6787_v8 = vld [vmem:[%s15277_s5 + $0x1a8] sm:$0xf0] }
 0x132   :  { %v675_v27 = vsel %vm667_vm3, %v586_v19, %v671_v23  ;;  %v6690_v19 = vor.u32 %v9508_v7, %v6689_v6  ;;  %v9644_v55 = vld [vmem:[%s15277_s5 + $0x524] sm:$0xf0]  ;;  %v9528_v7 = vld [vmem:[%s15277_s5 + $0x18c] sm:$0xf] }
 0x133   :  { %v11167_v30 = vpack.c.bf16 %v675_v27, %v675_v27  ;;  %v574_v31 = vpop.f32.mrf.mxu2  ;;  %v9692_v61 = vld [vmem:[%s15277_s5 + $0x6a4] sm:$0xf0]  ;;  %v7234_v0 = vor.u32 %v9644_v55, %v7233_v54  ;;  %v9552_v54 = vld [vmem:[%s15277_s5 + $0x24c] sm:$0xf] }
 0x134   :  { %v587_v34 = vpop.f32.mrf.mxu3  ;;  %2355 = vmatpush.bf16.msra.mxu3 %v7042_v24  ;;  %v9500_v24 = vld [vmem:[%s15277_s5 + $0xa4] sm:$0xf0]  ;;  %v7299_v1 = vld [vmem:[%s15277_s5 + $0x5a8] sm:$0xf0] }
 0x135   :  { %v650_v36 = vpop.f32.mrf.mxu0  ;;  %2245 = vmatmul.bf16.vlgmr.msra.gmra.mxu2 %v11167_v30  ;;  %v6849_v31 = vld [vmem:[%s15277_s5 + $0x208] sm:$0xf] }
 0x136   :  { %v651_v39 = vadd.f32 %v650_v36, %v238_v28  ;;  %v663_v40 = vpop.f32.mrf.mxu1  ;;  %2341 = vmatpush.bf16.msra.mxu2 %v6818_v29  ;;  %v6882_v28 = vor.u32 %v9556_v14, %v6881_v13  ;;  %v7522_v29 = vor.u32 %v9716_v17, %v7521_v16  ;;  %v9708_v34 = vld [vmem:[%s15277_s5 + $0x724] sm:$0xf0]  ;;  %v7298_v36 = vor.u32 %v9660_v26, %v7297_v25  ;;  %v9576_v13 = vld [vmem:[%s15277_s5 + $0x30c] sm:$0xf] }
 0x137   :  { %v6850_v43 = vor.u32 %v9548_v32, %v6849_v31  ;;  %v6979_v14 = vld [vmem:[%s15277_s5 + $0x328] sm:$0xf0]  ;;  %v6790_v16 = vor.u32 %v9528_v7, %v6787_v8  ;;  %v7169_v17 = vld [vmem:[%s15277_s5 + $0x488] sm:$0xf] }
 0x138   :  { %v664_v44 = vadd.f32 %v663_v40, %v651_v39  ;;  %2356 = vmatpush.bf16.msra.mxu3 %v7010_v35  ;;  %v6658_v35 = vor.u32 %v9500_v24, %v6657_v21  ;;  %v6625_v39 = vld [vmem:[%s15277_s5 + $0x48] sm:$0xf]  ;;  %v6755_v21 = vld [vmem:[%s15277_s5 + $0x168] sm:$0xf0] }
 0x139   :  { %v9492_v40 = vld [vmem:[%s15277_s5 + $0x64] sm:$0xf0]  ;;  %v9568_v26 = vld [vmem:[%s15277_s5 + $0x2cc] sm:$0xf] }
 0x13a   :  { %vm670_vm4 = vcmp.ge.f32.partialorder %v664_v44, 0.0  ;;  %v674_v51 = vmul.f32 0.2, %v664_v44  ;;  %2342 = vmatpush.bf16.msra.mxu2 %v6786_v41  ;;  %v7265_v41 = vld [vmem:[%s15277_s5 + $0x548] sm:$0xf]  ;;  %v6626_v48 = vor.u32 %v9492_v40, %v6625_v39 }
 0x13b   :  { %v624_v53 = vpop.f32.mrf.mxu2  ;;  %v7266_v49 = vor.u32 %v9652_v42, %v7265_v41  ;;  %v7361_v24 = vld [vmem:[%s15277_s5 + $0x608] sm:$0xf]  ;;  %v7587_v31 = vld [vmem:[%s15277_s5 + $0x7e8] sm:$0xf0] }
 0x13c   :  { %v678_v56 = vsel %vm670_vm4, %v664_v44, %v674_v51  ;;  %v625_v57 = vadd.f32 %v624_v53, %v237_v45  ;;  %v637_v58 = vpop.f32.mrf.mxu3  ;;  %2357 = vmatpush.bf16.msra.mxu3 %v6978_v46  ;;  %v7490_v44 = vor.u32 %v9708_v34, %v7489_v33  ;;  %v7078_v45 = vor.u32 %v9600_v37, %v7075_v38  ;;  %v7457_v46 = vld [vmem:[%s15277_s5 + $0x6c8] sm:$0xf]  ;;  %v7043_v51 = vld [vmem:[%s15277_s5 + $0x3a8] sm:$0xf0] }
 0x13d   :  { %v11210_v62 = vpack.c.bf16 %v678_v56, %v678_v56  ;;  %v652_v63 = vpop.f32.mrf.mxu0  ;;  %v9484_v53 = vld [vmem:[%s15277_s5 + $0x24] sm:$0xf0]  ;;  %v7458_v56 = vor.u32 %v9700_v47, %v7457_v46  ;;  %v6723_v37 = vld [vmem:[%s15277_s5 + $0x128] sm:$0xf0] }
 0x13e   :  { %v638_v4 = vadd.f32 %v637_v58, %v625_v57  ;;  %v665_v5 = vpop.f32.mrf.mxu1  ;;  %2343 = vmatpush.bf16.msra.mxu2 %v6754_v52  ;;  %v6593_v52 = vld [vmem:[%s15277_s5 + $0x8] sm:$0xf]  ;;  %v9536_v57 = vld [vmem:[%s15277_s5 + $0x1cc] sm:$0xf] }
 0x13f   :  { %2284 = vmatmul.bf16.vlgmr.msrb.gmra.mxu1 %v11210_v62  ;;  %2310 = vmatmul.bf16.vlgmr.msrb.gmra.mxu3 %v11145_v15  ;;  %v6819_v58 = vld [vmem:[%s15277_s5 + $0x1e8] sm:$0xf0]  ;;  %v6594_v63 = vor.u32 %v9484_v53, %v6593_v52  ;;  %v7201_v5 = vld [vmem:[%s15277_s5 + $0x4c8] sm:$0xf] }
 0x140   :  { %vm669_vm5 = vcmp.ge.f32.partialorder %v638_v4, 0.0  ;;  %v673_v10 = vmul.f32 0.2, %v638_v4  ;;  %2358 = vmatpush.bf16.msra.mxu3 %v6946_v59  ;;  %2380 = vmatpush.bf16.msrb.mxu1 %v7586_v60  ;;  %v7046_v59 = vor.u32 %v9592_v50, %v7043_v51  ;;  %v7425_v60 = vld [vmem:[%s15277_s5 + $0x688] sm:$0xf] }
 0x141   :  { %v7426_v6 = vor.u32 %v9692_v61, %v7425_v60  ;;  %v9676_v25 = vld [vmem:[%s15277_s5 + $0x624] sm:$0xf0]  ;;  %v9560_v40 = vld [vmem:[%s15277_s5 + $0x28c] sm:$0xf] }
 0x142   :  { %v677_v18 = vsel %vm669_vm5, %v638_v4, %v673_v10  ;;  %2344 = vmatpush.bf16.msra.mxu2 %v6722_v3  ;;  %v6822_v4 = vor.u32 %v9536_v57, %v6819_v58  ;;  %v9636_v3 = vld [vmem:[%s15277_s5 + $0x4e4] sm:$0xf0]  ;;  %v6915_v42 = vld [vmem:[%s15277_s5 + $0x2a8] sm:$0xf0] }
 0x143   :  { %v11250_v22 = vpack.c.bf16 %v677_v18, %v677_v18  ;;  %v626_v23 = vpop.f32.mrf.mxu2  ;;  %v7393_v10 = vld [vmem:[%s15277_s5 + $0x648] sm:$0xf]  ;;  %v9664_v50 = vld [vmem:[%s15277_s5 + $0x5cc] sm:$0xf]  ;;  %v6918_v52 = vor.u32 %v9560_v40, %v6915_v42  ;;  %v7017_v40 = vld [vmem:[%s15277_s5 + $0x350] sm:$0xf] }
 0x144   :  { %v639_v27 = vpop.f32.mrf.mxu3  ;;  %2359 = vmatpush.bf16.msra.mxu3 %v6914_v11  ;;  %2381 = vmatpush.bf16.msrb.mxu1 %v7554_v12  ;;  %v9684_v11 = vld [vmem:[%s15277_s5 + $0x664] sm:$0xf0]  ;;  %v7202_v12 = vor.u32 %v9636_v3, %v7201_v5  ;;  %v6982_v23 = vor.u32 %v9576_v13, %v6979_v14  ;;  %v7331_v51 = vld [vmem:[%s15277_s5 + $0x5e8] sm:$0xf0] }
 0x145   :  { %2271 = vmatmul.bf16.vlgmr.msrb.gmra.mxu0 %v11250_v22  ;;  %2297 = vmatmul.bf16.vlgmr.msrb.gmra.mxu2 %v11167_v30  ;;  %v9628_v18 = vld [vmem:[%s15277_s5 + $0x4a4] sm:$0xf0]  ;;  %v9712_v57 = vld [vmem:[%s15277_s5 + $0x74c] sm:$0xf]  ;;  %v7334_v60 = vor.u32 %v9664_v50, %v7331_v51 }
 0x146   :  { %2345 = vmatpush.bf16.msra.mxu2 %v6690_v19  ;;  %2367 = vmatpush.bf16.msrb.mxu0 %v7330_v20  ;;  %v7394_v19 = vor.u32 %v9684_v11, %v7393_v10  ;;  %v9520_v20 = vld [vmem:[%s15277_s5 + $0x14c] sm:$0xf]  ;;  %v7170_v27 = vor.u32 %v9628_v18, %v7169_v17  ;;  %v7137_v33 = vld [vmem:[%s15277_s5 + $0x448] sm:$0xf]  ;;  %v7081_v10 = vld [vmem:[%s15277_s5 + $0x3d0] sm:$0xf] }
 0x147   :  { %v6758_v32 = vor.u32 %v9520_v20, %v6755_v21  ;;  %v9620_v34 = vld [vmem:[%s15277_s5 + $0x464] sm:$0xf0]  ;;  %v7523_v58 = vld [vmem:[%s15277_s5 + $0x768] sm:$0xf0]  ;;  %v9605_v11 = vld [vmem:[%s15277_s5 + $0x3ec] sm:$0xf0] }
 0x148   :  { %2360 = vmatpush.bf16.msra.mxu3 %v6882_v28  ;;  %2382 = vmatpush.bf16.msrb.mxu1 %v7522_v29  ;;  %v6947_v28 = vld [vmem:[%s15277_s5 + $0x2e8] sm:$0xf0]  ;;  %v7138_v41 = vor.u32 %v9620_v34, %v7137_v33  ;;  %v7105_v46 = vld [vmem:[%s15277_s5 + $0x408] sm:$0xf]  ;;  %v6825_v33 = vld [vmem:[%s15277_s5 + $0x1d0] sm:$0xf] }
 0x149   :  { %v9728_v29 = vld [vmem:[%s15277_s5 + $0x7cc] sm:$0xf]  ;;  %v6950_v38 = vor.u32 %v9568_v26, %v6947_v28  ;;  %v9612_v47 = vld [vmem:[%s15277_s5 + $0x424] sm:$0xf0]  ;;  %v9597_v26 = vld [vmem:[%s15277_s5 + $0x3ac] sm:$0xf0] }
 0x14a   :  { %2346 = vmatpush.bf16.msra.mxu2 %v6658_v35  ;;  %2368 = vmatpush.bf16.msrb.mxu0 %v7298_v36  ;;  %v7362_v35 = vor.u32 %v9676_v25, %v7361_v24  ;;  %v9512_v36 = vld [vmem:[%s15277_s5 + $0x10c] sm:$0xf]  ;;  %v7590_v39 = vor.u32 %v9728_v29, %v7587_v31  ;;  %v7106_v55 = vor.u32 %v9612_v47, %v7105_v46  ;;  %v7049_v25 = vld [vmem:[%s15277_s5 + $0x390] sm:$0xf] }
 0x14b   :  { %v9496_v61 = vld [vmem:[%s15277_s5 + $0x8c] sm:$0xf]  ;;  %v9541_v34 = vld [vmem:[%s15277_s5 + $0x1ec] sm:$0xf0] }
 0x14c   :  { %2361 = vmatpush.bf16.msra.mxu3 %v6850_v43  ;;  %2383 = vmatpush.bf16.msrb.mxu1 %v7490_v44  ;;  %v9720_v43 = vld [vmem:[%s15277_s5 + $0x78c] sm:$0xf]  ;;  %v6826_v42 = vor.u32 %v9541_v34, %v6825_v33  ;;  %v6793_v46 = vld [vmem:[%s15277_s5 + $0x190] sm:$0xf] }
 0x14d   :  { %v7555_v44 = vld [vmem:[%s15277_s5 + $0x7a8] sm:$0xf0]  ;;  %v9533_v47 = vld [vmem:[%s15277_s5 + $0x1ac] sm:$0xf0] }
 0x14e   :  { %2347 = vmatpush.bf16.msra.mxu2 %v6626_v48  ;;  %2369 = vmatpush.bf16.msrb.mxu0 %v7266_v49  ;;  %v9504_v48 = vld [vmem:[%s15277_s5 + $0xcc] sm:$0xf]  ;;  %v7558_v53 = vor.u32 %v9720_v43, %v7555_v44 }
 0x14f   :  { %2336 = vmatmul.bf16.vlgmr.msra.gmra.mxu1 %v11210_v62  ;;  %2362 = vmatmul.bf16.vlgmr.msra.gmra.mxu3 %v11145_v15  ;;  %v6691_v49 = vld [vmem:[%s15277_s5 + $0xe8] sm:$0xf0] }
 0x150   :  { %2406 = vmatpush.bf16.msrb.mxu3 %v7078_v45  ;;  %2384 = vmatpush.bf16.msrb.mxu1 %v7458_v56  ;;  %v6726_v45 = vor.u32 %v9512_v36, %v6723_v37  ;;  %v6883_v56 = vld [vmem:[%s15277_s5 + $0x268] sm:$0xf0] }
 0x151   :  { %v6886_v2 = vor.u32 %v9552_v54, %v6883_v56  ;;  %v9544_v5 = vld [vmem:[%s15277_s5 + $0x20c] sm:$0xf]  ;;  %v6794_v54 = vor.u32 %v9533_v47, %v6793_v46  ;;  %v9709_v46 = vld [vmem:[%s15277_s5 + $0x72c] sm:$0xf0] }
 0x152   :  { %2348 = vmatpush.bf16.msra.mxu2 %v6594_v63  ;;  %2370 = vmatpush.bf16.msrb.mxu0 %v7234_v0  ;;  %v6659_v63 = vld [vmem:[%s15277_s5 + $0xa8] sm:$0xf0] }
 0x153   :  { %v9656_v0 = vld [vmem:[%s15277_s5 + $0x58c] sm:$0xf]  ;;  %v6662_v8 = vor.u32 %v9496_v61, %v6659_v63 }
 0x154   :  { %2407 = vmatpush.bf16.msrb.mxu3 %v7046_v59  ;;  %2385 = vmatpush.bf16.msrb.mxu1 %v7426_v6  ;;  %v6694_v59 = vor.u32 %v9504_v48, %v6691_v49  ;;  %v6851_v3 = vld [vmem:[%s15277_s5 + $0x228] sm:$0xf0] }
 0x155   :  { %2323 = vmatmul.bf16.vlgmr.msra.gmra.mxu0 %v11250_v22  ;;  %2349 = vmatmul.bf16.vlgmr.msra.gmra.mxu2 %v11167_v30  ;;  %v9704_v6 = vld [vmem:[%s15277_s5 + $0x70c] sm:$0xf]  ;;  %v6854_v17 = vor.u32 %v9544_v5, %v6851_v3  ;;  %v9733_v5 = vld [vmem:[%s15277_s5 + $0x7ec] sm:$0xf0] }
 0x156   :  { %2393 = vmatpush.bf16.msrb.mxu2 %v6822_v4  ;;  %2371 = vmatpush.bf16.msrb.mxu0 %v7202_v12  ;;  %v7526_v4 = vor.u32 %v9712_v57, %v7523_v58  ;;  %v7491_v7 = vld [vmem:[%s15277_s5 + $0x728] sm:$0xf0]  ;;  %v6761_v58 = vld [vmem:[%s15277_s5 + $0x150] sm:$0xf] }
 0x157   :  { %v9488_v12 = vld [vmem:[%s15277_s5 + $0x4c] sm:$0xf]  ;;  %v7494_v18 = vor.u32 %v9704_v6, %v7491_v7 }
 0x158   :  { %2408 = vmatpush.bf16.msrb.mxu3 %v7014_v9  ;;  %2386 = vmatpush.bf16.msrb.mxu1 %v7394_v19  ;;  %v7302_v9 = vor.u32 %v9656_v0, %v7299_v1  ;;  %v6627_v13 = vld [vmem:[%s15277_s5 + $0x68] sm:$0xf0]  ;;  %v7082_v19 = vor.u32 %v9605_v11, %v7081_v10  ;;  %v6953_v0 = vld [vmem:[%s15277_s5 + $0x2d0] sm:$0xf] }
 0x159   :  { %v9648_v14 = vld [vmem:[%s15277_s5 + $0x54c] sm:$0xf]  ;;  %v9517_v10 = vld [vmem:[%s15277_s5 + $0x12c] sm:$0xf0] }
 0x15a   :  { %2394 = vmatpush.bf16.msrb.mxu2 %v6790_v16  ;;  %2372 = vmatpush.bf16.msrb.mxu0 %v7170_v27  ;;  %v7267_v16 = vld [vmem:[%s15277_s5 + $0x568] sm:$0xf0] }
 0x15b   :  { %v9696_v20 = vld [vmem:[%s15277_s5 + $0x6cc] sm:$0xf]  ;;  %v7270_v24 = vor.u32 %v9648_v14, %v7267_v16  ;;  %v9565_v16 = vld [vmem:[%s15277_s5 + $0x2ac] sm:$0xf0] }
 0x15c   :  { %2409 = vmatpush.bf16.msrb.mxu3 %v6982_v23  ;;  %2387 = vmatpush.bf16.msrb.mxu1 %v7362_v35  ;;  %v7459_v21 = vld [vmem:[%s15277_s5 + $0x6e8] sm:$0xf0]  ;;  %v6630_v23 = vor.u32 %v9488_v12, %v6627_v13  ;;  %v7050_v35 = vor.u32 %v9597_v26, %v7049_v25  ;;  %v6921_v13 = vld [vmem:[%s15277_s5 + $0x290] sm:$0xf] }
 0x15d   :  { %v9480_v27 = vld [vmem:[%s15277_s5 + $0xc] sm:$0xf]  ;;  %v7337_v25 = vld [vmem:[%s15277_s5 + $0x5d0] sm:$0xf] }
 0x15e   :  { %2395 = vmatpush.bf16.msrb.mxu2 %v6758_v32  ;;  %2373 = vmatpush.bf16.msrb.mxu0 %v7138_v41  ;;  %v6595_v28 = vld [vmem:[%s15277_s5 + $0x28] sm:$0xf0]  ;;  %v7462_v32 = vor.u32 %v9696_v20, %v7459_v21  ;;  %v9589_v41 = vld [vmem:[%s15277_s5 + $0x36c] sm:$0xf0] }
 0x15f   :  { %2388 = vmatmul.bf16.vlgmr.msrb.gmra.mxu1 %v11210_v62  ;;  %v9640_v29 = vld [vmem:[%s15277_s5 + $0x50c] sm:$0xf]  ;;  %v7018_v48 = vor.u32 %v9589_v41, %v7017_v40  ;;  %v9669_v26 = vld [vmem:[%s15277_s5 + $0x5ec] sm:$0xf0] }
 0x160   :  { %2410 = vmatpush.bf16.msrb.mxu3 %v6950_v38  ;;  %2432 = vmatpush.bf16.msra.mxu1 %v7590_v39  ;;  %v7235_v31 = vld [vmem:[%s15277_s5 + $0x528] sm:$0xf0]  ;;  %v6598_v38 = vor.u32 %v9480_v27, %v6595_v28  ;;  %v6922_v27 = vor.u32 %v9565_v16, %v6921_v13  ;;  %v7338_v34 = vor.u32 %v9669_v26, %v7337_v25  ;;  %v9661_v40 = vld [vmem:[%s15277_s5 + $0x5ac] sm:$0xf0]  ;;  %v9585_v13 = vld [vmem:[%s15277_s5 + $0x354] sm:$0xf] }
 0x161   :  { %v9688_v36 = vld [vmem:[%s15277_s5 + $0x68c] sm:$0xf]  ;;  %v7238_v39 = vor.u32 %v9640_v29, %v7235_v31  ;;  %v6889_v31 = vld [vmem:[%s15277_s5 + $0x250] sm:$0xf]  ;;  %v7019_v16 = vld [vmem:[%s15277_s5 + $0x370] sm:$0xf0] }
 0x162   :  { %2396 = vmatpush.bf16.msrb.mxu2 %v6726_v45  ;;  %2374 = vmatpush.bf16.msrb.mxu0 %v7106_v55  ;;  %v7427_v37 = vld [vmem:[%s15277_s5 + $0x6a8] sm:$0xf0]  ;;  %v7401_v25 = vld [vmem:[%s15277_s5 + $0x650] sm:$0xf] }
 0x163   :  { %v9632_v43 = vld [vmem:[%s15277_s5 + $0x4cc] sm:$0xf]  ;;  %v7430_v45 = vor.u32 %v9688_v36, %v7427_v37  ;;  %v9717_v36 = vld [vmem:[%s15277_s5 + $0x76c] sm:$0xf0] }
 0x164   :  { %2411 = vmatpush.bf16.msrb.mxu3 %v6918_v52  ;;  %2433 = vmatpush.bf16.msra.mxu1 %v7558_v53  ;;  %v7203_v44 = vld [vmem:[%s15277_s5 + $0x4e8] sm:$0xf0]  ;;  %v6985_v52 = vld [vmem:[%s15277_s5 + $0x310] sm:$0xf] }
 0x165   :  { %2375 = vmatmul.bf16.vlgmr.msrb.gmra.mxu0 %v11250_v22  ;;  %v9680_v49 = vld [vmem:[%s15277_s5 + $0x64c] sm:$0xf]  ;;  %v7206_v51 = vor.u32 %v9632_v43, %v7203_v44  ;;  %v9581_v53 = vld [vmem:[%s15277_s5 + $0x32c] sm:$0xf0] }
 0x166   :  { %2397 = vmatpush.bf16.msrb.mxu2 %v6694_v59  ;;  %2419 = vmatpush.bf16.msra.mxu0 %v7334_v60  ;;  %v7395_v50 = vld [vmem:[%s15277_s5 + $0x668] sm:$0xf0]  ;;  %v9525_v59 = vld [vmem:[%s15277_s5 + $0x16c] sm:$0xf0]  ;;  %v6986_v60 = vor.u32 %v9581_v53, %v6985_v52 }
 0x167   :  { %v9624_v55 = vld [vmem:[%s15277_s5 + $0x48c] sm:$0xf]  ;;  %v7398_v57 = vor.u32 %v9680_v49, %v7395_v50  ;;  %v6762_v3 = vor.u32 %v9525_v59, %v6761_v58  ;;  %v6665_v37 = vld [vmem:[%s15277_s5 + $0x90] sm:$0xf]  ;;  %v9601_v49 = vld [vmem:[%s15277_s5 + $0x3d4] sm:$0xf] }
 0x168   :  { %2412 = vmatpush.bf16.msrb.mxu3 %v6886_v2  ;;  %2434 = vmatpush.bf16.msra.mxu1 %v7526_v4  ;;  %v7171_v56 = vld [vmem:[%s15277_s5 + $0x4a8] sm:$0xf0]  ;;  %v9573_v2 = vld [vmem:[%s15277_s5 + $0x2ec] sm:$0xf0]  ;;  %v7083_v50 = vld [vmem:[%s15277_s5 + $0x3f0] sm:$0xf0] }
 0x169   :  { %v9672_v61 = vld [vmem:[%s15277_s5 + $0x60c] sm:$0xf]  ;;  %v7174_v1 = vor.u32 %v9624_v55, %v7171_v56  ;;  %v7593_v4 = vld [vmem:[%s15277_s5 + $0x7d0] sm:$0xf]  ;;  %v6954_v11 = vor.u32 %v9573_v2, %v6953_v0  ;;  %v7051_v0 = vld [vmem:[%s15277_s5 + $0x3b0] sm:$0xf0] }
 0x16a   :  { %2398 = vmatpush.bf16.msrb.mxu2 %v6662_v8  ;;  %2420 = vmatpush.bf16.msra.mxu0 %v7302_v9  ;;  %v7363_v63 = vld [vmem:[%s15277_s5 + $0x628] sm:$0xf0]  ;;  %v6729_v9 = vld [vmem:[%s15277_s5 + $0x110] sm:$0xf]  ;;  %v7594_v12 = vor.u32 %v9733_v5, %v7593_v4 }
 0x16b   :  { %v9616_v6 = vld [vmem:[%s15277_s5 + $0x44c] sm:$0xf]  ;;  %v7366_v8 = vor.u32 %v9672_v61, %v7363_v63  ;;  %v9549_v44 = vld [vmem:[%s15277_s5 + $0x22c] sm:$0xf0]  ;;  %v9593_v63 = vld [vmem:[%s15277_s5 + $0x394] sm:$0xf] }
 0x16c   :  { %2413 = vmatpush.bf16.msrb.mxu3 %v6854_v17  ;;  %2435 = vmatpush.bf16.msra.mxu1 %v7494_v18  ;;  %v7139_v7 = vld [vmem:[%s15277_s5 + $0x468] sm:$0xf0]  ;;  %v7561_v17 = vld [vmem:[%s15277_s5 + $0x790] sm:$0xf] }
 0x16d   :  { %v7142_v14 = vor.u32 %v9616_v6, %v7139_v7  ;;  %v9725_v18 = vld [vmem:[%s15277_s5 + $0x7ac] sm:$0xf0]  ;;  %v9608_v20 = vld [vmem:[%s15277_s5 + $0x40c] sm:$0xf]  ;;  %v6827_v6 = vld [vmem:[%s15277_s5 + $0x1f0] sm:$0xf0] }
 0x16e   :  { %2399 = vmatpush.bf16.msrb.mxu2 %v6630_v23  ;;  %2421 = vmatpush.bf16.msra.mxu0 %v7270_v24  ;;  %v7107_v21 = vld [vmem:[%s15277_s5 + $0x428] sm:$0xf0]  ;;  %v6697_v23 = vld [vmem:[%s15277_s5 + $0xd0] sm:$0xf]  ;;  %v7562_v28 = vor.u32 %v9725_v18, %v7561_v17 }
 0x16f   :  { %2414 = vmatmul.bf16.vlgmr.msrb.gmra.mxu3 %v11145_v15  ;;  %v9509_v24 = vld [vmem:[%s15277_s5 + $0xec] sm:$0xf0]  ;;  %v7110_v29 = vor.u32 %v9608_v20, %v7107_v21  ;;  %v6795_v20 = vld [vmem:[%s15277_s5 + $0x1b0] sm:$0xf0] }
 0x170   :  { %2458 = vmatpush.bf16.msra.mxu3 %v7082_v19  ;;  %2436 = vmatpush.bf16.msra.mxu1 %v7462_v32  ;;  %v6730_v19 = vor.u32 %v9517_v10, %v6729_v9  ;;  %v9557_v32 = vld [vmem:[%s15277_s5 + $0x26c] sm:$0xf0]  ;;  %v6698_v33 = vor.u32 %v9509_v24, %v6697_v23  ;;  %v7022_v23 = vor.u32 %v9585_v13, %v7019_v16  ;;  %v7307_v13 = vld [vmem:[%s15277_s5 + $0x5b0] sm:$0xf0] }
 0x171   :  { %v6890_v41 = vor.u32 %v9557_v32, %v6889_v31  ;;  %v9493_v52 = vld [vmem:[%s15277_s5 + $0x6c] sm:$0xf0]  ;;  %v9545_v16 = vld [vmem:[%s15277_s5 + $0x214] sm:$0xf] }
 0x172   :  { %2400 = vmatpush.bf16.msrb.mxu2 %v6598_v38  ;;  %2422 = vmatpush.bf16.msra.mxu0 %v7238_v39  ;;  %v9501_v38 = vld [vmem:[%s15277_s5 + $0xac] sm:$0xf0] }
 0x173   :  { %v7305_v39 = vld [vmem:[%s15277_s5 + $0x590] sm:$0xf]  ;;  %v6666_v47 = vor.u32 %v9501_v38, %v6665_v37 }
 0x174   :  { %2459 = vmatpush.bf16.msra.mxu3 %v7050_v35  ;;  %2437 = vmatpush.bf16.msra.mxu1 %v7430_v45  ;;  %v7529_v35 = vld [vmem:[%s15277_s5 + $0x750] sm:$0xf] }
 0x175   :  { %2401 = vmatmul.bf16.vlgmr.msrb.gmra.mxu2 %v11167_v30  ;;  %v7530_v43 = vor.u32 %v9717_v36, %v7529_v35  ;;  %v7497_v45 = vld [vmem:[%s15277_s5 + $0x710] sm:$0xf] }
 0x176   :  { %2445 = vmatpush.bf16.msra.mxu2 %v6826_v42  ;;  %2423 = vmatpush.bf16.msra.mxu0 %v7206_v51  ;;  %v6857_v42 = vld [vmem:[%s15277_s5 + $0x210] sm:$0xf]  ;;  %v7498_v56 = vor.u32 %v9709_v46, %v7497_v45 }
 0x177   :  { %v6633_v51 = vld [vmem:[%s15277_s5 + $0x50] sm:$0xf]  ;;  %v6858_v55 = vor.u32 %v9549_v44, %v6857_v42  ;;  %v7595_v44 = vld [vmem:[%s15277_s5 + $0x7f0] sm:$0xf0] }
 0x178   :  { %2460 = vmatpush.bf16.msra.mxu3 %v7018_v48  ;;  %2438 = vmatpush.bf16.msra.mxu1 %v7398_v57  ;;  %v7306_v48 = vor.u32 %v9661_v40, %v7305_v39  ;;  %v7273_v53 = vld [vmem:[%s15277_s5 + $0x550] sm:$0xf]  ;;  %v7086_v57 = vor.u32 %v9601_v49, %v7083_v50  ;;  %v9569_v40 = vld [vmem:[%s15277_s5 + $0x2d4] sm:$0xf] }
 0x179   :  { %v7465_v58 = vld [vmem:[%s15277_s5 + $0x6d0] sm:$0xf] }
 0x17a   :  { %2446 = vmatpush.bf16.msra.mxu2 %v6794_v54  ;;  %2424 = vmatpush.bf16.msra.mxu0 %v7174_v1  ;;  %v9653_v54 = vld [vmem:[%s15277_s5 + $0x56c] sm:$0xf0] }
 0x17b   :  { %v9701_v59 = vld [vmem:[%s15277_s5 + $0x6ec] sm:$0xf0]  ;;  %v7274_v61 = vor.u32 %v9653_v54, %v7273_v53  ;;  %v6923_v53 = vld [vmem:[%s15277_s5 + $0x2b0] sm:$0xf0] }
 0x17c   :  { %2461 = vmatpush.bf16.msra.mxu3 %v6986_v60  ;;  %2439 = vmatpush.bf16.msra.mxu1 %v7366_v8  ;;  %v6634_v60 = vor.u32 %v9493_v52, %v6633_v51  ;;  %v6601_v1 = vld [vmem:[%s15277_s5 + $0x10] sm:$0xf]  ;;  %v7466_v7 = vor.u32 %v9701_v59, %v7465_v58  ;;  %v7054_v8 = vor.u32 %v9593_v63, %v7051_v0  ;;  %v9561_v52 = vld [vmem:[%s15277_s5 + $0x294] sm:$0xf] }
 0x17d   :  { %v9485_v2 = vld [vmem:[%s15277_s5 + $0x2c] sm:$0xf0]  ;;  %v9665_v63 = vld [vmem:[%s15277_s5 + $0x5d4] sm:$0xf] }
 0x17e   :  { %2447 = vmatpush.bf16.msra.mxu2 %v6762_v3  ;;  %2425 = vmatpush.bf16.msra.mxu0 %v7142_v14  ;;  %v7241_v4 = vld [vmem:[%s15277_s5 + $0x510] sm:$0xf]  ;;  %v9537_v3 = vld [vmem:[%s15277_s5 + $0x1d4] sm:$0xf]  ;;  %v6602_v9 = vor.u32 %v9485_v2, %v6601_v1  ;;  %v6926_v1 = vor.u32 %v9561_v52, %v6923_v53  ;;  %v7025_v52 = vld [vmem:[%s15277_s5 + $0x358] sm:$0xf] }
 0x17f   :  { %2440 = vmatmul.bf16.vlgmr.msra.gmra.mxu1 %v11210_v62  ;;  %v9645_v5 = vld [vmem:[%s15277_s5 + $0x52c] sm:$0xf0]  ;;  %v6830_v14 = vor.u32 %v9537_v3, %v6827_v6  ;;  %v7339_v0 = vld [vmem:[%s15277_s5 + $0x5f0] sm:$0xf0] }
 0x180   :  { %2462 = vmatpush.bf16.msra.mxu3 %v6954_v11  ;;  %2484 = vmatpush.bf16.msrb.mxu1 %v7594_v12  ;;  %v7242_v10 = vor.u32 %v9645_v5, %v7241_v4  ;;  %v7433_v11 = vld [vmem:[%s15277_s5 + $0x690] sm:$0xf]  ;;  %v9553_v3 = vld [vmem:[%s15277_s5 + $0x254] sm:$0xf] }
 0x181   :  { %v9693_v12 = vld [vmem:[%s15277_s5 + $0x6ac] sm:$0xf0]  ;;  %v6891_v6 = vld [vmem:[%s15277_s5 + $0x270] sm:$0xf0] }
 0x182   :  { %2448 = vmatpush.bf16.msra.mxu2 %v6730_v19  ;;  %2426 = vmatpush.bf16.msra.mxu0 %v7110_v29  ;;  %v7209_v17 = vld [vmem:[%s15277_s5 + $0x4d0] sm:$0xf]  ;;  %v9529_v19 = vld [vmem:[%s15277_s5 + $0x194] sm:$0xf]  ;;  %v7434_v21 = vor.u32 %v9693_v12, %v7433_v11 }
 0x183   :  { %v9637_v18 = vld [vmem:[%s15277_s5 + $0x4ec] sm:$0xf0]  ;;  %v6987_v29 = vld [vmem:[%s15277_s5 + $0x330] sm:$0xf0] }
 0x184   :  { %2463 = vmatpush.bf16.msra.mxu3 %v6922_v27  ;;  %2485 = vmatpush.bf16.msrb.mxu1 %v7562_v28  ;;  %v7210_v24 = vor.u32 %v9637_v18, %v7209_v17  ;;  %v9685_v26 = vld [vmem:[%s15277_s5 + $0x66c] sm:$0xf0]  ;;  %v9577_v27 = vld [vmem:[%s15277_s5 + $0x314] sm:$0xf]  ;;  %v6798_v28 = vor.u32 %v9529_v19, %v6795_v20 }
 0x185   :  { %2427 = vmatmul.bf16.vlgmr.msra.gmra.mxu0 %v11250_v22  ;;  %v7177_v31 = vld [vmem:[%s15277_s5 + $0x490] sm:$0xf]  ;;  %v7402_v35 = vor.u32 %v9685_v26, %v7401_v25  ;;  %v6990_v37 = vor.u32 %v9577_v27, %v6987_v29  ;;  %v6667_v11 = vld [vmem:[%s15277_s5 + $0xb0] sm:$0xf0]  ;;  %v9606_v25 = vld [vmem:[%s15277_s5 + $0x3f4] sm:$0xf0] }
 0x186   :  { %2449 = vmatpush.bf16.msra.mxu2 %v6698_v33  ;;  %2471 = vmatpush.bf16.msrb.mxu0 %v7338_v34  ;;  %v9629_v32 = vld [vmem:[%s15277_s5 + $0x4ac] sm:$0xf0]  ;;  %v9521_v33 = vld [vmem:[%s15277_s5 + $0x154] sm:$0xf] }
 0x187   :  { %v6763_v34 = vld [vmem:[%s15277_s5 + $0x170] sm:$0xf0]  ;;  %v7369_v36 = vld [vmem:[%s15277_s5 + $0x610] sm:$0xf]  ;;  %v7178_v38 = vor.u32 %v9629_v32, %v7177_v31 }
 0x188   :  { %2464 = vmatpush.bf16.msra.mxu3 %v6890_v41  ;;  %2486 = vmatpush.bf16.msrb.mxu1 %v7530_v43  ;;  %v9677_v39 = vld [vmem:[%s15277_s5 + $0x62c] sm:$0xf0]  ;;  %v6955_v41 = vld [vmem:[%s15277_s5 + $0x2f0] sm:$0xf0]  ;;  %v6766_v42 = vor.u32 %v9521_v33, %v6763_v34 }
 0x189   :  { %v9729_v43 = vld [vmem:[%s15277_s5 + $0x7d4] sm:$0xf]  ;;  %v7145_v45 = vld [vmem:[%s15277_s5 + $0x450] sm:$0xf]  ;;  %v7370_v49 = vor.u32 %v9677_v39, %v7369_v36  ;;  %v6958_v50 = vor.u32 %v9569_v40, %v6955_v41  ;;  %v9598_v39 = vld [vmem:[%s15277_s5 + $0x3b4] sm:$0xf0] }
 0x18a   :  { %2450 = vmatpush.bf16.msra.mxu2 %v6666_v47  ;;  %2472 = vmatpush.bf16.msrb.mxu0 %v7306_v48  ;;  %v9621_v46 = vld [vmem:[%s15277_s5 + $0x46c] sm:$0xf0]  ;;  %v9513_v47 = vld [vmem:[%s15277_s5 + $0x114] sm:$0xf]  ;;  %v7598_v51 = vor.u32 %v9729_v43, %v7595_v44  ;;  %v6833_v44 = vld [vmem:[%s15277_s5 + $0x1d8] sm:$0xf] }
 0x18b   :  { %v6731_v48 = vld [vmem:[%s15277_s5 + $0x130] sm:$0xf0]  ;;  %v7146_v54 = vor.u32 %v9621_v46, %v7145_v45  ;;  %v7113_v58 = vld [vmem:[%s15277_s5 + $0x410] sm:$0xf]  ;;  %v9542_v45 = vld [vmem:[%s15277_s5 + $0x1f4] sm:$0xf0] }
 0x18c   :  { %2465 = vmatpush.bf16.msra.mxu3 %v6858_v55  ;;  %2487 = vmatpush.bf16.msrb.mxu1 %v7498_v56  ;;  %v6734_v55 = vor.u32 %v9513_v47, %v6731_v48  ;;  %v9721_v56 = vld [vmem:[%s15277_s5 + $0x794] sm:$0xf]  ;;  %v9613_v59 = vld [vmem:[%s15277_s5 + $0x42c] sm:$0xf0]  ;;  %v6834_v53 = vor.u32 %v9542_v45, %v6833_v44 }
 0x18d   :  { %v7114_v4 = vor.u32 %v9613_v59, %v7113_v58  ;;  %v9657_v12 = vld [vmem:[%s15277_s5 + $0x594] sm:$0xf]  ;;  %v9534_v58 = vld [vmem:[%s15277_s5 + $0x1b4] sm:$0xf0] }
 0x18e   :  { %2451 = vmatpush.bf16.msra.mxu2 %v6634_v60  ;;  %2473 = vmatpush.bf16.msrb.mxu0 %v7274_v61  ;;  %v9505_v60 = vld [vmem:[%s15277_s5 + $0xd4] sm:$0xf] }
 0x18f   :  { %2466 = vmatmul.bf16.vlgmr.msra.gmra.mxu3 %v11145_v15  ;;  %v6699_v61 = vld [vmem:[%s15277_s5 + $0xf0] sm:$0xf0] }
 0x190   :  { %2510 = vmatpush.bf16.msrb.mxu3 %v7086_v57  ;;  %2488 = vmatpush.bf16.msrb.mxu1 %v7466_v7  ;;  %v7563_v57 = vld [vmem:[%s15277_s5 + $0x7b0] sm:$0xf0]  ;;  %v6702_v5 = vor.u32 %v9505_v60, %v6699_v61 }
 0x191   :  { %v7566_v2 = vor.u32 %v9721_v56, %v7563_v57  ;;  %v9713_v7 = vld [vmem:[%s15277_s5 + $0x754] sm:$0xf]  ;;  %v6801_v57 = vld [vmem:[%s15277_s5 + $0x198] sm:$0xf] }
 0x192   :  { %2452 = vmatpush.bf16.msra.mxu2 %v6602_v9  ;;  %2474 = vmatpush.bf16.msrb.mxu0 %v7242_v10  ;;  %v7531_v9 = vld [vmem:[%s15277_s5 + $0x770] sm:$0xf0] }
 0x193   :  { %v9497_v10 = vld [vmem:[%s15277_s5 + $0x94] sm:$0xf]  ;;  %v7534_v17 = vor.u32 %v9713_v7, %v7531_v9  ;;  %v9526_v7 = vld [vmem:[%s15277_s5 + $0x174] sm:$0xf0] }
 0x194   :  { %2511 = vmatpush.bf16.msrb.mxu3 %v7054_v8  ;;  %2489 = vmatpush.bf16.msrb.mxu1 %v7434_v21  ;;  %v7342_v8 = vor.u32 %v9665_v63, %v7339_v0  ;;  %v6670_v18 = vor.u32 %v9497_v10, %v6667_v11  ;;  %v6859_v19 = vld [vmem:[%s15277_s5 + $0x230] sm:$0xf0] }
 0x195   :  { %2453 = vmatmul.bf16.vlgmr.msra.gmra.mxu2 %v11167_v30  ;;  %v9705_v20 = vld [vmem:[%s15277_s5 + $0x714] sm:$0xf]  ;;  %v6862_v31 = vor.u32 %v9545_v16, %v6859_v19 }
 0x196   :  { %2497 = vmatpush.bf16.msrb.mxu2 %v6830_v14  ;;  %2475 = vmatpush.bf16.msrb.mxu0 %v7210_v24  ;;  %v6894_v14 = vor.u32 %v9553_v3, %v6891_v6  ;;  %v7499_v21 = vld [vmem:[%s15277_s5 + $0x730] sm:$0xf0]  ;;  %v7089_v24 = vld [vmem:[%s15277_s5 + $0x3d8] sm:$0xf] }
 0x197   :  { %v9489_v26 = vld [vmem:[%s15277_s5 + $0x54] sm:$0xf]  ;;  %v7502_v32 = vor.u32 %v9705_v20, %v7499_v21  ;;  %v7090_v33 = vor.u32 %v9606_v25, %v7089_v24  ;;  %v6769_v6 = vld [vmem:[%s15277_s5 + $0x158] sm:$0xf] }
 0x198   :  { %2512 = vmatpush.bf16.msrb.mxu3 %v7022_v23  ;;  %2490 = vmatpush.bf16.msrb.mxu1 %v7402_v35  ;;  %v7310_v23 = vor.u32 %v9657_v12, %v7307_v13  ;;  %v6635_v27 = vld [vmem:[%s15277_s5 + $0x70] sm:$0xf0]  ;;  %v6961_v13 = vld [vmem:[%s15277_s5 + $0x2d8] sm:$0xf]  ;;  %v6770_v16 = vor.u32 %v9526_v7, %v6769_v6  ;;  %v9602_v6 = vld [vmem:[%s15277_s5 + $0x3dc] sm:$0xf] }
 0x199   :  { %v7275_v29 = vld [vmem:[%s15277_s5 + $0x570] sm:$0xf0]  ;;  %v6638_v36 = vor.u32 %v9489_v26, %v6635_v27  ;;  %v6737_v21 = vld [vmem:[%s15277_s5 + $0x118] sm:$0xf]  ;;  %v7091_v7 = vld [vmem:[%s15277_s5 + $0x3f8] sm:$0xf0] }
 0x19a   :  { %2498 = vmatpush.bf16.msrb.mxu2 %v6798_v28  ;;  %2476 = vmatpush.bf16.msrb.mxu0 %v7178_v38  ;;  %v9649_v28 = vld [vmem:[%s15277_s5 + $0x554] sm:$0xf]  ;;  %v7057_v38 = vld [vmem:[%s15277_s5 + $0x398] sm:$0xf] }
 0x19b   :  { %v9697_v34 = vld [vmem:[%s15277_s5 + $0x6d4] sm:$0xf]  ;;  %v7058_v47 = vor.u32 %v9598_v39, %v7057_v38  ;;  %v6705_v38 = vld [vmem:[%s15277_s5 + $0xd8] sm:$0xf] }
 0x19c   :  { %2513 = vmatpush.bf16.msrb.mxu3 %v6990_v37  ;;  %2491 = vmatpush.bf16.msrb.mxu1 %v7370_v49  ;;  %v7467_v35 = vld [vmem:[%s15277_s5 + $0x6f0] sm:$0xf0]  ;;  %v7278_v37 = vor.u32 %v9649_v28, %v7275_v29  ;;  %v6929_v28 = vld [vmem:[%s15277_s5 + $0x298] sm:$0xf] }
 0x19d   :  { %v9481_v40 = vld [vmem:[%s15277_s5 + $0x14] sm:$0xf]  ;;  %v7470_v46 = vor.u32 %v9697_v34, %v7467_v35  ;;  %v9566_v29 = vld [vmem:[%s15277_s5 + $0x2b4] sm:$0xf0] }
 0x19e   :  { %2499 = vmatpush.bf16.msrb.mxu2 %v6766_v42  ;;  %2477 = vmatpush.bf16.msrb.mxu0 %v7146_v54  ;;  %v6603_v41 = vld [vmem:[%s15277_s5 + $0x30] sm:$0xf0]  ;;  %v9590_v54 = vld [vmem:[%s15277_s5 + $0x374] sm:$0xf0] }
 0x19f   :  { %2492 = vmatmul.bf16.vlgmr.msrb.gmra.mxu1 %v11210_v62  ;;  %v9641_v42 = vld [vmem:[%s15277_s5 + $0x514] sm:$0xf]  ;;  %v6606_v48 = vor.u32 %v9481_v40, %v6603_v41  ;;  %v7026_v60 = vor.u32 %v9590_v54, %v7025_v52  ;;  %v7569_v34 = vld [vmem:[%s15277_s5 + $0x798] sm:$0xf] }
 0x1a0   :  { %2514 = vmatpush.bf16.msrb.mxu3 %v6958_v50  ;;  %2536 = vmatpush.bf16.msra.mxu1 %v7598_v51  ;;  %v7243_v43 = vld [vmem:[%s15277_s5 + $0x530] sm:$0xf0]  ;;  %v9726_v35 = vld [vmem:[%s15277_s5 + $0x7b4] sm:$0xf0] }
 0x1a1   :  { %v7246_v49 = vor.u32 %v9641_v42, %v7243_v43  ;;  %v9689_v50 = vld [vmem:[%s15277_s5 + $0x694] sm:$0xf]  ;;  %v9510_v39 = vld [vmem:[%s15277_s5 + $0xf4] sm:$0xf0]  ;;  %v6930_v43 = vor.u32 %v9566_v29, %v6929_v28  ;;  %v7570_v44 = vor.u32 %v9726_v35, %v7569_v34 }
 0x1a2   :  { %2500 = vmatpush.bf16.msrb.mxu2 %v6734_v55  ;;  %2478 = vmatpush.bf16.msrb.mxu0 %v7114_v4  ;;  %v7435_v51 = vld [vmem:[%s15277_s5 + $0x6b0] sm:$0xf0]  ;;  %v9582_v4 = vld [vmem:[%s15277_s5 + $0x334] sm:$0xf0] }
 0x1a3   :  { %v9633_v55 = vld [vmem:[%s15277_s5 + $0x4d4] sm:$0xf]  ;;  %v7438_v59 = vor.u32 %v9689_v50, %v7435_v51  ;;  %v7345_v41 = vld [vmem:[%s15277_s5 + $0x5d8] sm:$0xf] }
 0x1a4   :  { %2515 = vmatpush.bf16.msrb.mxu3 %v6926_v1  ;;  %2537 = vmatpush.bf16.msra.mxu1 %v7566_v2  ;;  %v7211_v56 = vld [vmem:[%s15277_s5 + $0x4f0] sm:$0xf0]  ;;  %v6993_v1 = vld [vmem:[%s15277_s5 + $0x318] sm:$0xf]  ;;  %v6802_v2 = vor.u32 %v9534_v58, %v6801_v57 }
 0x1a5   :  { %2479 = vmatmul.bf16.vlgmr.msrb.gmra.mxu0 %v11250_v22  ;;  %v7214_v61 = vor.u32 %v9633_v55, %v7211_v56  ;;  %v9681_v63 = vld [vmem:[%s15277_s5 + $0x654] sm:$0xf]  ;;  %v6994_v10 = vor.u32 %v9582_v4, %v6993_v1  ;;  %v9670_v42 = vld [vmem:[%s15277_s5 + $0x5f4] sm:$0xf0] }
 0x1a6   :  { %2501 = vmatpush.bf16.msrb.mxu2 %v6702_v5  ;;  %2523 = vmatpush.bf16.msra.mxu0 %v7342_v8  ;;  %v7403_v0 = vld [vmem:[%s15277_s5 + $0x670] sm:$0xf0]  ;;  %v7346_v51 = vor.u32 %v9670_v42, %v7345_v41  ;;  %v9718_v52 = vld [vmem:[%s15277_s5 + $0x774] sm:$0xf0]  ;;  %v9586_v42 = vld [vmem:[%s15277_s5 + $0x35c] sm:$0xf] }
 0x1a7   :  { %v9625_v5 = vld [vmem:[%s15277_s5 + $0x494] sm:$0xf]  ;;  %v7406_v8 = vor.u32 %v9681_v63, %v7403_v0  ;;  %v9502_v54 = vld [vmem:[%s15277_s5 + $0xb4] sm:$0xf0] }
 0x1a8   :  { %2516 = vmatpush.bf16.msrb.mxu3 %v6894_v14  ;;  %2538 = vmatpush.bf16.msra.mxu1 %v7534_v17  ;;  %v7179_v3 = vld [vmem:[%s15277_s5 + $0x4b0] sm:$0xf0]  ;;  %v9574_v14 = vld [vmem:[%s15277_s5 + $0x2f4] sm:$0xf0] }
 0x1a9   :  { %v9673_v9 = vld [vmem:[%s15277_s5 + $0x614] sm:$0xf]  ;;  %v7182_v11 = vor.u32 %v9625_v5, %v7179_v3  ;;  %v7601_v17 = vld [vmem:[%s15277_s5 + $0x7d8] sm:$0xf]  ;;  %v6962_v26 = vor.u32 %v9574_v14, %v6961_v13  ;;  %v7094_v14 = vor.u32 %v9602_v6, %v7091_v7 }
 0x1aa   :  { %2502 = vmatpush.bf16.msrb.mxu2 %v6670_v18  ;;  %2524 = vmatpush.bf16.msra.mxu0 %v7310_v23  ;;  %v7371_v12 = vld [vmem:[%s15277_s5 + $0x630] sm:$0xf0]  ;;  %v9734_v18 = vld [vmem:[%s15277_s5 + $0x7f4] sm:$0xf0] }
 0x1ab   :  { %v9617_v19 = vld [vmem:[%s15277_s5 + $0x454] sm:$0xf]  ;;  %v9518_v23 = vld [vmem:[%s15277_s5 + $0x134] sm:$0xf0]  ;;  %v7374_v24 = vor.u32 %v9673_v9, %v7371_v12  ;;  %v7602_v27 = vor.u32 %v9734_v18, %v7601_v17 }
 0x1ac   :  { %2517 = vmatpush.bf16.msrb.mxu3 %v6862_v31  ;;  %2539 = vmatpush.bf16.msra.mxu1 %v7502_v32  ;;  %v7147_v20 = vld [vmem:[%s15277_s5 + $0x470] sm:$0xf0]  ;;  %v12002_v31 = vld [vmem:[%s15279_s6] sm:$0xff]  ;;  %v7313_v56 = vld [vmem:[%s15277_s5 + $0x598] sm:$0xf] }
 0x1ad   :  { %v7150_v32 = vor.u32 %v9617_v19, %v7147_v20  ;;  %v941_v40 = vperm.slane %v12002_v31, 0  ;;  %v9662_v57 = vld [vmem:[%s15277_s5 + $0x5b4] sm:$0xf0] }
 0x1ae   :  { %2503 = vmatpush.bf16.msrb.mxu2 %v6638_v36  ;;  %2525 = vmatpush.bf16.msra.mxu0 %v7278_v37  ;;  %v9609_v36 = vld [vmem:[%s15277_s5 + $0x414] sm:$0xf]  ;;  %v9550_v0 = vld [vmem:[%s15277_s5 + $0x234] sm:$0xf0]  ;;  %v7314_v3 = vor.u32 %v9662_v57, %v7313_v56  ;;  %v9578_v56 = vld [vmem:[%s15277_s5 + $0x31c] sm:$0xf] }
 0x1af   :  { %2518 = vmatmul.bf16.vlgmr.msrb.gmra.mxu3 %v11145_v15  ;;  %v7115_v37 = vld [vmem:[%s15277_s5 + $0x430] sm:$0xf0]  ;;  %v7505_v1 = vld [vmem:[%s15277_s5 + $0x718] sm:$0xf] }
 0x1b0   :  { %2562 = vmatpush.bf16.msra.mxu3 %v7090_v33  ;;  %2540 = vmatpush.bf16.msra.mxu1 %v7470_v46  ;;  %v6738_v33 = vor.u32 %v9518_v23, %v6737_v21  ;;  %v7118_v45 = vor.u32 %v9609_v36, %v7115_v37  ;;  %v6706_v46 = vor.u32 %v9510_v39, %v6705_v38  ;;  %v9494_v9 = vld [vmem:[%s15277_s5 + $0x74] sm:$0xf0]  ;;  %v9594_v21 = vld [vmem:[%s15277_s5 + $0x39c] sm:$0xf] }
 0x1b1   :  { %v9702_v17 = vld [vmem:[%s15277_s5 + $0x6f4] sm:$0xf0]  ;;  %v7059_v23 = vld [vmem:[%s15277_s5 + $0x3b8] sm:$0xf0] }
 0x1b2   :  { %2504 = vmatpush.bf16.msrb.mxu2 %v6606_v48  ;;  %2526 = vmatpush.bf16.msra.mxu0 %v7246_v49  ;;  %v2259_v25 = vpop.f32.mrf.mxu3  ;;  %v9558_v48 = vld [vmem:[%s15277_s5 + $0x274] sm:$0xf0]  ;;  %v7062_v36 = vor.u32 %v9594_v21, %v7059_v23  ;;  %v9562_v23 = vld [vmem:[%s15277_s5 + $0x29c] sm:$0xf] }
 0x1b3   :  { %v7537_v49 = vld [vmem:[%s15277_s5 + $0x758] sm:$0xf] }
 0x1b4   :  { %2563 = vmatpush.bf16.msra.mxu3 %v7058_v47  ;;  %2541 = vmatpush.bf16.msra.mxu1 %v7438_v59  ;;  %v6897_v47 = vld [vmem:[%s15277_s5 + $0x258] sm:$0xf] }
 0x1b5   :  { %2505 = vmatmul.bf16.vlgmr.msrb.gmra.mxu2 %v11167_v30  ;;  %v6898_v59 = vor.u32 %v9558_v48, %v6897_v47  ;;  %v9694_v41 = vld [vmem:[%s15277_s5 + $0x6b4] sm:$0xf0]  ;;  %v9530_v48 = vld [vmem:[%s15277_s5 + $0x19c] sm:$0xf] }
 0x1b6   :  { %2549 = vmatpush.bf16.msra.mxu2 %v6834_v53  ;;  %2527 = vmatpush.bf16.msra.mxu0 %v7214_v61  ;;  %v6673_v53 = vld [vmem:[%s15277_s5 + $0x98] sm:$0xf]  ;;  %v7538_v61 = vor.u32 %v9718_v52, %v7537_v49  ;;  %v6803_v49 = vld [vmem:[%s15277_s5 + $0x1b8] sm:$0xf0] }
 0x1b7   :  { %v6674_v63 = vor.u32 %v9502_v54, %v6673_v53  ;;  %v9638_v47 = vld [vmem:[%s15277_s5 + $0x4f4] sm:$0xf0]  ;;  %v6806_v57 = vor.u32 %v9530_v48, %v6803_v49  ;;  %v9714_v48 = vld [vmem:[%s15277_s5 + $0x75c] sm:$0xf] }
 0x1b8   :  { %2564 = vmatpush.bf16.msra.mxu3 %v7026_v60  ;;  %2542 = vmatpush.bf16.msra.mxu1 %v7406_v8  ;;  %v2246_v50 = vpop.f32.mrf.mxu2  ;;  %v6865_v60 = vld [vmem:[%s15277_s5 + $0x218] sm:$0xf] }
 0x1b9   :  { %v2247_v55 = vadd.f32 %v2246_v50, %v941_v40  ;;  %v6641_v8 = vld [vmem:[%s15277_s5 + $0x58] sm:$0xf]  ;;  %v6866_v12 = vor.u32 %v9550_v0, %v6865_v60  ;;  %v9522_v0 = vld [vmem:[%s15277_s5 + $0x15c] sm:$0xf] }
 0x1ba   :  { %2550 = vmatpush.bf16.msra.mxu2 %v6802_v2  ;;  %2528 = vmatpush.bf16.msra.mxu0 %v7182_v11  ;;  %v2261_v58 = vpop.f32.mrf.mxu3  ;;  %v9710_v2 = vld [vmem:[%s15277_s5 + $0x734] sm:$0xf0]  ;;  %v6642_v19 = vor.u32 %v9494_v9, %v6641_v8  ;;  %v9570_v8 = vld [vmem:[%s15277_s5 + $0x2dc] sm:$0xf] }
 0x1bb   :  { %v2260_v4 = vadd.f32 %v2259_v25, %v2247_v55  ;;  %v9654_v11 = vld [vmem:[%s15277_s5 + $0x574] sm:$0xf0]  ;;  %v7506_v13 = vor.u32 %v9710_v2, %v7505_v1  ;;  %v6995_v58 = vld [vmem:[%s15277_s5 + $0x338] sm:$0xf0] }
 0x1bc   :  { %2565 = vmatpush.bf16.msra.mxu3 %v6994_v10  ;;  %2543 = vmatpush.bf16.msra.mxu1 %v7374_v24  ;;  %v2285_v5 = vpop.f32.mrf.mxu1  ;;  %v7281_v10 = vld [vmem:[%s15277_s5 + $0x558] sm:$0xf]  ;;  %v6771_v1 = vld [vmem:[%s15277_s5 + $0x178] sm:$0xf0] }
 0x1bd   :  { %v7282_v20 = vor.u32 %v9654_v11, %v7281_v10  ;;  %v6609_v24 = vld [vmem:[%s15277_s5 + $0x18] sm:$0xf]  ;;  %v6963_v9 = vld [vmem:[%s15277_s5 + $0x2f8] sm:$0xf0]  ;;  %v6774_v10 = vor.u32 %v9522_v0, %v6771_v1 }
 0x1be   :  { %2551 = vmatpush.bf16.msra.mxu2 %v6770_v16  ;;  %2529 = vmatpush.bf16.msra.mxu0 %v7150_v32  ;;  %v7473_v16 = vld [vmem:[%s15277_s5 + $0x6d8] sm:$0xf]  ;;  %v9538_v32 = vld [vmem:[%s15277_s5 + $0x1dc] sm:$0xf] }
 0x1bf   :  { %2544 = vmatmul.bf16.vlgmr.msra.gmra.mxu1 %v11210_v62  ;;  %v9486_v25 = vld [vmem:[%s15277_s5 + $0x34] sm:$0xf0]  ;;  %v7474_v35 = vor.u32 %v9702_v17, %v7473_v16  ;;  %v9730_v11 = vld [vmem:[%s15277_s5 + $0x7dc] sm:$0xf] }
 0x1c0   :  { %2566 = vmatpush.bf16.msra.mxu3 %v6962_v26  ;;  %2588 = vmatpush.bf16.msrb.mxu1 %v7602_v27  ;;  %v2248_v18 = vpop.f32.mrf.mxu2  ;;  %v7249_v26 = vld [vmem:[%s15277_s5 + $0x518] sm:$0xf]  ;;  %v6610_v38 = vor.u32 %v9486_v25, %v6609_v24  ;;  %v9514_v16 = vld [vmem:[%s15277_s5 + $0x11c] sm:$0xf] }
 0x1c1   :  { %v9646_v27 = vld [vmem:[%s15277_s5 + $0x534] sm:$0xf0]  ;;  %v6739_v17 = vld [vmem:[%s15277_s5 + $0x138] sm:$0xf0] }
 0x1c2   :  { %2552 = vmatpush.bf16.msra.mxu2 %v6738_v33  ;;  %2530 = vmatpush.bf16.msra.mxu0 %v7118_v45  ;;  %v2272_v28 = vpop.f32.mrf.mxu0  ;;  %v12109_v29 = vpop.f32.mrf.mxu3  ;;  %v6835_v33 = vld [vmem:[%s15277_s5 + $0x1f8] sm:$0xf0]  ;;  %v7250_v39 = vor.u32 %v9646_v27, %v7249_v26  ;;  %v7441_v40 = vld [vmem:[%s15277_s5 + $0x698] sm:$0xf]  ;;  %v6742_v26 = vor.u32 %v9514_v16, %v6739_v17 }
 0x1c3   :  { %v2273_v34 = vadd.f32 %v2272_v28, %v2260_v4  ;;  %v7027_v45 = vld [vmem:[%s15277_s5 + $0x378] sm:$0xf0]  ;;  %v7442_v50 = vor.u32 %v9694_v41, %v7441_v40  ;;  %v7409_v54 = vld [vmem:[%s15277_s5 + $0x658] sm:$0xf] }
 0x1c4   :  { %2567 = vmatpush.bf16.msra.mxu3 %v6930_v43  ;;  %2589 = vmatpush.bf16.msrb.mxu1 %v7570_v44  ;;  %v2287_v37 = vpop.f32.mrf.mxu1  ;;  %v6838_v44 = vor.u32 %v9538_v32, %v6835_v33  ;;  %v7030_v52 = vor.u32 %v9586_v42, %v7027_v45  ;;  %v9686_v55 = vld [vmem:[%s15277_s5 + $0x674] sm:$0xf0]  ;;  %v6931_v24 = vld [vmem:[%s15277_s5 + $0x2b8] sm:$0xf0] }
 0x1c5   :  { %2531 = vmatmul.bf16.vlgmr.msra.gmra.mxu0 %v11250_v22  ;;  %v12126_v43 = vadd.f32 %v2285_v5, %v2273_v34  ;;  %v9630_v60 = vld [vmem:[%s15277_s5 + $0x4b4] sm:$0xf0]  ;;  %v7410_v2 = vor.u32 %v9686_v55, %v7409_v54  ;;  %v9722_v27 = vld [vmem:[%s15277_s5 + $0x79c] sm:$0xf]  ;;  %v6934_v41 = vor.u32 %v9562_v23, %v6931_v24 }
 0x1c6   :  { %2553 = vmatpush.bf16.msra.mxu2 %v6706_v46  ;;  %2575 = vmatpush.bf16.msrb.mxu0 %v7346_v51  ;;  %v7217_v46 = vld [vmem:[%s15277_s5 + $0x4d8] sm:$0xf]  ;;  %v7571_v28 = vld [vmem:[%s15277_s5 + $0x7b8] sm:$0xf0] }
 0x1c7   :  { %v7218_v53 = vor.u32 %v9638_v47, %v7217_v46  ;;  %v7377_v4 = vld [vmem:[%s15277_s5 + $0x618] sm:$0xf]  ;;  %v6707_v37 = vld [vmem:[%s15277_s5 + $0xf8] sm:$0xf0]  ;;  %v7574_v42 = vor.u32 %v9722_v27, %v7571_v28  ;;  %v7805_v27 = vld [vmem:[%s15280_s7 + $0x188] sm:$0xf] }
 0x1c8   :  { %2568 = vmatpush.bf16.msra.mxu3 %v6898_v59  ;;  %2590 = vmatpush.bf16.msrb.mxu1 %v7538_v61  ;;  %v12144_v51 = vpop.f32.mrf.mxu2  ;;  %v7185_v59 = vld [vmem:[%s15277_s5 + $0x498] sm:$0xf]  ;;  %v9554_v46 = vld [vmem:[%s15277_s5 + $0x25c] sm:$0xf]  ;;  %v9787_v28 = vld [vmem:[%s15280_s7 + $0x1a0] sm:$0xf0] }
 0x1c9   :  { %v7186_v6 = vor.u32 %v9630_v60, %v7185_v59  ;;  %v9678_v7 = vld [vmem:[%s15277_s5 + $0x634] sm:$0xf0]  ;;  %v6899_v47 = vld [vmem:[%s15277_s5 + $0x278] sm:$0xf0]  ;;  %vm2653_vm7 = vcmp.ge.f32.partialorder %v12126_v43, 0.0 }
 0x1ca   :  { %2554 = vmatpush.bf16.msra.mxu2 %v6674_v63  ;;  %2576 = vmatpush.bf16.msrb.mxu0 %v7314_v3  ;;  %v2274_v61 = vpop.f32.mrf.mxu0  ;;  %v2313_v63 = vpop.f32.mrf.mxu3  ;;  %v6998_v3 = vor.u32 %v9578_v56, %v6995_v58  ;;  %v7378_v18 = vor.u32 %v9678_v7, %v7377_v4  ;;  %v7121_v32 = vld [vmem:[%s15277_s5 + $0x418] sm:$0xf]  ;;  %v9658_v54 = vld [vmem:[%s15277_s5 + $0x59c] sm:$0xf]  ;;  %v6902_v56 = vor.u32 %v9554_v46, %v6899_v47 }
 0x1cb   :  { %v7315_v55 = vld [vmem:[%s15277_s5 + $0x5b8] sm:$0xf0] }
 0x1cc   :  { %2569 = vmatpush.bf16.msra.mxu3 %v6866_v12  ;;  %2591 = vmatpush.bf16.msrb.mxu1 %v7506_v13  ;;  %v12174_v5 = vpop.f32.mrf.mxu1  ;;  %v7603_v12 = vld [vmem:[%s15277_s5 + $0x7f8] sm:$0xf0]  ;;  %v7153_v13 = vld [vmem:[%s15277_s5 + $0x458] sm:$0xf]  ;;  %v7318_v4 = vor.u32 %v9658_v54, %v7315_v55 }
 0x1cd   :  { %v7606_v21 = vor.u32 %v9730_v11, %v7603_v12  ;;  %v6867_v61 = vld [vmem:[%s15277_s5 + $0x238] sm:$0xf0] }
 0x1ce   :  { %2555 = vmatpush.bf16.msra.mxu2 %v6642_v19  ;;  %2577 = vmatpush.bf16.msrb.mxu0 %v7282_v20  ;;  %v6966_v20 = vor.u32 %v9570_v8, %v6963_v9  ;;  %v9706_v63 = vld [vmem:[%s15277_s5 + $0x71c] sm:$0xf] }
 0x1cf   :  { %2570 = vmatmul.bf16.vlgmr.msra.gmra.mxu3 %v11145_v15  ;;  %v7507_v0 = vld [vmem:[%s15277_s5 + $0x738] sm:$0xf0] }
 0x1d0   :  { %2614 = vmatpush.bf16.msrb.mxu3 %v7094_v14  ;;  %2592 = vmatpush.bf16.msrb.mxu1 %v7474_v35  ;;  %v9622_v14 = vld [vmem:[%s15277_s5 + $0x474] sm:$0xf0]  ;;  %v2300_v19 = vpop.f32.mrf.mxu2  ;;  %v9490_v7 = vld [vmem:[%s15277_s5 + $0x5c] sm:$0xf] }
 0x1d1   :  { %v7154_v25 = vor.u32 %v9622_v14, %v7153_v13  ;;  %v9614_v35 = vld [vmem:[%s15277_s5 + $0x434] sm:$0xf0]  ;;  %v6643_v8 = vld [vmem:[%s15277_s5 + $0x78] sm:$0xf0]  ;;  %v7510_v13 = vor.u32 %v9706_v63, %v7507_v0 }
 0x1d2   :  { %2556 = vmatpush.bf16.msra.mxu2 %v6610_v38  ;;  %2578 = vmatpush.bf16.msrb.mxu0 %v7250_v39  ;;  %v12218_v33 = vpop.f32.mrf.mxu0  ;;  %v12220_v34 = vpop.f32.mrf.mxu3  ;;  %v9666_v38 = vld [vmem:[%s15277_s5 + $0x5dc] sm:$0xf] }
 0x1d3   :  { %v7347_v39 = vld [vmem:[%s15277_s5 + $0x5f8] sm:$0xf0] }
 0x1d4   :  { %2615 = vmatpush.bf16.msrb.mxu3 %v7062_v36  ;;  %2593 = vmatpush.bf16.msrb.mxu1 %v7442_v50  ;;  %v9506_v36 = vld [vmem:[%s15277_s5 + $0xdc] sm:$0xf]  ;;  %v2339_v40 = vpop.f32.mrf.mxu1  ;;  %v7350_v49 = vor.u32 %v9666_v38, %v7347_v39 }
 0x1d5   :  { %2557 = vmatmul.bf16.vlgmr.msra.gmra.mxu2 %v11167_v30  ;;  %v6710_v45 = vor.u32 %v9506_v36, %v6707_v37  ;;  %v7539_v50 = vld [vmem:[%s15277_s5 + $0x778] sm:$0xf0] }
 0x1d6   :  { %2601 = vmatpush.bf16.msrb.mxu2 %v6838_v44  ;;  %2579 = vmatpush.bf16.msrb.mxu0 %v7218_v53  ;;  %v7122_v44 = vor.u32 %v9614_v35, %v7121_v32  ;;  %v6675_v53 = vld [vmem:[%s15277_s5 + $0xb8] sm:$0xf0]  ;;  %v7542_v59 = vor.u32 %v9714_v48, %v7539_v50  ;;  %v942_v48 = vperm.slane %v12002_v31, 1  ;;  %v9780_v50 = vld [vmem:[%s15280_s7 + $0x168] sm:$0xf0] }
 0x1d7   :  { %v9650_v9 = vld [vmem:[%s15277_s5 + $0x55c] sm:$0xf] }
 0x1d8   :  { %2616 = vmatpush.bf16.msrb.mxu3 %v7030_v52  ;;  %2594 = vmatpush.bf16.msrb.mxu1 %v7410_v2  ;;  %v9498_v52 = vld [vmem:[%s15277_s5 + $0x9c] sm:$0xf]  ;;  %v12265_v58 = vpop.f32.mrf.mxu2  ;;  %v2299_v0 = vadd.f32 %v12144_v51, %v942_v48  ;;  %v7861_v48 = vld [vmem:[%s15280_s7 + $0x1f8] sm:$0xf] }
 0x1d9   :  { %v6678_v60 = vor.u32 %v9498_v52, %v6675_v53  ;;  %v9698_v16 = vld [vmem:[%s15277_s5 + $0x6dc] sm:$0xf] }
 0x1da   :  { %2602 = vmatpush.bf16.msrb.mxu2 %v6806_v57  ;;  %2580 = vmatpush.bf16.msrb.mxu0 %v7186_v6  ;;  %v9546_v57 = vld [vmem:[%s15277_s5 + $0x21c] sm:$0xf]  ;;  %v2326_v1 = vpop.f32.mrf.mxu0  ;;  %v2365_v2 = vpop.f32.mrf.mxu3  ;;  %v9843_v6 = vld [vmem:[%s15280_s7 + $0x360] sm:$0xf0] }
 0x1db   :  { %v6870_v12 = vor.u32 %v9546_v57, %v6867_v61  ;;  %v7475_v17 = vld [vmem:[%s15277_s5 + $0x6f8] sm:$0xf0]  ;;  %v7945_v57 = vld [vmem:[%s15280_s7 + $0x2a0] sm:$0xf]  ;;  %v7749_v1 = vld [vmem:[%s15280_s7 + $0x118] sm:$0xf] }
 0x1dc   :  { %2617 = vmatpush.bf16.msrb.mxu3 %v6998_v3  ;;  %2595 = vmatpush.bf16.msrb.mxu1 %v7378_v18  ;;  %v8029_v3 = vld [vmem:[%s15280_s7 + $0x348] sm:$0xf]  ;;  %v12295_v11 = vpop.f32.mrf.mxu1  ;;  %v6646_v18 = vor.u32 %v9490_v7, %v6643_v8  ;;  %v9482_v23 = vld [vmem:[%s15277_s5 + $0x1c] sm:$0xf]  ;;  %v7478_v35 = vor.u32 %v9698_v16, %v7475_v17  ;;  %v9773_v2 = vld [vmem:[%s15280_s7 + $0x130] sm:$0xf0]  ;;  %v2312_v16 = vadd.f32 %v12109_v29, %v2299_v0 }
 0x1dd   :  { %v8030_v14 = vor.u32 %v9843_v6, %v8029_v3  ;;  %v6611_v24 = vld [vmem:[%s15277_s5 + $0x38] sm:$0xf0]  ;;  %v7917_v8 = vld [vmem:[%s15280_s7 + $0x268] sm:$0xf] }
 0x1de   :  { %2603 = vmatpush.bf16.msrb.mxu2 %v6774_v10  ;;  %2581 = vmatpush.bf16.msrb.mxu0 %v7154_v25  ;;  %v7283_v10 = vld [vmem:[%s15277_s5 + $0x578] sm:$0xf0]  ;;  %v6614_v37 = vor.u32 %v9482_v23, %v6611_v24  ;;  %v7889_v24 = vld [vmem:[%s15280_s7 + $0x230] sm:$0xf] }
 0x1df   :  { %2596 = vmatmul.bf16.vlgmr.msrb.gmra.mxu1 %v11210_v62  ;;  %v7286_v19 = vor.u32 %v9650_v9, %v7283_v10  ;;  %v9642_v25 = vld [vmem:[%s15277_s5 + $0x51c] sm:$0xf]  ;;  %v7750_v10 = vor.u32 %v9773_v2, %v7749_v1  ;;  %v8393_v2 = vld [vmem:[%s15280_s7 + $0x620] sm:$0xf] }
 0x1e0   :  { %2618 = vmatpush.bf16.msrb.mxu3 %v6966_v20  ;;  %2640 = vmatpush.bf16.msra.mxu1 %v7606_v21  ;;  %v8001_v20 = vld [vmem:[%s15280_s7 + $0x310] sm:$0xf]  ;;  %v9836_v21 = vld [vmem:[%s15280_s7 + $0x328] sm:$0xf0]  ;;  %v2352_v32 = vpop.f32.mrf.mxu2  ;;  %v9690_v39 = vld [vmem:[%s15277_s5 + $0x69c] sm:$0xf] }
 0x1e1   :  { %v8002_v36 = vor.u32 %v9836_v21, %v8001_v20  ;;  %v7443_v40 = vld [vmem:[%s15277_s5 + $0x6b8] sm:$0xf0]  ;;  %v2325_v21 = vadd.f32 %v12218_v33, %v2312_v16  ;;  %v8449_v33 = vld [vmem:[%s15280_s7 + $0x690] sm:$0xf]  ;;  %v9948_v32 = vld [vmem:[%s15280_s7 + $0x6a8] sm:$0xf0] }
 0x1e2   :  { %2604 = vmatpush.bf16.msrb.mxu2 %v6742_v26  ;;  %2582 = vmatpush.bf16.msrb.mxu0 %v7122_v44  ;;  %v7251_v26 = vld [vmem:[%s15277_s5 + $0x538] sm:$0xf0]  ;;  %v7806_v44 = vor.u32 %v9787_v28, %v7805_v27  ;;  %v7446_v52 = vor.u32 %v9690_v39, %v7443_v40  ;;  %v8253_v39 = vld [vmem:[%s15280_s7 + $0x508] sm:$0xf]  ;;  %v9899_v40 = vld [vmem:[%s15280_s7 + $0x520] sm:$0xf0] }
 0x1e3   :  { %v7254_v38 = vor.u32 %v9642_v25, %v7251_v26  ;;  %v9634_v46 = vld [vmem:[%s15277_s5 + $0x4dc] sm:$0xf]  ;;  %v9808_v25 = vld [vmem:[%s15280_s7 + $0x248] sm:$0xf0]  ;;  %v2661_v16 = vmul.f32 0.2, %v12126_v43 }
 0x1e4   :  { %2619 = vmatpush.bf16.msrb.mxu3 %v6934_v41  ;;  %2641 = vmatpush.bf16.msra.mxu1 %v7574_v42  ;;  %v7973_v41 = vld [vmem:[%s15280_s7 + $0x2d8] sm:$0xf]  ;;  %v12337_v42 = vpop.f32.mrf.mxu0  ;;  %v7219_v47 = vld [vmem:[%s15277_s5 + $0x4f8] sm:$0xf0] }
 0x1e5   :  { %2583 = vmatmul.bf16.vlgmr.msrb.gmra.mxu0 %v11250_v22  ;;  %v7222_v54 = vor.u32 %v9634_v46, %v7219_v47  ;;  %v9682_v55 = vld [vmem:[%s15277_s5 + $0x65c] sm:$0xf] }
 0x1e6   :  { %2605 = vmatpush.bf16.msrb.mxu2 %v6710_v45  ;;  %2627 = vmatpush.bf16.msra.mxu0 %v7350_v49  ;;  %v9829_v45 = vld [vmem:[%s15280_s7 + $0x2f0] sm:$0xf0]  ;;  %v2391_v49 = vpop.f32.mrf.mxu1  ;;  %v9626_v61 = vld [vmem:[%s15277_s5 + $0x49c] sm:$0xf] }
 0x1e7   :  { %v7974_v53 = vor.u32 %v9829_v45, %v7973_v41  ;;  %v7187_v63 = vld [vmem:[%s15277_s5 + $0x4b8] sm:$0xf0]  ;;  %v2338_v41 = vadd.f32 %v12174_v5, %v2325_v21  ;;  %v8450_v45 = vor.u32 %v9948_v32, %v8449_v33  ;;  %v9801_v49 = vld [vmem:[%s15280_s7 + $0x210] sm:$0xf0]  ;;  %v8421_v5 = vld [vmem:[%s15280_s7 + $0x658] sm:$0xf] }
 0x1e8   :  { %2620 = vmatpush.bf16.msrb.mxu3 %v6902_v56  ;;  %2642 = vmatpush.bf16.msra.mxu1 %v7542_v59  ;;  %v7411_v56 = vld [vmem:[%s15277_s5 + $0x678] sm:$0xf0]  ;;  %v7190_v51 = vor.u32 %v9626_v61, %v7187_v63  ;;  %v9927_v21 = vld [vmem:[%s15280_s7 + $0x600] sm:$0xf0]  ;;  %v8701_v33 = vld [vmem:[%s15280_s7 + $0x888] sm:$0xf] }
 0x1e9   :  { %v9674_v3 = vld [vmem:[%s15277_s5 + $0x61c] sm:$0xf]  ;;  %vm2654_vm6 = vcmp.ge.f32.partialorder %v2338_v41, 0.0  ;;  %v10011_v32 = vld [vmem:[%s15280_s7 + $0x8a0] sm:$0xf0] }
 0x1ea   :  { %2606 = vmatpush.bf16.msrb.mxu2 %v6678_v60  ;;  %2628 = vmatpush.bf16.msra.mxu0 %v7318_v4  ;;  %v9822_v60 = vld [vmem:[%s15280_s7 + $0x2b8] sm:$0xf0]  ;;  %v7414_v4 = vor.u32 %v9682_v55, %v7411_v56  ;;  %v8225_v55 = vld [vmem:[%s15280_s7 + $0x4d0] sm:$0xf]  ;;  %v2662_v56 = vmul.f32 0.2, %v2338_v41 }
 0x1eb   :  { %v7946_v6 = vor.u32 %v9822_v60, %v7945_v57  ;;  %v7379_v7 = vld [vmem:[%s15277_s5 + $0x638] sm:$0xf0]  ;;  %v944_v57 = vperm.slane %v12002_v31, 3  ;;  %v7833_v60 = vld [vmem:[%s15280_s7 + $0x1c0] sm:$0xf] }
 0x1ec   :  { %2621 = vmatpush.bf16.msrb.mxu3 %v6870_v12  ;;  %2643 = vmatpush.bf16.msra.mxu1 %v7510_v13  ;;  %v2378_v9 = vpop.f32.mrf.mxu0  ;;  %v8477_v12 = vld [vmem:[%s15280_s7 + $0x6c8] sm:$0xf]  ;;  %v9955_v13 = vld [vmem:[%s15280_s7 + $0x6e0] sm:$0xf0]  ;;  %v7155_v17 = vld [vmem:[%s15277_s5 + $0x478] sm:$0xf0]  ;;  %v7382_v20 = vor.u32 %v9674_v3, %v7379_v7 }
 0x1ed   :  { %v8478_v29 = vor.u32 %v9955_v13, %v8477_v12  ;;  %v9794_v1 = vld [vmem:[%s15280_s7 + $0x1d8] sm:$0xf0]  ;;  %v8197_v7 = vld [vmem:[%s15280_s7 + $0x498] sm:$0xf]  ;;  %v8925_v9 = vld [vmem:[%s15280_s7 + $0xa48] sm:$0xf]  ;;  %v2670_v12 = vsel %vm2654_vm6, %v2338_v41, %v2662_v56 }
 0x1ee   :  { %2607 = vmatpush.bf16.msrb.mxu2 %v6646_v18  ;;  %2629 = vmatpush.bf16.msra.mxu0 %v7286_v19  ;;  %v7721_v18 = vld [vmem:[%s15280_s7 + $0xe0] sm:$0xf]  ;;  %v9766_v19 = vld [vmem:[%s15280_s7 + $0xf8] sm:$0xf0]  ;;  %v943_v13 = vperm.slane %v12002_v31, 2 }
 0x1ef   :  { %2622 = vmatmul.bf16.vlgmr.msrb.gmra.mxu3 %v11145_v15  ;;  %v7777_v15 = vld [vmem:[%s15280_s7 + $0x150] sm:$0xf]  ;;  %v7722_v28 = vor.u32 %v9766_v19, %v7721_v18 }
 0x1f0   :  { %5530 = vmatpush.bf16.msra.mxu3 %v8030_v14  ;;  %2644 = vmatpush.bf16.msra.mxu1 %v7478_v35  ;;  %v7778_v59 = vor.u32 %v9780_v50, %v7777_v15  ;;  %v9618_v14 = vld [vmem:[%s15277_s5 + $0x45c] sm:$0xf]  ;;  %v8254_v15 = vor.u32 %v9899_v40, %v8253_v39  ;;  %v9941_v50 = vld [vmem:[%s15280_s7 + $0x670] sm:$0xf0] }
 0x1f1   :  { %v7158_v27 = vor.u32 %v9618_v14, %v7155_v17  ;;  %v9610_v35 = vld [vmem:[%s15277_s5 + $0x41c] sm:$0xf]  ;;  %v8422_v61 = vor.u32 %v9941_v50, %v8421_v5  ;;  %v7834_v14 = vor.u32 %v9794_v1, %v7833_v60  ;;  %v9871_v5 = vld [vmem:[%s15280_s7 + $0x440] sm:$0xf0]  ;;  %v10004_v50 = vld [vmem:[%s15280_s7 + $0x868] sm:$0xf0] }
 0x1f2   :  { %2608 = vmatpush.bf16.msrb.mxu2 %v6614_v37  ;;  %2630 = vmatpush.bf16.msra.mxu0 %v7254_v38  ;;  %v12419_v26 = vpop.f32.mrf.mxu3  ;;  %v7693_v37 = vld [vmem:[%s15280_s7 + $0xa8] sm:$0xf]  ;;  %v9759_v38 = vld [vmem:[%s15280_s7 + $0xc0] sm:$0xf0]  ;;  %v8645_v1 = vld [vmem:[%s15280_s7 + $0x818] sm:$0xf] }
 0x1f3   :  { %v7694_v47 = vor.u32 %v9759_v38, %v7693_v37  ;;  %v8897_v37 = vld [vmem:[%s15280_s7 + $0xa10] sm:$0xf]  ;;  %v10060_v38 = vld [vmem:[%s15280_s7 + $0xa28] sm:$0xf0] }
 0x1f4   :  { %5531 = vmatpush.bf16.msra.mxu3 %v8002_v36  ;;  %2645 = vmatpush.bf16.msra.mxu1 %v7446_v52  ;;  %v7123_v36 = vld [vmem:[%s15277_s5 + $0x438] sm:$0xf0]  ;;  %v7665_v52 = vld [vmem:[%s15280_s7 + $0x70] sm:$0xf] }
 0x1f5   :  { %2609 = vmatmul.bf16.vlgmr.msrb.gmra.mxu2 %v11167_v30  ;;  %v9815_v30 = vld [vmem:[%s15280_s7 + $0x280] sm:$0xf0]  ;;  %v7126_v46 = vor.u32 %v9610_v35, %v7123_v36  ;;  %v12533_v35 = vpack.c.bf16 %v2670_v12, %v2670_v12  ;;  %v2351_v36 = vadd.f32 %v12265_v58, %v943_v13  ;;  %v2669_v58 = vsel %vm2653_vm7, %v12126_v43, %v2661_v16  ;;  %v9906_v12 = vld [vmem:[%s15280_s7 + $0x558] sm:$0xf0]  ;;  %v8085_v13 = vld [vmem:[%s15280_s7 + $0x3b8] sm:$0xf] }
 0x1f6   :  { %5517 = vmatpush.bf16.msra.mxu2 %v7806_v44  ;;  %2631 = vmatpush.bf16.msra.mxu0 %v7222_v54  ;;  %v7918_v23 = vor.u32 %v9815_v30, %v7917_v8  ;;  %v7890_v44 = vor.u32 %v9808_v25, %v7889_v24  ;;  %v9885_v30 = vld [vmem:[%s15280_s7 + $0x4b0] sm:$0xf0]  ;;  %v8169_v24 = vld [vmem:[%s15280_s7 + $0x460] sm:$0xf] }
 0x1f8   :  { %5532 = vmatpush.bf16.msra.mxu3 %v7974_v53  ;;  %2646 = vmatpush.bf16.msra.mxu1 %v7414_v4  ;;  %v9752_v53 = vld [vmem:[%s15280_s7 + $0x88] sm:$0xf0]  ;;  %v2402_v54 = vpop.f32.mrf.mxu2  ;;  %v9934_v4 = vld [vmem:[%s15280_s7 + $0x638] sm:$0xf0] }
 0x1f9   :  { %v7666_v0 = vor.u32 %v9752_v53, %v7665_v52  ;;  %v2403_v17 = vadd.f32 %v2402_v54, %v944_v57  ;;  %v8394_v18 = vor.u32 %v9934_v4, %v8393_v2  ;;  %v8898_v52 = vor.u32 %v10060_v38, %v8897_v37  ;;  %v8869_v54 = vld [vmem:[%s15280_s7 + $0x9d8] sm:$0xf]  ;;  %v9997_v2 = vld [vmem:[%s15280_s7 + $0x830] sm:$0xf0]  ;;  %v8785_v37 = vld [vmem:[%s15280_s7 + $0x930] sm:$0xf] }
 0x1fa   :  { %5518 = vmatpush.bf16.msra.mxu2 %v7778_v59  ;;  %2632 = vmatpush.bf16.msra.mxu0 %v7190_v51  ;;  %v7862_v59 = vor.u32 %v9801_v49, %v7861_v48  ;;  %v2417_v63 = vpop.f32.mrf.mxu3  ;;  %v9745_v51 = vld [vmem:[%s15280_s7 + $0x50] sm:$0xf0]  ;;  %v9920_v48 = vld [vmem:[%s15280_s7 + $0x5c8] sm:$0xf0]  ;;  %v2364_v53 = vadd.f32 %v12220_v34, %v2351_v36  ;;  %v8309_v34 = vld [vmem:[%s15280_s7 + $0x578] sm:$0xf] }
 0x1fb   :  { %v2416_v40 = vadd.f32 %v12419_v26, %v2403_v17  ;;  %v8141_v26 = vld [vmem:[%s15280_s7 + $0x428] sm:$0xf]  ;;  %v8113_v63 = vld [vmem:[%s15280_s7 + $0x3f0] sm:$0xf]  ;;  %v9990_v17 = vld [vmem:[%s15280_s7 + $0x7f8] sm:$0xf0] }
 0x1fc   :  { %5533 = vmatpush.bf16.msra.mxu3 %v7946_v6  ;;  %2647 = vmatpush.bf16.msra.mxu1 %v7382_v20  ;;  %v7637_v6 = vld [vmem:[%s15280_s7 + $0x38] sm:$0xf]  ;;  %v12493_v8 = vpop.f32.mrf.mxu1  ;;  %v8365_v20 = vld [vmem:[%s15280_s7 + $0x5e8] sm:$0xf]  ;;  %v2377_v57 = vadd.f32 %v12337_v42, %v2364_v53  ;;  %v9864_v42 = vld [vmem:[%s15280_s7 + $0x408] sm:$0xf0] }
 0x1fd   :  { %v7638_v19 = vor.u32 %v9745_v51, %v7637_v6  ;;  %v8366_v39 = vor.u32 %v9927_v21, %v8365_v20  ;;  %v10046_v6 = vld [vmem:[%s15280_s7 + $0x9b8] sm:$0xf0]  ;;  %v10039_v20 = vld [vmem:[%s15280_s7 + $0x980] sm:$0xf0]  ;;  %v10032_v38 = vld [vmem:[%s15280_s7 + $0x948] sm:$0xf0] }
 0x1fe   :  { %5519 = vmatpush.bf16.msra.mxu2 %v7750_v10  ;;  %2633 = vmatpush.bf16.msra.mxu0 %v7158_v27  ;;  %v10067_v10 = vld [vmem:[%s15280_s7 + $0xa60] sm:$0xf0] }
 0x1ff   :  { %2648 = vmatmul.bf16.vlgmr.msra.gmra.mxu1 %v11210_v62  ;;  %v9892_v62 = vld [vmem:[%s15280_s7 + $0x4e8] sm:$0xf0]  ;;  %v8926_v25 = vor.u32 %v10067_v10, %v8925_v9  ;;  %v8114_v9 = vor.u32 %v9864_v42, %v8113_v63  ;;  %v8646_v10 = vor.u32 %v9997_v2, %v8645_v1  ;;  %v10109_v63 = vld [vmem:[%s15280_s7 + $0xbb0] sm:$0xf0]  ;;  %v8031_v1 = vld [vmem:[%s15280_s7 + $0x364] sm:$0xf0] }
 0x200   :  { %5534 = vmatpush.bf16.msra.mxu3 %v7918_v23  ;;  %5556 = vmatpush.bf16.msrb.mxu1 %v8478_v29  ;;  %v8226_v3 = vor.u32 %v9892_v62, %v8225_v55  ;;  %v8198_v23 = vor.u32 %v9885_v30, %v8197_v7  ;;  %v9738_v29 = vld [vmem:[%s15280_s7 + $0x18] sm:$0xf0]  ;;  %v2404_v27 = vpop.f32.mrf.mxu2  ;;  %v10053_v55 = vld [vmem:[%s15280_s7 + $0x9f0] sm:$0xf0]  ;;  %v12572_v62 = vpack.c.bf16 %v2669_v58, %v2669_v58  ;;  %v9840_v42 = vld [vmem:[%s15280_s7 + $0x34c] sm:$0xf] }
 0x201   :  { %v8870_v4 = vor.u32 %v10053_v55, %v8869_v54  ;;  %v2390_v30 = vadd.f32 %v12295_v11, %v2377_v57  ;;  %v8617_v11 = vld [vmem:[%s15280_s7 + $0x7e0] sm:$0xf]  ;;  %v9850_v27 = vld [vmem:[%s15280_s7 + $0x398] sm:$0xf0]  ;;  %v9969_v57 = vld [vmem:[%s15280_s7 + $0x750] sm:$0xf0] }
 0x202   :  { %5520 = vmatpush.bf16.msra.mxu2 %v7722_v28  ;;  %2634 = vmatpush.bf16.msra.mxu0 %v7126_v46  ;;  %v9878_v28 = vld [vmem:[%s15280_s7 + $0x478] sm:$0xf0]  ;;  %v2428_v41 = vpop.f32.mrf.mxu0  ;;  %v8702_v46 = vor.u32 %v10011_v32, %v8701_v33  ;;  %v8589_v33 = vld [vmem:[%s15280_s7 + $0x7a8] sm:$0xf]  ;;  %v9983_v32 = vld [vmem:[%s15280_s7 + $0x7c0] sm:$0xf0] }
 0x203   :  { %v2429_v49 = vadd.f32 %v2428_v41, %v2416_v40  ;;  %v10123_v40 = vld [vmem:[%s15280_s7 + $0xc20] sm:$0xf0]  ;;  %vm2655_vm9 = vcmp.ge.f32.partialorder %v2390_v30, 0.0  ;;  %v8590_v58 = vor.u32 %v9983_v32, %v8589_v33  ;;  %v7975_v33 = vld [vmem:[%s15280_s7 + $0x2f4] sm:$0xf0] }
 0x204   :  { %5535 = vmatpush.bf16.msra.mxu3 %v7890_v44  ;;  %5557 = vmatpush.bf16.msrb.mxu1 %v8450_v45  ;;  %v8170_v45 = vor.u32 %v9878_v28, %v8169_v24  ;;  %v2443_v43 = vpop.f32.mrf.mxu1  ;;  %v8618_v24 = vor.u32 %v9990_v17, %v8617_v11 }
 0x205   :  { %2635 = vmatmul.bf16.vlgmr.msra.gmra.mxu0 %v11250_v22  ;;  %v7609_v22 = vld [vmem:[%s15280_s7] sm:$0xf] }
 0x206   :  { %5521 = vmatpush.bf16.msra.mxu2 %v7694_v47  ;;  %5543 = vmatpush.bf16.msrb.mxu0 %v8254_v15  ;;  %v7610_v44 = vor.u32 %v9738_v29, %v7609_v22  ;;  %v8337_v47 = vld [vmem:[%s15280_s7 + $0x5b0] sm:$0xf] }
 0x207   :  { %v8673_v15 = vld [vmem:[%s15280_s7 + $0x850] sm:$0xf]  ;;  %v8338_v56 = vor.u32 %v9920_v48, %v8337_v47  ;;  %v8786_v47 = vor.u32 %v10032_v38, %v8785_v37  ;;  %v8757_v48 = vld [vmem:[%s15280_s7 + $0x8f8] sm:$0xf]  ;;  %v9770_v37 = vld [vmem:[%s15280_s7 + $0x11c] sm:$0xf] }
 0x208   :  { %5536 = vmatpush.bf16.msra.mxu3 %v7862_v59  ;;  %5558 = vmatpush.bf16.msrb.mxu1 %v8422_v61  ;;  %v8142_v59 = vor.u32 %v9871_v5, %v8141_v26  ;;  %v8674_v60 = vor.u32 %v10004_v50, %v8673_v15  ;;  %v9913_v61 = vld [vmem:[%s15280_s7 + $0x590] sm:$0xf0]  ;;  %v9121_v15 = vld [vmem:[%s15280_s7 + $0xbd0] sm:$0xf]  ;;  %v10116_v50 = vld [vmem:[%s15280_s7 + $0xbe8] sm:$0xf0] }
 0x209   :  { %v8310_v51 = vor.u32 %v9913_v61, %v8309_v34  ;;  %v10025_v5 = vld [vmem:[%s15280_s7 + $0x910] sm:$0xf0]  ;;  %v10018_v34 = vld [vmem:[%s15280_s7 + $0x8d8] sm:$0xf0]  ;;  %v9093_v61 = vld [vmem:[%s15280_s7 + $0xb98] sm:$0xf] }
 0x20a   :  { %5522 = vmatpush.bf16.msra.mxu2 %v7666_v0  ;;  %5544 = vmatpush.bf16.msrb.mxu0 %v8226_v3  ;;  %v2442_v0 = vadd.f32 %v12493_v8, %v2429_v49  ;;  %v8841_v3 = vld [vmem:[%s15280_s7 + $0x9a0] sm:$0xf]  ;;  %v2430_v7 = vpop.f32.mrf.mxu0  ;;  %v7751_v38 = vld [vmem:[%s15280_s7 + $0x134] sm:$0xf0] }
 0x20b   :  { %v8281_v8 = vld [vmem:[%s15280_s7 + $0x540] sm:$0xf] }
 0x20c   :  { %5537 = vmatpush.bf16.msra.mxu3 %v7834_v14  ;;  %5559 = vmatpush.bf16.msrb.mxu1 %v8394_v18  ;;  %v9857_v14 = vld [vmem:[%s15280_s7 + $0x3d0] sm:$0xf0]  ;;  %v2664_v16 = vmul.f32 0.2, %v2442_v0  ;;  %v8842_v18 = vor.u32 %v10046_v6, %v8841_v3  ;;  %vm2656_vm8 = vcmp.ge.f32.partialorder %v2442_v0, 0.0  ;;  %v8282_v21 = vor.u32 %v9906_v12, %v8281_v8 }
 0x20d   :  { %v8086_v29 = vor.u32 %v9857_v14, %v8085_v13  ;;  %v8505_v3 = vld [vmem:[%s15280_s7 + $0x700] sm:$0xf]  ;;  %v9962_v6 = vld [vmem:[%s15280_s7 + $0x718] sm:$0xf0]  ;;  %v9094_v8 = vor.u32 %v10109_v63, %v9093_v61  ;;  %v9833_v14 = vld [vmem:[%s15280_s7 + $0x314] sm:$0xf] }
 0x20e   :  { %5523 = vmatpush.bf16.msra.mxu2 %v7638_v19  ;;  %5545 = vmatpush.bf16.msrb.mxu0 %v8198_v23  ;;  %v8813_v19 = vld [vmem:[%s15280_s7 + $0x968] sm:$0xf]  ;;  %v2663_v23 = vmul.f32 0.2, %v2390_v30  ;;  %v2672_v28 = vsel %vm2656_vm8, %v2442_v0, %v2664_v16  ;;  %v9065_v12 = vld [vmem:[%s15280_s7 + $0xb60] sm:$0xf]  ;;  %v8506_v17 = vor.u32 %v9962_v6, %v8505_v3 }
 0x20f   :  { %5538 = vmatmul.bf16.vlgmr.msra.gmra.mxu3 %v12533_v35  ;;  %v8814_v36 = vor.u32 %v10039_v20, %v8813_v19  ;;  %v12652_v41 = vpack.c.bf16 %v2672_v28, %v2672_v28  ;;  %v10102_v13 = vld [vmem:[%s15280_s7 + $0xb78] sm:$0xf0]  ;;  %v8003_v16 = vld [vmem:[%s15280_s7 + $0x32c] sm:$0xf0]  ;;  %v9777_v20 = vld [vmem:[%s15280_s7 + $0x154] sm:$0xf] }
 0x210   :  { %5582 = vmatpush.bf16.msrb.mxu3 %v8926_v25  ;;  %5560 = vmatpush.bf16.msrb.mxu1 %v8366_v39  ;;  %v8057_v25 = vld [vmem:[%s15280_s7 + $0x380] sm:$0xf]  ;;  %v9149_v39 = vld [vmem:[%s15280_s7 + $0xc08] sm:$0xf]  ;;  %v2671_v49 = vsel %vm2655_vm9, %v2390_v30, %v2663_v23  ;;  %v9826_v28 = vld [vmem:[%s15280_s7 + $0x2dc] sm:$0xf] }
 0x211   :  { %v9150_v26 = vor.u32 %v10123_v40, %v9149_v39  ;;  %v12674_v55 = vpack.c.bf16 %v2671_v49, %v2671_v49  ;;  %v9009_v40 = vld [vmem:[%s15280_s7 + $0xaf0] sm:$0xf]  ;;  %v10172_v63 = vld [vmem:[%s15280_s7 + $0xda8] sm:$0xf0] }
 0x212   :  { %5524 = vmatpush.bf16.msra.mxu2 %v7610_v44  ;;  %5546 = vmatpush.bf16.msrb.mxu0 %v8170_v45  ;;  %v12626_v22 = vpop.f32.mrf.mxu3  ;;  %v8058_v44 = vor.u32 %v9850_v27, %v8057_v25  ;;  %v8561_v45 = vld [vmem:[%s15280_s7 + $0x770] sm:$0xf]  ;;  %v10095_v25 = vld [vmem:[%s15280_s7 + $0xb40] sm:$0xf0] }
 0x213   :  { %v9345_v61 = vld [vmem:[%s15280_s7 + $0xd90] sm:$0xf] }
 0x214   :  { %5583 = vmatpush.bf16.msrb.mxu3 %v8898_v52  ;;  %5561 = vmatpush.bf16.msrb.mxu1 %v8338_v56  ;;  %v945_v52 = vperm.slane %v12002_v31, 4  ;;  %v8533_v56 = vld [vmem:[%s15280_s7 + $0x738] sm:$0xf]  ;;  %v9122_v31 = vor.u32 %v10116_v50, %v9121_v15  ;;  %v9373_v50 = vld [vmem:[%s15280_s7 + $0xdc8] sm:$0xf]  ;;  %v9346_v3 = vor.u32 %v10172_v63, %v9345_v61 }
 0x215   :  { %5525 = vmatmul.bf16.vlgmr.msra.gmra.mxu2 %v12572_v62  ;;  %v9233_v63 = vld [vmem:[%s15280_s7 + $0xcb0] sm:$0xf] }
 0x216   :  { %5569 = vmatpush.bf16.msrb.mxu2 %v8702_v46  ;;  %5547 = vmatpush.bf16.msrb.mxu0 %v8142_v59  ;;  %v9976_v46 = vld [vmem:[%s15280_s7 + $0x788] sm:$0xf0]  ;;  %v8758_v59 = vor.u32 %v10025_v5, %v8757_v48  ;;  %v9763_v5 = vld [vmem:[%s15280_s7 + $0xe4] sm:$0xf] }
 0x217   :  { %v8562_v54 = vor.u32 %v9976_v46, %v8561_v45  ;;  %v10088_v45 = vld [vmem:[%s15280_s7 + $0xb08] sm:$0xf0]  ;;  %v9819_v46 = vld [vmem:[%s15280_s7 + $0x2a4] sm:$0xf] }
 0x218   :  { %5584 = vmatpush.bf16.msrb.mxu3 %v8870_v4  ;;  %5562 = vmatpush.bf16.msrb.mxu1 %v8310_v51  ;;  %v2454_v43 = vpop.f32.mrf.mxu2  ;;  %v8534_v4 = vor.u32 %v9969_v57, %v8533_v56  ;;  %v9784_v51 = vld [vmem:[%s15280_s7 + $0x18c] sm:$0xf]  ;;  %v9010_v15 = vor.u32 %v10088_v45, %v9009_v40  ;;  %v8981_v56 = vld [vmem:[%s15280_s7 + $0xab8] sm:$0xf]  ;;  %v10081_v57 = vld [vmem:[%s15280_s7 + $0xad0] sm:$0xf0] }
 0x219   :  { %v2455_v2 = vadd.f32 %v2454_v43, %v945_v52  ;;  %v7754_v43 = vor.u32 %v9770_v37, %v7751_v38  ;;  %v10179_v52 = vld [vmem:[%s15280_s7 + $0xde0] sm:$0xf0]  ;;  %v9882_v45 = vld [vmem:[%s15280_s7 + $0x49c] sm:$0xf] }
 0x21a   :  { %5570 = vmatpush.bf16.msrb.mxu2 %v8674_v60  ;;  %5548 = vmatpush.bf16.msrb.mxu0 %v8114_v9  ;;  %v2469_v53 = vpop.f32.mrf.mxu3  ;;  %v8729_v60 = vld [vmem:[%s15280_s7 + $0x8c0] sm:$0xf]  ;;  %v7807_v9 = vld [vmem:[%s15280_s7 + $0x1a4] sm:$0xf0]  ;;  %v9791_v40 = vld [vmem:[%s15280_s7 + $0x1c4] sm:$0xf] }
 0x21b   :  { %v8730_v7 = vor.u32 %v10018_v34, %v8729_v60  ;;  %v2468_v11 = vadd.f32 %v12626_v22, %v2455_v2  ;;  %v7810_v19 = vor.u32 %v9784_v51, %v7807_v9  ;;  %v9037_v22 = vld [vmem:[%s15280_s7 + $0xb28] sm:$0xf]  ;;  %v7723_v53 = vld [vmem:[%s15280_s7 + $0xfc] sm:$0xf0]  ;;  %v9812_v60 = vld [vmem:[%s15280_s7 + $0x26c] sm:$0xf] }
 0x21c   :  { %5585 = vmatpush.bf16.msrb.mxu3 %v8842_v18  ;;  %5563 = vmatpush.bf16.msrb.mxu1 %v8282_v21  ;;  %v2493_v0 = vpop.f32.mrf.mxu1  ;;  %v9066_v21 = vor.u32 %v10102_v13, %v9065_v12  ;;  %v9038_v39 = vor.u32 %v10095_v25, %v9037_v22  ;;  %v9756_v34 = vld [vmem:[%s15280_s7 + $0xac] sm:$0xf]  ;;  %v7891_v2 = vld [vmem:[%s15280_s7 + $0x24c] sm:$0xf0]  ;;  %v10165_v12 = vld [vmem:[%s15280_s7 + $0xd70] sm:$0xf0] }
 0x21d   :  { %v9896_v9 = vld [vmem:[%s15280_s7 + $0x50c] sm:$0xf]  ;;  %v9289_v22 = vld [vmem:[%s15280_s7 + $0xd20] sm:$0xf]  ;;  %v10158_v25 = vld [vmem:[%s15280_s7 + $0xd38] sm:$0xf0] }
 0x21e   :  { %5571 = vmatpush.bf16.msrb.mxu2 %v8646_v10  ;;  %5549 = vmatpush.bf16.msrb.mxu0 %v8086_v29  ;;  %v8034_v10 = vor.u32 %v9840_v42, %v8031_v1  ;;  %v7779_v29 = vld [vmem:[%s15280_s7 + $0x16c] sm:$0xf0]  ;;  %v7695_v42 = vld [vmem:[%s15280_s7 + $0xc4] sm:$0xf0]  ;;  %v9805_v1 = vld [vmem:[%s15280_s7 + $0x234] sm:$0xf]  ;;  %v9290_v37 = vor.u32 %v10158_v25, %v9289_v22 }
 0x21f   :  { %5564 = vmatmul.bf16.vlgmr.msrb.gmra.mxu1 %v12652_v41  ;;  %v10130_v22 = vld [vmem:[%s15280_s7 + $0xc58] sm:$0xf0] }
 0x220   :  { %5586 = vmatpush.bf16.msrb.mxu3 %v8814_v36  ;;  %v2456_v30 = vpop.f32.mrf.mxu2  ;;  %v7782_v36 = vor.u32 %v9777_v20, %v7779_v29  ;;  %v8227_v29 = vld [vmem:[%s15280_s7 + $0x4ec] sm:$0xf0] }
 0x221   :  { %v9317_v30 = vld [vmem:[%s15280_s7 + $0xd58] sm:$0xf] }
 0x222   :  { %5572 = vmatpush.bf16.msrb.mxu2 %v8618_v24  ;;  %5550 = vmatpush.bf16.msrb.mxu0 %v8058_v44  ;;  %v2480_v18 = vpop.f32.mrf.mxu0  ;;  %v8006_v24 = vor.u32 %v9833_v14, %v8003_v16  ;;  %v9318_v13 = vor.u32 %v10165_v12, %v9317_v30  ;;  %v7698_v14 = vor.u32 %v9756_v34, %v7695_v42  ;;  %v10137_v12 = vld [vmem:[%s15280_s7 + $0xc90] sm:$0xf0] }
 0x223   :  { %v2481_v23 = vadd.f32 %v2480_v18, %v2468_v11  ;;  %v9749_v11 = vld [vmem:[%s15280_s7 + $0x74] sm:$0xf]  ;;  %v7894_v18 = vor.u32 %v9805_v1, %v7891_v2  ;;  %v8675_v2 = vld [vmem:[%s15280_s7 + $0x86c] sm:$0xf0] }
 0x224   :  { %5587 = vmatpush.bf16.msrb.mxu3 %v8786_v47  ;;  %v2495_v27 = vpop.f32.mrf.mxu1  ;;  %v7947_v47 = vld [vmem:[%s15280_s7 + $0x2bc] sm:$0xf0]  ;;  %v10001_v1 = vld [vmem:[%s15280_s7 + $0x854] sm:$0xf] }
 0x225   :  { %5551 = vmatmul.bf16.vlgmr.msrb.gmra.mxu0 %v12674_v55  ;;  %v2494_v32 = vadd.f32 %v2493_v0, %v2481_v23  ;;  %v7726_v0 = vor.u32 %v9763_v5, %v7723_v53  ;;  %v9889_v23 = vld [vmem:[%s15280_s7 + $0x4d4] sm:$0xf]  ;;  %v12854_v27 = vld [vmem:[%s15279_s6] sm:$0xff]  ;;  %v10008_v53 = vld [vmem:[%s15280_s7 + $0x88c] sm:$0xf] }
 0x226   :  { %5573 = vmatpush.bf16.msrb.mxu2 %v8590_v58  ;;  %5595 = vmatpush.bf16.msra.mxu0 %v9150_v26  ;;  %v7978_v58 = vor.u32 %v9826_v28, %v7975_v33  ;;  %v946_v28 = vperm.slane %v12854_v27, 5 }
 0x227   :  { %vm2657_vm10 = vcmp.ge.f32.partialorder %v2494_v32, 0.0  ;;  %v2665_v44 = vmul.f32 0.2, %v2494_v32 }
 0x228   :  { %5588 = vmatpush.bf16.msrb.mxu3 %v8758_v59  ;;  %v9374_v59 = vor.u32 %v10179_v52, %v9373_v50  ;;  %v7611_v52 = vld [vmem:[%s15280_s7 + $0x1c] sm:$0xf0] }
 0x229   :  { %v2673_v48 = vsel %vm2657_vm10, %v2494_v32, %v2665_v44  ;;  %v9742_v32 = vld [vmem:[%s15280_s7 + $0x3c] sm:$0xf]  ;;  %v7835_v44 = vld [vmem:[%s15280_s7 + $0x1dc] sm:$0xf0] }
 0x22a   :  { %5574 = vmatpush.bf16.msrb.mxu2 %v8562_v54  ;;  %5596 = vmatpush.bf16.msra.mxu0 %v9122_v31  ;;  %v12762_v26 = vpack.c.bf16 %v2673_v48, %v2673_v48  ;;  %v2482_v49 = vpop.f32.mrf.mxu0  ;;  %v7950_v54 = vor.u32 %v9819_v46, %v7947_v47  ;;  %v7919_v31 = vld [vmem:[%s15280_s7 + $0x284] sm:$0xf0]  ;;  %v8199_v46 = vld [vmem:[%s15280_s7 + $0x4b4] sm:$0xf0]  ;;  %v10151_v48 = vld [vmem:[%s15280_s7 + $0xd00] sm:$0xf0] }
 0x22b   :  { %5608 = vmatpush.bf16.msra.mxu1 %v9374_v59  ;;  %v7922_v51 = vor.u32 %v9812_v60, %v7919_v31  ;;  %v9261_v47 = vld [vmem:[%s15280_s7 + $0xce8] sm:$0xf]  ;;  %v9875_v59 = vld [vmem:[%s15280_s7 + $0x464] sm:$0xf]  ;;  %v8171_v60 = vld [vmem:[%s15280_s7 + $0x47c] sm:$0xf0] }
 0x22c   :  { %5589 = vmatpush.bf16.msrb.mxu3 %v8730_v7  ;;  %v8953_v7 = vld [vmem:[%s15280_s7 + $0xa80] sm:$0xf]  ;;  %v9262_v49 = vor.u32 %v10151_v48, %v9261_v47  ;;  %v8087_v47 = vld [vmem:[%s15280_s7 + $0x3d4] sm:$0xf0] }
 0x22e   :  { %5575 = vmatpush.bf16.msrb.mxu2 %v8534_v4  ;;  %5597 = vmatpush.bf16.msra.mxu0 %v9094_v8  ;;  %v8982_v4 = vor.u32 %v10081_v57, %v8981_v56  ;;  %v10074_v8 = vld [vmem:[%s15280_s7 + $0xa98] sm:$0xf0]  ;;  %v7838_v56 = vor.u32 %v9791_v40, %v7835_v44  ;;  %v8202_v57 = vor.u32 %v9882_v45, %v8199_v46  ;;  %v8899_v40 = vld [vmem:[%s15280_s7 + $0xa2c] sm:$0xf0]  ;;  %v8479_v45 = vld [vmem:[%s15280_s7 + $0x6e4] sm:$0xf0] }
 0x22f   :  { %5609 = vmatpush.bf16.msra.mxu1 %v9346_v3  ;;  %v8954_v16 = vor.u32 %v10074_v8, %v8953_v7  ;;  %v9868_v7 = vld [vmem:[%s15280_s7 + $0x42c] sm:$0xf]  ;;  %v9854_v46 = vld [vmem:[%s15280_s7 + $0x3bc] sm:$0xf] }
 0x230   :  { %5634 = vmatpush.bf16.msra.mxu3 %v8034_v10  ;;  %v8255_v10 = vld [vmem:[%s15280_s7 + $0x524] sm:$0xf0] }
 0x231   :  { %v8258_v20 = vor.u32 %v9896_v9, %v8255_v10  ;;  %v8678_v9 = vor.u32 %v10001_v1, %v8675_v2  ;;  %v9205_v10 = vld [vmem:[%s15280_s7 + $0xc78] sm:$0xf]  ;;  %v8563_v1 = vld [vmem:[%s15280_s7 + $0x78c] sm:$0xf0]  ;;  %v10043_v2 = vld [vmem:[%s15280_s7 + $0x9a4] sm:$0xf] }
 0x232   :  { %5576 = vmatpush.bf16.msrb.mxu2 %v8506_v17  ;;  %5598 = vmatpush.bf16.msra.mxu0 %v9066_v21  ;;  %v12807_v6 = vpop.f32.mrf.mxu3  ;;  %v7667_v17 = vld [vmem:[%s15280_s7 + $0x8c] sm:$0xf0]  ;;  %v7863_v21 = vld [vmem:[%s15280_s7 + $0x214] sm:$0xf0] }
 0x233   :  { %5610 = vmatpush.bf16.msra.mxu1 %v9318_v13  ;;  %v7670_v33 = vor.u32 %v9749_v11, %v7667_v17  ;;  %v9206_v17 = vor.u32 %v10137_v12, %v9205_v10  ;;  %v8395_v10 = vld [vmem:[%s15280_s7 + $0x63c] sm:$0xf0]  ;;  %v8535_v12 = vld [vmem:[%s15280_s7 + $0x754] sm:$0xf0] }
 0x234   :  { %5635 = vmatpush.bf16.msra.mxu3 %v8006_v24 }
 0x235   :  { %5577 = vmatmul.bf16.vlgmr.msrb.gmra.mxu2 %v12762_v26 }
 0x236   :  { %5621 = vmatpush.bf16.msra.mxu2 %v7810_v19  ;;  %5599 = vmatpush.bf16.msra.mxu0 %v9038_v39  ;;  %v9798_v19 = vld [vmem:[%s15280_s7 + $0x1fc] sm:$0xf] }
 0x237   :  { %v7866_v39 = vor.u32 %v9798_v19, %v7863_v21  ;;  %5611 = vmatpush.bf16.msra.mxu1 %v9290_v37  ;;  %v8927_v19 = vld [vmem:[%s15280_s7 + $0xa64] sm:$0xf0] }
 0x238   :  { %5636 = vmatpush.bf16.msra.mxu3 %v7978_v58  ;;  %v2506_v24 = vpop.f32.mrf.mxu2  ;;  %v8230_v58 = vor.u32 %v9889_v23, %v8227_v29  ;;  %v8115_v23 = vld [vmem:[%s15280_s7 + $0x40c] sm:$0xf0] }
 0x239   :  { %v2507_v50 = vadd.f32 %v2506_v24, %v946_v28  ;;  %v9177_v24 = vld [vmem:[%s15280_s7 + $0xc40] sm:$0xf] }
 0x23a   :  { %5622 = vmatpush.bf16.msra.mxu2 %v7782_v36  ;;  %5600 = vmatpush.bf16.msra.mxu0 %v9010_v15  ;;  %v7639_v36 = vld [vmem:[%s15280_s7 + $0x54] sm:$0xf0]  ;;  %v2521_v38 = vpop.f32.mrf.mxu3  ;;  %v9735_v15 = vld [vmem:[%s15280_s7 + $0x4] sm:$0xf]  ;;  %v9178_v37 = vor.u32 %v10130_v22, %v9177_v24  ;;  %v8507_v24 = vld [vmem:[%s15280_s7 + $0x71c] sm:$0xf0] }
 0x23b   :  { %v7642_v5 = vor.u32 %v9742_v32, %v7639_v36  ;;  %5612 = vmatpush.bf16.msra.mxu1 %v9262_v49  ;;  %v7614_v34 = vor.u32 %v9735_v15, %v7611_v52  ;;  %v2520_v42 = vadd.f32 %v12807_v6, %v2507_v50  ;;  %v8143_v6 = vld [vmem:[%s15280_s7 + $0x444] sm:$0xf0]  ;;  %v8619_v32 = vld [vmem:[%s15280_s7 + $0x7fc] sm:$0xf0]  ;;  %v10057_v36 = vld [vmem:[%s15280_s7 + $0xa14] sm:$0xf] }
 0x23c   :  { %5637 = vmatpush.bf16.msra.mxu3 %v7950_v54  ;;  %v8703_v54 = vld [vmem:[%s15280_s7 + $0x8a4] sm:$0xf0]  ;;  %v8146_v11 = vor.u32 %v9868_v7, %v8143_v6  ;;  %v9945_v15 = vld [vmem:[%s15280_s7 + $0x694] sm:$0xf]  ;;  %v8451_v50 = vld [vmem:[%s15280_s7 + $0x6ac] sm:$0xf0] }
 0x23d   :  { %v8706_v61 = vor.u32 %v10008_v53, %v8703_v54  ;;  %v8591_v52 = vld [vmem:[%s15280_s7 + $0x7c4] sm:$0xf0]  ;;  %v10050_v53 = vld [vmem:[%s15280_s7 + $0x9dc] sm:$0xf]  ;;  %v8871_v54 = vld [vmem:[%s15280_s7 + $0x9f4] sm:$0xf0] }
 0x23e   :  { %5623 = vmatpush.bf16.msra.mxu2 %v7754_v43  ;;  %5601 = vmatpush.bf16.msra.mxu0 %v8982_v4  ;;  %v2545_v43 = vpop.f32.mrf.mxu1  ;;  %v8174_v4 = vor.u32 %v9875_v59, %v8171_v60  ;;  %v9847_v60 = vld [vmem:[%s15280_s7 + $0x384] sm:$0xf]  ;;  %v10029_v22 = vld [vmem:[%s15280_s7 + $0x934] sm:$0xf] }
 0x240   :  { %5638 = vmatpush.bf16.msra.mxu3 %v7922_v51  ;;  %v2508_v31 = vpop.f32.mrf.mxu2 }
 0x241   :  { %v8059_v31 = vld [vmem:[%s15280_s7 + $0x39c] sm:$0xf0] }
 0x242   :  { %5624 = vmatpush.bf16.msra.mxu2 %v7726_v0  ;;  %5602 = vmatpush.bf16.msra.mxu0 %v8954_v16  ;;  %v10144_v0 = vld [vmem:[%s15280_s7 + $0xcc8] sm:$0xf0]  ;;  %v2532_v51 = vpop.f32.mrf.mxu0  ;;  %v8647_v16 = vld [vmem:[%s15280_s7 + $0x834] sm:$0xf0] }
 0x243   :  { %v9234_v3 = vor.u32 %v10144_v0, %v9233_v63  ;;  %v2533_v8 = vadd.f32 %v2532_v51, %v2520_v42  ;;  %v8874_v0 = vor.u32 %v10050_v53, %v8871_v54  ;;  %v9973_v42 = vld [vmem:[%s15280_s7 + $0x774] sm:$0xf]  ;;  %v9910_v53 = vld [vmem:[%s15280_s7 + $0x57c] sm:$0xf]  ;;  %v8311_v54 = vld [vmem:[%s15280_s7 + $0x594] sm:$0xf0] }
 0x244   :  { %5639 = vmatpush.bf16.msra.mxu3 %v7894_v18  ;;  %v10064_v18 = vld [vmem:[%s15280_s7 + $0xa4c] sm:$0xf]  ;;  %v8566_v6 = vor.u32 %v9973_v42, %v8563_v1  ;;  %v9151_v42 = vld [vmem:[%s15280_s7 + $0xc24] sm:$0xf0]  ;;  %v8037_v1 = vld [vmem:[%s15280_s7 + $0x350] sm:$0xf] }
 0x245   :  { %5613 = vmatpush.bf16.msra.mxu1 %v9234_v3  ;;  %v2546_v13 = vadd.f32 %v2545_v43, %v2533_v8  ;;  %v8930_v28 = vor.u32 %v10064_v18, %v8927_v19  ;;  %v8902_v43 = vor.u32 %v10057_v36, %v8899_v40  ;;  %v8062_v3 = vor.u32 %v9847_v60, %v8059_v31  ;;  %v9788_v36 = vld [vmem:[%s15280_s7 + $0x1a8] sm:$0xf0]  ;;  %v8731_v60 = vld [vmem:[%s15280_s7 + $0x8dc] sm:$0xf0] }
 0x246   :  { %5625 = vmatpush.bf16.msra.mxu2 %v7698_v14  ;;  %5647 = vmatpush.bf16.msrb.mxu0 %v8258_v20  ;;  %v2547_v30 = vpop.f32.mrf.mxu1  ;;  %v9994_v14 = vld [vmem:[%s15280_s7 + $0x81c] sm:$0xf]  ;;  %v9861_v20 = vld [vmem:[%s15280_s7 + $0x3f4] sm:$0xf]  ;;  %v8314_v31 = vor.u32 %v9910_v53, %v8311_v54  ;;  %v9039_v53 = vld [vmem:[%s15280_s7 + $0xb44] sm:$0xf0] }
 0x247   :  { %vm2658_vm11 = vcmp.ge.f32.partialorder %v2546_v13, 0.0  ;;  %v2666_v21 = vmul.f32 0.2, %v2546_v13  ;;  %v8650_v29 = vor.u32 %v9994_v14, %v8647_v16  ;;  %v8118_v44 = vor.u32 %v9861_v20, %v8115_v23  ;;  %v9966_v30 = vld [vmem:[%s15280_s7 + $0x73c] sm:$0xf] }
 0x248   :  { %5640 = vmatpush.bf16.msra.mxu3 %v7866_v39  ;;  %v8815_v14 = vld [vmem:[%s15280_s7 + $0x984] sm:$0xf0]  ;;  %v8538_v18 = vor.u32 %v9966_v30, %v8535_v12  ;;  %v9959_v20 = vld [vmem:[%s15280_s7 + $0x704] sm:$0xf]  ;;  %v7925_v54 = vld [vmem:[%s15280_s7 + $0x270] sm:$0xf] }
 0x249   :  { %5614 = vmatpush.bf16.msra.mxu1 %v9206_v17  ;;  %v2674_v25 = vsel %vm2658_vm11, %v2546_v13, %v2666_v21  ;;  %v10036_v13 = vld [vmem:[%s15280_s7 + $0x96c] sm:$0xf]  ;;  %v8367_v23 = vld [vmem:[%s15280_s7 + $0x604] sm:$0xf0] }
 0x24a   :  { %5626 = vmatpush.bf16.msra.mxu2 %v7670_v33  ;;  %5648 = vmatpush.bf16.msrb.mxu0 %v8230_v58  ;;  %v9987_v33 = vld [vmem:[%s15280_s7 + $0x7e4] sm:$0xf]  ;;  %v12958_v38 = vpack.c.bf16 %v2674_v25, %v2674_v25  ;;  %v2534_v39 = vpop.f32.mrf.mxu0  ;;  %v9952_v58 = vld [vmem:[%s15280_s7 + $0x6cc] sm:$0xf]  ;;  %v8818_v19 = vor.u32 %v10036_v13, %v8815_v14  ;;  %v8787_v25 = vld [vmem:[%s15280_s7 + $0x94c] sm:$0xf0] }
 0x24b   :  { %v8482_v48 = vor.u32 %v9952_v58, %v8479_v45  ;;  %v8622_v49 = vor.u32 %v9987_v33, %v8619_v32  ;;  %v9924_v21 = vld [vmem:[%s15280_s7 + $0x5ec] sm:$0xf]  ;;  %v7813_v32 = vld [vmem:[%s15280_s7 + $0x190] sm:$0xf]  ;;  %v8510_v39 = vor.u32 %v9959_v20, %v8507_v24  ;;  %v8790_v40 = vor.u32 %v10029_v22, %v8787_v25  ;;  %v7729_v12 = vld [vmem:[%s15280_s7 + $0xe8] sm:$0xf] }
 0x24c   :  { %5641 = vmatpush.bf16.msra.mxu3 %v7838_v56  ;;  %v8090_v56 = vor.u32 %v9854_v46, %v8087_v47  ;;  %v8339_v58 = vld [vmem:[%s15280_s7 + $0x5cc] sm:$0xf0]  ;;  %v7814_v45 = vor.u32 %v9788_v36, %v7813_v32  ;;  %v10022_v46 = vld [vmem:[%s15280_s7 + $0x8fc] sm:$0xf]  ;;  %v8759_v47 = vld [vmem:[%s15280_s7 + $0x914] sm:$0xf0] }
 0x24d   :  { %5615 = vmatpush.bf16.msra.mxu1 %v9178_v37  ;;  %5590 = vmatmul.bf16.vlgmr.msrb.gmra.mxu3 %v12958_v38  ;;  %v9767_v13 = vld [vmem:[%s15280_s7 + $0x100] sm:$0xf0]  ;;  %v7701_v24 = vld [vmem:[%s15280_s7 + $0xb0] sm:$0xf]  ;;  %v9760_v22 = vld [vmem:[%s15280_s7 + $0xc8] sm:$0xf0] }
 0x24e   :  { %5627 = vmatpush.bf16.msra.mxu2 %v7642_v5  ;;  %5649 = vmatpush.bf16.msrb.mxu0 %v8202_v57  ;;  %v9980_v5 = vld [vmem:[%s15280_s7 + $0x7ac] sm:$0xf]  ;;  %v8454_v57 = vor.u32 %v9945_v15, %v8451_v50  ;;  %v7730_v20 = vor.u32 %v9767_v13, %v7729_v12  ;;  %v9095_v25 = vld [vmem:[%s15280_s7 + $0xbb4] sm:$0xf0]  ;;  %v7702_v36 = vor.u32 %v9760_v22, %v7701_v24  ;;  %v7869_v13 = vld [vmem:[%s15280_s7 + $0x200] sm:$0xf] }
 0x24f   :  { %v8594_v63 = vor.u32 %v9980_v5, %v8591_v52  ;;  %v9781_v5 = vld [vmem:[%s15280_s7 + $0x170] sm:$0xf0]  ;;  %v8762_v52 = vor.u32 %v10022_v46, %v8759_v47  ;;  %v7953_v46 = vld [vmem:[%s15280_s7 + $0x2a8] sm:$0xf]  ;;  %v9823_v47 = vld [vmem:[%s15280_s7 + $0x2c0] sm:$0xf0] }
 0x250   :  { %5686 = vmatpush.bf16.msrb.mxu3 %v8930_v28  ;;  %v8370_v28 = vor.u32 %v9924_v21, %v8367_v23  ;;  %v8983_v12 = vld [vmem:[%s15280_s7 + $0xad4] sm:$0xf0]  ;;  %v8955_v24 = vld [vmem:[%s15280_s7 + $0xa9c] sm:$0xf0] }
 0x251   :  { %5660 = vmatpush.bf16.msrb.mxu1 %v8482_v48 }
 0x252   :  { %5628 = vmatpush.bf16.msra.mxu2 %v7614_v34  ;;  %5650 = vmatpush.bf16.msrb.mxu0 %v8174_v4  ;;  %v2571_v59 = vpop.f32.mrf.mxu3  ;;  %v9938_v34 = vld [vmem:[%s15280_s7 + $0x65c] sm:$0xf]  ;;  %v8843_v4 = vld [vmem:[%s15280_s7 + $0x9bc] sm:$0xf0] }
 0x253   :  { %v8846_v8 = vor.u32 %v10043_v2, %v8843_v4  ;;  %v9844_v2 = vld [vmem:[%s15280_s7 + $0x368] sm:$0xf0] }
 0x254   :  { %5687 = vmatpush.bf16.msrb.mxu3 %v8902_v43  ;;  %v7785_v43 = vld [vmem:[%s15280_s7 + $0x158] sm:$0xf] }
 0x255   :  { %5629 = vmatmul.bf16.vlgmr.msra.gmra.mxu2 %v12572_v62  ;;  %5661 = vmatpush.bf16.msrb.mxu1 %v8454_v57  ;;  %v7786_v57 = vor.u32 %v9781_v5, %v7785_v43  ;;  %v7954_v5 = vor.u32 %v9823_v47, %v7953_v46 }
 0x256   :  { %5673 = vmatpush.bf16.msrb.mxu2 %v8706_v61  ;;  %5651 = vmatpush.bf16.msrb.mxu0 %v8146_v11  ;;  %v8423_v61 = vld [vmem:[%s15280_s7 + $0x674] sm:$0xf0]  ;;  %v947_v11 = vperm.slane %v12854_v27, 6 }
 0x257   :  { %v8426_v51 = vor.u32 %v9938_v34, %v8423_v61  ;;  %v10120_v61 = vld [vmem:[%s15280_s7 + $0xc0c] sm:$0xf] }
 0x258   :  { %5688 = vmatpush.bf16.msrb.mxu3 %v8874_v0  ;;  %v2558_v7 = vpop.f32.mrf.mxu2  ;;  %v9774_v0 = vld [vmem:[%s15280_s7 + $0x138] sm:$0xf0]  ;;  %v9154_v30 = vor.u32 %v10120_v61, %v9151_v42  ;;  %v10085_v61 = vld [vmem:[%s15280_s7 + $0xaf4] sm:$0xf]  ;;  %v9011_v42 = vld [vmem:[%s15280_s7 + $0xb0c] sm:$0xf0] }
 0x259   :  { %5662 = vmatpush.bf16.msrb.mxu1 %v8426_v51  ;;  %v2559_v33 = vadd.f32 %v2558_v7, %v947_v11  ;;  %v9903_v51 = vld [vmem:[%s15280_s7 + $0x544] sm:$0xf]  ;;  %v9123_v11 = vld [vmem:[%s15280_s7 + $0xbec] sm:$0xf0] }
 0x25a   :  { %5674 = vmatpush.bf16.msrb.mxu2 %v8678_v9  ;;  %5652 = vmatpush.bf16.msrb.mxu0 %v8118_v44  ;;  %v9931_v9 = vld [vmem:[%s15280_s7 + $0x624] sm:$0xf]  ;;  %v2573_v17 = vpop.f32.mrf.mxu3  ;;  %v9917_v44 = vld [vmem:[%s15280_s7 + $0x5b4] sm:$0xf] }
 0x25b   :  { %v8398_v16 = vor.u32 %v9931_v9, %v8395_v10  ;;  %v8342_v48 = vor.u32 %v9917_v44, %v8339_v58  ;;  %v8038_v9 = vor.u32 %v9844_v2, %v8037_v1  ;;  %v10113_v10 = vld [vmem:[%s15280_s7 + $0xbd4] sm:$0xf]  ;;  %v8009_v17 = vld [vmem:[%s15280_s7 + $0x318] sm:$0xf] }
 0x25c   :  { %5689 = vmatpush.bf16.msrb.mxu3 %v8846_v8  ;;  %v9126_v21 = vor.u32 %v10113_v10, %v9123_v11  ;;  %v7673_v44 = vld [vmem:[%s15280_s7 + $0x78] sm:$0xf]  ;;  %v9753_v58 = vld [vmem:[%s15280_s7 + $0x90] sm:$0xf0] }
 0x25d   :  { %5663 = vmatpush.bf16.msrb.mxu1 %v8398_v16  ;;  %5642 = vmatmul.bf16.vlgmr.msra.gmra.mxu3 %v12533_v35  ;;  %v7897_v1 = vld [vmem:[%s15280_s7 + $0x238] sm:$0xf]  ;;  %v9809_v2 = vld [vmem:[%s15280_s7 + $0x250] sm:$0xf0] }
 0x25e   :  { %5675 = vmatpush.bf16.msrb.mxu2 %v8650_v29  ;;  %5653 = vmatpush.bf16.msrb.mxu0 %v8090_v56  ;;  %v2597_v29 = vpop.f32.mrf.mxu1 }
 0x260   :  { %5690 = vmatpush.bf16.msrb.mxu3 %v8818_v19  ;;  %v2560_v37 = vpop.f32.mrf.mxu2 }
 0x261   :  { %5664 = vmatpush.bf16.msrb.mxu1 %v8370_v28  ;;  %v7981_v28 = vld [vmem:[%s15280_s7 + $0x2e0] sm:$0xf] }
 0x262   :  { %5676 = vmatpush.bf16.msrb.mxu2 %v8622_v49  ;;  %5654 = vmatpush.bf16.msrb.mxu0 %v8062_v3  ;;  %v2572_v49 = vadd.f32 %v2571_v59, %v2559_v33  ;;  %v2584_v15 = vpop.f32.mrf.mxu0  ;;  %v10015_v59 = vld [vmem:[%s15280_s7 + $0x8c4] sm:$0xf]  ;;  %v9830_v33 = vld [vmem:[%s15280_s7 + $0x2f8] sm:$0xf0] }
 0x263   :  { %v8734_v3 = vor.u32 %v10015_v59, %v8731_v60 }
 0x264   :  { %v2585_v50 = vadd.f32 %v2584_v15, %v2572_v49  ;;  %5691 = vmatpush.bf16.msrb.mxu3 %v8790_v40  ;;  %v10099_v40 = vld [vmem:[%s15280_s7 + $0xb64] sm:$0xf]  ;;  %v10092_v15 = vld [vmem:[%s15280_s7 + $0xb2c] sm:$0xf] }
 0x265   :  { %5665 = vmatpush.bf16.msrb.mxu1 %v8342_v48  ;;  %v7674_v48 = vor.u32 %v9753_v58, %v7673_v44  ;;  %v8653_v44 = vld [vmem:[%s15280_s7 + $0x820] sm:$0xf]  ;;  %v9998_v58 = vld [vmem:[%s15280_s7 + $0x838] sm:$0xf0] }
 0x266   :  { %5677 = vmatpush.bf16.msrb.mxu2 %v8594_v63  ;;  %v2599_v56 = vpop.f32.mrf.mxu1  ;;  %v2598_v34 = vadd.f32 %v2597_v29, %v2585_v50  ;;  %v7757_v63 = vld [vmem:[%s15280_s7 + $0x120] sm:$0xf]  ;;  %v10106_v29 = vld [vmem:[%s15280_s7 + $0xb9c] sm:$0xf] }
 0x267   :  { %v7758_v7 = vor.u32 %v9774_v0, %v7757_v63  ;;  %v9098_v37 = vor.u32 %v10106_v29, %v9095_v25  ;;  %v7645_v50 = vld [vmem:[%s15280_s7 + $0x40] sm:$0xf]  ;;  %v9816_v56 = vld [vmem:[%s15280_s7 + $0x288] sm:$0xf0]  ;;  %v7617_v63 = vld [vmem:[%s15280_s7 + $0x8] sm:$0xf] }
 0x268   :  { %vm2659_vm12 = vcmp.ge.f32.partialorder %v2598_v34, 0.0  ;;  %v2667_v4 = vmul.f32 0.2, %v2598_v34  ;;  %5692 = vmatpush.bf16.msrb.mxu3 %v8762_v52  ;;  %v9746_v52 = vld [vmem:[%s15280_s7 + $0x58] sm:$0xf0] }
 0x269   :  { %5666 = vmatpush.bf16.msrb.mxu1 %v8314_v31  ;;  %v7646_v60 = vor.u32 %v9746_v52, %v7645_v50  ;;  %v9042_v31 = vor.u32 %v10092_v15, %v9039_v53  ;;  %v9739_v0 = vld [vmem:[%s15280_s7 + $0x20] sm:$0xf0]  ;;  %v8654_v50 = vor.u32 %v9998_v58, %v8653_v44  ;;  %v10169_v52 = vld [vmem:[%s15280_s7 + $0xd94] sm:$0xf]  ;;  %v8233_v53 = vld [vmem:[%s15280_s7 + $0x4d8] sm:$0xf] }
 0x26a   :  { %5678 = vmatpush.bf16.msrb.mxu2 %v8566_v6  ;;  %v8283_v6 = vld [vmem:[%s15280_s7 + $0x55c] sm:$0xf0]  ;;  %v2675_v8 = vsel %vm2659_vm12, %v2598_v34, %v2667_v4  ;;  %v2586_v16 = vpop.f32.mrf.mxu0  ;;  %v7926_v34 = vor.u32 %v9816_v56, %v7925_v54  ;;  %v10071_v29 = vld [vmem:[%s15280_s7 + $0xa84] sm:$0xf]  ;;  %v9893_v54 = vld [vmem:[%s15280_s7 + $0x4f0] sm:$0xf0] }
 0x26b   :  { %v13126_v14 = vpack.c.bf16 %v2675_v8, %v2675_v8  ;;  %v8286_v19 = vor.u32 %v9903_v51, %v8283_v6  ;;  %v10012_v51 = vld [vmem:[%s15280_s7 + $0x8a8] sm:$0xf0]  ;;  %v9014_v8 = vor.u32 %v10085_v61, %v9011_v42  ;;  %v9802_v16 = vld [vmem:[%s15280_s7 + $0x218] sm:$0xf0]  ;;  %v8958_v47 = vor.u32 %v10071_v29, %v8955_v24  ;;  %v8905_v61 = vld [vmem:[%s15280_s7 + $0xa18] sm:$0xf] }
 0x26c   :  { %5693 = vmatpush.bf16.msrb.mxu3 %v8734_v3  ;;  %v8709_v3 = vld [vmem:[%s15280_s7 + $0x890] sm:$0xf]  ;;  %v9977_v29 = vld [vmem:[%s15280_s7 + $0x790] sm:$0xf0]  ;;  %v8849_v24 = vld [vmem:[%s15280_s7 + $0x9a8] sm:$0xf] }
 0x26d   :  { %5603 = vmatmul.bf16.vlgmr.msra.gmra.mxu0 %v13126_v14  ;;  %5667 = vmatpush.bf16.msrb.mxu1 %v8286_v19  ;;  %v8710_v10 = vor.u32 %v10012_v51, %v8709_v3  ;;  %v3197_v3 = vld [vmem:[%s15281_s8] sm:$0xff]  ;;  %v9263_v58 = vld [vmem:[%s15280_s7 + $0xd04] sm:$0xf0] }
 0x26e   :  { %5679 = vmatpush.bf16.msrb.mxu2 %v8538_v18  ;;  %v9837_v18 = vld [vmem:[%s15280_s7 + $0x330] sm:$0xf0]  ;;  %5699 = vmatpush.bf16.msra.mxu0 %v9154_v30  ;;  %v7898_v30 = vor.u32 %v9809_v2, %v7897_v1  ;;  %v8205_v2 = vld [vmem:[%s15280_s7 + $0x4a0] sm:$0xf] }
 0x26f   :  { %v8010_v23 = vor.u32 %v9837_v18, %v8009_v17  ;;  %5694 = vmatmul.bf16.vlgmr.msrb.gmra.mxu3 %v12958_v38  ;;  %v8681_v17 = vld [vmem:[%s15280_s7 + $0x858] sm:$0xf]  ;;  %v10005_v18 = vld [vmem:[%s15280_s7 + $0x870] sm:$0xf0] }
 0x270   :  { %5738 = vmatpush.bf16.msra.mxu3 %v8038_v9  ;;  %v10078_v9 = vld [vmem:[%s15280_s7 + $0xabc] sm:$0xf]  ;;  %v8682_v25 = vor.u32 %v10005_v18, %v8681_v17  ;;  %v10155_v17 = vld [vmem:[%s15280_s7 + $0xd24] sm:$0xf]  ;;  %v8177_v18 = vld [vmem:[%s15280_s7 + $0x468] sm:$0xf] }
 0x272   :  { %5680 = vmatpush.bf16.msrb.mxu2 %v8510_v39  ;;  %v2623_v32 = vpop.f32.mrf.mxu3  ;;  %5700 = vmatpush.bf16.msra.mxu0 %v9126_v21  ;;  %v7982_v39 = vor.u32 %v9830_v33, %v7981_v28  ;;  %v8986_v21 = vor.u32 %v10078_v9, %v8983_v12  ;;  %v7841_v28 = vld [vmem:[%s15280_s7 + $0x1c8] sm:$0xf]  ;;  %v9795_v33 = vld [vmem:[%s15280_s7 + $0x1e0] sm:$0xf0]  ;;  %v8877_v9 = vld [vmem:[%s15280_s7 + $0x9e0] sm:$0xf] }
 0x274   :  { %5739 = vmatpush.bf16.msra.mxu3 %v8010_v23  ;;  %v7870_v23 = vor.u32 %v9802_v16, %v7869_v13  ;;  %v3199_v13 = vperm.slane %v3197_v3, 0  ;;  %v8093_v3 = vld [vmem:[%s15280_s7 + $0x3c0] sm:$0xf] }
 0x275   :  { %5681 = vmatmul.bf16.vlgmr.msrb.gmra.mxu2 %v12762_v26 }
 0x276   :  { %5725 = vmatpush.bf16.msra.mxu2 %v7814_v45  ;;  %v9067_v45 = vld [vmem:[%s15280_s7 + $0xb7c] sm:$0xf0]  ;;  %5701 = vmatpush.bf16.msra.mxu0 %v9098_v37  ;;  %v9375_v37 = vld [vmem:[%s15280_s7 + $0xde4] sm:$0xf0] }
 0x277   :  { %v9070_v43 = vor.u32 %v10099_v40, %v9067_v45  ;;  %v9900_v40 = vld [vmem:[%s15280_s7 + $0x528] sm:$0xf0]  ;;  %v8933_v45 = vld [vmem:[%s15280_s7 + $0xa50] sm:$0xf] }
 0x278   :  { %5740 = vmatpush.bf16.msra.mxu3 %v7982_v39  ;;  %v2610_v49 = vpop.f32.mrf.mxu2  ;;  %v8261_v39 = vld [vmem:[%s15280_s7 + $0x510] sm:$0xf] }
 0x27a   :  { %5726 = vmatpush.bf16.msra.mxu2 %v7786_v57  ;;  %v948_v57 = vperm.slane %v12854_v27, 7  ;;  %v2625_v59 = vpop.f32.mrf.mxu3  ;;  %5702 = vmatpush.bf16.msra.mxu0 %v9070_v43  ;;  %v8262_v43 = vor.u32 %v9900_v40, %v8261_v39  ;;  %v8149_v39 = vld [vmem:[%s15280_s7 + $0x430] sm:$0xf]  ;;  %v9872_v40 = vld [vmem:[%s15280_s7 + $0x448] sm:$0xf0] }
 0x27c   :  { %5741 = vmatpush.bf16.msra.mxu3 %v7954_v5  ;;  %v2649_v27 = vpop.f32.mrf.mxu1  ;;  %v2611_v4 = vadd.f32 %v2610_v49, %v948_v57  ;;  %v10068_v49 = vld [vmem:[%s15280_s7 + $0xa68] sm:$0xf0] }
 0x27d   :  { %5655 = vmatmul.bf16.vlgmr.msrb.gmra.mxu0 %v12674_v55  ;;  %v8934_v59 = vor.u32 %v10068_v49, %v8933_v45  ;;  %v8541_v45 = vld [vmem:[%s15280_s7 + $0x740] sm:$0xf]  ;;  %v10040_v49 = vld [vmem:[%s15280_s7 + $0x988] sm:$0xf0] }
 0x27e   :  { %5727 = vmatpush.bf16.msra.mxu2 %v7758_v7  ;;  %v7618_v7 = vor.u32 %v9739_v0, %v7617_v63  ;;  %5703 = vmatpush.bf16.msra.mxu0 %v9042_v31  ;;  %v2624_v11 = vadd.f32 %v2623_v32, %v2611_v4  ;;  %v10176_v32 = vld [vmem:[%s15280_s7 + $0xdcc] sm:$0xf]  ;;  %v8625_v31 = vld [vmem:[%s15280_s7 + $0x7e8] sm:$0xf]  ;;  %v10061_v63 = vld [vmem:[%s15280_s7 + $0xa30] sm:$0xf0]  ;;  %v8234_v0 = vor.u32 %v9893_v54, %v8233_v53 }
 0x27f   :  { %v9378_v15 = vor.u32 %v10176_v32, %v9375_v37  ;;  %v9886_v4 = vld [vmem:[%s15280_s7 + $0x4b8] sm:$0xf0]  ;;  %v8906_v51 = vor.u32 %v10061_v63, %v8905_v61  ;;  %v10148_v37 = vld [vmem:[%s15280_s7 + $0xcec] sm:$0xf]  ;;  %v9235_v53 = vld [vmem:[%s15280_s7 + $0xccc] sm:$0xf0] }
 0x280   :  { %5742 = vmatpush.bf16.msra.mxu3 %v7926_v34  ;;  %v2612_v6 = vpop.f32.mrf.mxu2  ;;  %v9991_v34 = vld [vmem:[%s15280_s7 + $0x800] sm:$0xf0]  ;;  %v8206_v12 = vor.u32 %v9886_v4, %v8205_v2  ;;  %v8121_v54 = vld [vmem:[%s15280_s7 + $0x3f8] sm:$0xf]  ;;  %v10033_v63 = vld [vmem:[%s15280_s7 + $0x950] sm:$0xf0] }
 0x281   :  { %v8626_v1 = vor.u32 %v9991_v34, %v8625_v31  ;;  %v8597_v6 = vld [vmem:[%s15280_s7 + $0x7b0] sm:$0xf]  ;;  %v8513_v31 = vld [vmem:[%s15280_s7 + $0x708] sm:$0xf]  ;;  %v9963_v34 = vld [vmem:[%s15280_s7 + $0x720] sm:$0xf0] }
 0x282   :  { %5728 = vmatpush.bf16.msra.mxu2 %v7730_v20  ;;  %v2636_v19 = vpop.f32.mrf.mxu0  ;;  %5704 = vmatpush.bf16.msra.mxu0 %v9014_v8  ;;  %v9984_v8 = vld [vmem:[%s15280_s7 + $0x7c8] sm:$0xf0]  ;;  %v8793_v61 = vld [vmem:[%s15280_s7 + $0x938] sm:$0xf]  ;;  %v8514_v4 = vor.u32 %v9963_v34, %v8513_v31  ;;  %v9834_v31 = vld [vmem:[%s15280_s7 + $0x31c] sm:$0xf] }
 0x283   :  { %v2637_v20 = vadd.f32 %v2636_v19, %v2624_v11  ;;  %v8598_v11 = vor.u32 %v9984_v8, %v8597_v6  ;;  %v9879_v19 = vld [vmem:[%s15280_s7 + $0x480] sm:$0xf0]  ;;  %v10134_v8 = vld [vmem:[%s15280_s7 + $0xc7c] sm:$0xf]  ;;  %v8011_v34 = vld [vmem:[%s15280_s7 + $0x334] sm:$0xf0] }
 0x284   :  { %5743 = vmatpush.bf16.msra.mxu3 %v7898_v30  ;;  %v2651_v22 = vpop.f32.mrf.mxu1 }
 0x285   :  { %v10047_v22 = vld [vmem:[%s15280_s7 + $0x9c0] sm:$0xf0] }
 0x286   :  { %5729 = vmatpush.bf16.msra.mxu2 %v7702_v36  ;;  %v2650_v36 = vadd.f32 %v2649_v27, %v2637_v20  ;;  %5705 = vmatpush.bf16.msra.mxu0 %v8986_v21  ;;  %v10162_v27 = vld [vmem:[%s15280_s7 + $0xd5c] sm:$0xf]  ;;  %v9291_v21 = vld [vmem:[%s15280_s7 + $0xd3c] sm:$0xf0]  ;;  %v8850_v44 = vor.u32 %v10047_v22, %v8849_v24 }
 0x287   :  { %v9294_v32 = vor.u32 %v10155_v17, %v9291_v21  ;;  %v8065_v21 = vld [vmem:[%s15280_s7 + $0x388] sm:$0xf] }
 0x288   :  { %vm2660_vm13 = vcmp.ge.f32.partialorder %v2650_v36, 0.0  ;;  %v2668_v46 = vmul.f32 0.2, %v2650_v36  ;;  %5744 = vmatpush.bf16.msra.mxu3 %v7870_v23  ;;  %v8569_v23 = vld [vmem:[%s15280_s7 + $0x778] sm:$0xf] }
 0x28a   :  { %5730 = vmatpush.bf16.msra.mxu2 %v7674_v48  ;;  %v7842_v48 = vor.u32 %v9795_v33, %v7841_v28  ;;  %v2676_v5 = vsel %vm2660_vm13, %v2650_v36, %v2668_v46  ;;  %v2638_v57 = vpop.f32.mrf.mxu0  ;;  %5706 = vmatpush.bf16.msra.mxu0 %v8958_v47  ;;  %v8178_v28 = vor.u32 %v9879_v19, %v8177_v18  ;;  %v9970_v46 = vld [vmem:[%s15280_s7 + $0x758] sm:$0xf0]  ;;  %v10127_v18 = vld [vmem:[%s15280_s7 + $0xc44] sm:$0xf]  ;;  %v9179_v19 = vld [vmem:[%s15280_s7 + $0xc5c] sm:$0xf0] }
 0x28b   :  { %v13283_v56 = vpack.c.bf16 %v2676_v5, %v2676_v5  ;;  %v8570_v36 = vor.u32 %v9977_v29, %v8569_v23  ;;  %v8150_v5 = vor.u32 %v9872_v40, %v8149_v39  ;;  %v9865_v57 = vld [vmem:[%s15280_s7 + $0x410] sm:$0xf0]  ;;  %v9851_v23 = vld [vmem:[%s15280_s7 + $0x3a0] sm:$0xf0]  ;;  %v8737_v29 = vld [vmem:[%s15280_s7 + $0x8c8] sm:$0xf] }
 0x28c   :  { %5745 = vmatpush.bf16.msra.mxu3 %v7842_v48  ;;  %v8821_v48 = vld [vmem:[%s15280_s7 + $0x970] sm:$0xf]  ;;  %v9956_v39 = vld [vmem:[%s15280_s7 + $0x6e8] sm:$0xf0]  ;;  %v9771_v40 = vld [vmem:[%s15280_s7 + $0x124] sm:$0xf] }
 0x28d   :  { %5616 = vmatmul.bf16.vlgmr.msra.gmra.mxu1 %v13283_v56  ;;  %5707 = vmatmul.bf16.vlgmr.msra.gmra.mxu0 %v13126_v14 }
 0x28e   :  { %5731 = vmatpush.bf16.msra.mxu2 %v7646_v60  ;;  %v9347_v60 = vld [vmem:[%s15280_s7 + $0xdac] sm:$0xf0]  ;;  %5751 = vmatpush.bf16.msrb.mxu0 %v8262_v43 }
 0x28f   :  { %5712 = vmatpush.bf16.msra.mxu1 %v9378_v15  ;;  %v9350_v42 = vor.u32 %v10169_v52, %v9347_v60  ;;  %5746 = vmatmul.bf16.vlgmr.msra.gmra.mxu3 %v12533_v35  ;;  %v10141_v15 = vld [vmem:[%s15280_s7 + $0xcb4] sm:$0xf]  ;;  %v8542_v52 = vor.u32 %v9970_v46, %v8541_v45  ;;  %v8822_v60 = vor.u32 %v10040_v49, %v8821_v48  ;;  %v8039_v46 = vld [vmem:[%s15280_s7 + $0x36c] sm:$0xf0] }
 0x290   :  { %5790 = vmatpush.bf16.msrb.mxu3 %v8934_v59  ;;  %v9238_v2 = vor.u32 %v10141_v15, %v9235_v53  ;;  %v9841_v45 = vld [vmem:[%s15280_s7 + $0x354] sm:$0xf] }
 0x291   :  { %v10117_v15 = vld [vmem:[%s15280_s7 + $0xbf0] sm:$0xf0]  ;;  %v8042_v53 = vor.u32 %v9841_v45, %v8039_v46 }
 0x292   :  { %5732 = vmatpush.bf16.msra.mxu2 %v7618_v7  ;;  %v9319_v7 = vld [vmem:[%s15280_s7 + $0xd74] sm:$0xf0]  ;;  %v5539_v30 = vpop.f32.mrf.mxu3  ;;  %5752 = vmatpush.bf16.msrb.mxu0 %v8234_v0  ;;  %v9785_v0 = vld [vmem:[%s15280_s7 + $0x194] sm:$0xf] }
 0x293   :  { %5713 = vmatpush.bf16.msra.mxu1 %v9350_v42  ;;  %v9322_v16 = vor.u32 %v10162_v27, %v9319_v7  ;;  %v7815_v27 = vld [vmem:[%s15280_s7 + $0x1ac] sm:$0xf0]  ;;  %v8794_v7 = vor.u32 %v10033_v63, %v8793_v61 }
 0x294   :  { %5791 = vmatpush.bf16.msrb.mxu3 %v8906_v51  ;;  %v9858_v51 = vld [vmem:[%s15280_s7 + $0x3d8] sm:$0xf0]  ;;  %v7818_v6 = vor.u32 %v9785_v0, %v7815_v27  ;;  %v9101_v0 = vld [vmem:[%s15280_s7 + $0xba0] sm:$0xf] }
 0x295   :  { %5733 = vmatmul.bf16.vlgmr.msra.gmra.mxu2 %v12572_v62  ;;  %v8094_v17 = vor.u32 %v9858_v51, %v8093_v3  ;;  %v10110_v27 = vld [vmem:[%s15280_s7 + $0xbb8] sm:$0xf0]  ;;  %v9757_v3 = vld [vmem:[%s15280_s7 + $0xb4] sm:$0xf]  ;;  %v7703_v51 = vld [vmem:[%s15280_s7 + $0xcc] sm:$0xf0] }
 0x296   :  { %5777 = vmatpush.bf16.msrb.mxu2 %v8710_v10  ;;  %v10054_v10 = vld [vmem:[%s15280_s7 + $0x9f8] sm:$0xf0]  ;;  %5753 = vmatpush.bf16.msrb.mxu0 %v8206_v12 }
 0x297   :  { %v8878_v20 = vor.u32 %v10054_v10, %v8877_v9  ;;  %5714 = vmatpush.bf16.msra.mxu1 %v9322_v16  ;;  %v8765_v9 = vld [vmem:[%s15280_s7 + $0x900] sm:$0xf]  ;;  %v10026_v12 = vld [vmem:[%s15280_s7 + $0x918] sm:$0xf0]  ;;  %v7787_v16 = vld [vmem:[%s15280_s7 + $0x174] sm:$0xf0] }
 0x298   :  { %v8766_v22 = vor.u32 %v10026_v12, %v8765_v9  ;;  %v9073_v9 = vld [vmem:[%s15280_s7 + $0xb68] sm:$0xf]  ;;  %v7706_v12 = vor.u32 %v9757_v3, %v7703_v51 }
 0x299   :  { %5792 = vmatpush.bf16.msrb.mxu3 %v8878_v20 }
 0x29a   :  { %5778 = vmatpush.bf16.msrb.mxu2 %v8682_v25  ;;  %v5526_v25 = vpop.f32.mrf.mxu2  ;;  %v5541_v47 = vpop.f32.mrf.mxu3  ;;  %5754 = vmatpush.bf16.msrb.mxu0 %v8178_v28  ;;  %v10019_v28 = vld [vmem:[%s15280_s7 + $0x8e0] sm:$0xf0] }
 0x29b   :  { %v5527_v33 = vadd.f32 %v5526_v25, %v3199_v13  ;;  %5715 = vmatpush.bf16.msra.mxu1 %v9294_v32  ;;  %v9778_v13 = vld [vmem:[%s15280_s7 + $0x15c] sm:$0xf]  ;;  %v10124_v32 = vld [vmem:[%s15280_s7 + $0xc28] sm:$0xf0]  ;;  %v9182_v47 = vor.u32 %v10127_v18, %v9179_v19  ;;  %v8738_v49 = vor.u32 %v10019_v28, %v8737_v29  ;;  %v7675_v18 = vld [vmem:[%s15280_s7 + $0x94] sm:$0xf0] }
 0x29c   :  { %v5565_v59 = vpop.f32.mrf.mxu1  ;;  %v7790_v25 = vor.u32 %v9778_v13, %v7787_v16  ;;  %v8401_v16 = vld [vmem:[%s15280_s7 + $0x628] sm:$0xf]  ;;  %v9820_v19 = vld [vmem:[%s15280_s7 + $0x2ac] sm:$0xf]  ;;  %v9045_v29 = vld [vmem:[%s15280_s7 + $0xb30] sm:$0xf] }
 0x29d   :  { %v5540_v43 = vadd.f32 %v5539_v30, %v5527_v33  ;;  %5793 = vmatpush.bf16.msrb.mxu3 %v8850_v44  ;;  %5668 = vmatmul.bf16.vlgmr.msrb.gmra.mxu1 %v12652_v41  ;;  %v9207_v30 = vld [vmem:[%s15280_s7 + $0xc94] sm:$0xf0]  ;;  %v9157_v33 = vld [vmem:[%s15280_s7 + $0xc10] sm:$0xf]  ;;  %v8066_v44 = vor.u32 %v9851_v23, %v8065_v21 }
 0x29e   :  { %5779 = vmatpush.bf16.msrb.mxu2 %v8654_v50  ;;  %v9266_v50 = vor.u32 %v10148_v37, %v9263_v58  ;;  %5755 = vmatpush.bf16.msrb.mxu0 %v8150_v5  ;;  %v9210_v20 = vor.u32 %v10134_v8, %v9207_v30  ;;  %v8485_v37 = vld [vmem:[%s15280_s7 + $0x6d0] sm:$0xf]  ;;  %v7759_v58 = vld [vmem:[%s15280_s7 + $0x13c] sm:$0xf0]  ;;  %v9158_v48 = vor.u32 %v10124_v32, %v9157_v33  ;;  %v9129_v5 = vld [vmem:[%s15280_s7 + $0xbd8] sm:$0xf] }
 0x29f   :  { %v9130_v61 = vor.u32 %v10117_v15, %v9129_v5  ;;  %v9102_v8 = vor.u32 %v10110_v27, %v9101_v0  ;;  %v8373_v28 = vld [vmem:[%s15280_s7 + $0x5f0] sm:$0xf]  ;;  %v9928_v33 = vld [vmem:[%s15280_s7 + $0x608] sm:$0xf0]  ;;  %v9743_v32 = vld [vmem:[%s15280_s7 + $0x44] sm:$0xf] }
 0x2a0   :  { %5716 = vmatpush.bf16.msra.mxu1 %v9266_v50  ;;  %v8374_v46 = vor.u32 %v9928_v33, %v8373_v28  ;;  %v8345_v5 = vld [vmem:[%s15280_s7 + $0x5b8] sm:$0xf]  ;;  %v9736_v15 = vld [vmem:[%s15280_s7 + $0xc] sm:$0xf]  ;;  %v8317_v0 = vld [vmem:[%s15280_s7 + $0x580] sm:$0xf] }
 0x2a1   :  { %5794 = vmatpush.bf16.msrb.mxu3 %v8822_v60  ;;  %v7731_v60 = vld [vmem:[%s15280_s7 + $0x104] sm:$0xf0]  ;;  %v9914_v27 = vld [vmem:[%s15280_s7 + $0x598] sm:$0xf0] }
 0x2a2   :  { %5780 = vmatpush.bf16.msrb.mxu2 %v8626_v1  ;;  %v5528_v42 = vpop.f32.mrf.mxu2  ;;  %v8122_v1 = vor.u32 %v9865_v57, %v8121_v54  ;;  %v5552_v10 = vpop.f32.mrf.mxu0  ;;  %v8457_v54 = vld [vmem:[%s15280_s7 + $0x698] sm:$0xf]  ;;  %v9949_v57 = vld [vmem:[%s15280_s7 + $0x6b0] sm:$0xf0] }
 0x2a3   :  { %v8458_v63 = vor.u32 %v9949_v57, %v8457_v54  ;;  %v10009_v57 = vld [vmem:[%s15280_s7 + $0x894] sm:$0xf] }
 0x2a4   :  { %5756 = vmatpush.bf16.msrb.mxu0 %v8122_v1  ;;  %5717 = vmatpush.bf16.msra.mxu1 %v9238_v2  ;;  %v5567_v24 = vpop.f32.mrf.mxu1  ;;  %v8014_v1 = vor.u32 %v9834_v31, %v8011_v34  ;;  %v8429_v2 = vld [vmem:[%s15280_s7 + $0x660] sm:$0xf]  ;;  %v10082_v34 = vld [vmem:[%s15280_s7 + $0xad8] sm:$0xf0] }
 0x2a5   :  { %5795 = vmatpush.bf16.msrb.mxu3 %v8794_v7  ;;  %v9827_v7 = vld [vmem:[%s15280_s7 + $0x2e4] sm:$0xf]  ;;  %v10096_v24 = vld [vmem:[%s15280_s7 + $0xb48] sm:$0xf0]  ;;  %v8989_v31 = vld [vmem:[%s15280_s7 + $0xac0] sm:$0xf] }
 0x2a6   :  { %5781 = vmatpush.bf16.msrb.mxu2 %v8598_v11  ;;  %v5553_v11 = vadd.f32 %v5552_v10, %v5540_v43  ;;  %v8486_v43 = vor.u32 %v9956_v39, %v8485_v37  ;;  %v10103_v10 = vld [vmem:[%s15280_s7 + $0xb80] sm:$0xf0]  ;;  %v7647_v37 = vld [vmem:[%s15280_s7 + $0x5c] sm:$0xf0]  ;;  %v9813_v39 = vld [vmem:[%s15280_s7 + $0x274] sm:$0xf]  ;;  %v8990_v51 = vor.u32 %v10082_v34, %v8989_v31 }
 0x2a7   :  { %v9074_v21 = vor.u32 %v10103_v10, %v9073_v9  ;;  %v8961_v9 = vld [vmem:[%s15280_s7 + $0xa88] sm:$0xf]  ;;  %v10075_v10 = vld [vmem:[%s15280_s7 + $0xaa0] sm:$0xf0]  ;;  %v8879_v34 = vld [vmem:[%s15280_s7 + $0x9fc] sm:$0xf0] }
 0x2a8   :  { %5757 = vmatpush.bf16.msrb.mxu0 %v8094_v17  ;;  %5718 = vmatpush.bf16.msra.mxu1 %v9210_v20  ;;  %v9750_v17 = vld [vmem:[%s15280_s7 + $0x7c] sm:$0xf]  ;;  %v7955_v20 = vld [vmem:[%s15280_s7 + $0x2c4] sm:$0xf0]  ;;  %v10051_v31 = vld [vmem:[%s15280_s7 + $0x9e4] sm:$0xf] }
 0x2a9   :  { %5796 = vmatpush.bf16.msrb.mxu3 %v8766_v22  ;;  %v7678_v22 = vor.u32 %v9750_v17, %v7675_v18  ;;  %v8263_v17 = vld [vmem:[%s15280_s7 + $0x52c] sm:$0xf0] }
 0x2aa   :  { %5782 = vmatpush.bf16.msrb.mxu2 %v8570_v36  ;;  %v13457_v36 = vadd.f32 %v5565_v59, %v5553_v11  ;;  %v5554_v50 = vpop.f32.mrf.mxu0  ;;  %v9764_v59 = vld [vmem:[%s15280_s7 + $0xec] sm:$0xf]  ;;  %v9935_v11 = vld [vmem:[%s15280_s7 + $0x640] sm:$0xf0] }
 0x2ab   :  { %v7734_v42 = vor.u32 %v9764_v59, %v7731_v60  ;;  %v8402_v23 = vor.u32 %v9935_v11, %v8401_v16  ;;  %v7619_v50 = vld [vmem:[%s15280_s7 + $0x24] sm:$0xf0]  ;;  %v8711_v59 = vld [vmem:[%s15280_s7 + $0x8ac] sm:$0xf0]  ;;  %v9897_v11 = vld [vmem:[%s15280_s7 + $0x514] sm:$0xf] }
 0x2ac   :  { %5758 = vmatpush.bf16.msrb.mxu0 %v8066_v44  ;;  %5719 = vmatpush.bf16.msra.mxu1 %v9182_v47  ;;  %v9017_v47 = vld [vmem:[%s15280_s7 + $0xaf8] sm:$0xf]  ;;  %v7843_v16 = vld [vmem:[%s15280_s7 + $0x1e4] sm:$0xf0]  ;;  %v8266_v28 = vor.u32 %v9897_v11, %v8263_v17  ;;  %v9269_v11 = vld [vmem:[%s15280_s7 + $0xcf0] sm:$0xf] }
 0x2ad   :  { %5797 = vmatpush.bf16.msrb.mxu3 %v8738_v49  ;;  %v7650_v49 = vor.u32 %v9743_v32, %v7647_v37  ;;  %v9890_v37 = vld [vmem:[%s15280_s7 + $0x4dc] sm:$0xf]  ;;  %v10152_v17 = vld [vmem:[%s15280_s7 + $0xd08] sm:$0xf0] }
 0x2ae   :  { %5783 = vmatpush.bf16.msrb.mxu2 %v8542_v52  ;;  %v7762_v52 = vor.u32 %v9771_v40, %v7759_v58  ;;  %v7927_v40 = vld [vmem:[%s15280_s7 + $0x28c] sm:$0xf0]  ;;  %v9046_v58 = vor.u32 %v10096_v24, %v9045_v29  ;;  %v8655_v29 = vld [vmem:[%s15280_s7 + $0x83c] sm:$0xf0]  ;;  %v10065_v24 = vld [vmem:[%s15280_s7 + $0xa54] sm:$0xf] }
 0x2af   :  { %5759 = vmatmul.bf16.vlgmr.msrb.gmra.mxu0 %v12674_v55  ;;  %5720 = vmatmul.bf16.vlgmr.msra.gmra.mxu1 %v13283_v56 }
 0x2b0   :  { %5803 = vmatpush.bf16.msra.mxu0 %v9158_v48  ;;  %5764 = vmatpush.bf16.msrb.mxu1 %v8486_v43  ;;  %v10089_v48 = vld [vmem:[%s15280_s7 + $0xb10] sm:$0xf0]  ;;  %v7930_v43 = vor.u32 %v9813_v39, %v7927_v40  ;;  %v8235_v39 = vld [vmem:[%s15280_s7 + $0x4f4] sm:$0xf0] }
 0x2b1   :  { %5842 = vmatpush.bf16.msra.mxu3 %v8042_v53  ;;  %v7899_v53 = vld [vmem:[%s15280_s7 + $0x254] sm:$0xf0]  ;;  %v9018_v54 = vor.u32 %v10089_v48, %v9017_v47  ;;  %v9988_v47 = vld [vmem:[%s15280_s7 + $0x7ec] sm:$0xf]  ;;  %v8627_v48 = vld [vmem:[%s15280_s7 + $0x804] sm:$0xf0] }
 0x2b2   :  { %5784 = vmatpush.bf16.msrb.mxu2 %v8514_v4  ;;  %v9942_v4 = vld [vmem:[%s15280_s7 + $0x678] sm:$0xf0]  ;;  %5798 = vmatmul.bf16.vlgmr.msrb.gmra.mxu3 %v12958_v38 }
 0x2b3   :  { %v8430_v30 = vor.u32 %v9942_v4, %v8429_v2  ;;  %v7871_v2 = vld [vmem:[%s15280_s7 + $0x21c] sm:$0xf0]  ;;  %v10002_v4 = vld [vmem:[%s15280_s7 + $0x85c] sm:$0xf] }
 0x2b4   :  { %5804 = vmatpush.bf16.msra.mxu0 %v9130_v61  ;;  %5765 = vmatpush.bf16.msrb.mxu1 %v8458_v63  ;;  %v7622_v61 = vor.u32 %v9736_v15, %v7619_v50  ;;  %v9883_v15 = vld [vmem:[%s15280_s7 + $0x4a4] sm:$0xf]  ;;  %v8207_v50 = vld [vmem:[%s15280_s7 + $0x4bc] sm:$0xf0] }
 0x2b5   :  { %5785 = vmatmul.bf16.vlgmr.msrb.gmra.mxu2 %v12762_v26  ;;  %5843 = vmatpush.bf16.msra.mxu3 %v8014_v1  ;;  %v9799_v1 = vld [vmem:[%s15280_s7 + $0x204] sm:$0xf] }
 0x2b6   :  { %5829 = vmatpush.bf16.msra.mxu2 %v7818_v6  ;;  %v7983_v6 = vld [vmem:[%s15280_s7 + $0x2fc] sm:$0xf0] }
 0x2b7   :  { %v7986_v13 = vor.u32 %v9827_v7, %v7983_v6  ;;  %v8683_v7 = vld [vmem:[%s15280_s7 + $0x874] sm:$0xf0]  ;;  %v8289_v6 = vld [vmem:[%s15280_s7 + $0x548] sm:$0xf] }
 0x2b8   :  { %5805 = vmatpush.bf16.msra.mxu0 %v9102_v8  ;;  %5766 = vmatpush.bf16.msrb.mxu1 %v8430_v30  ;;  %v5578_v44 = vpop.f32.mrf.mxu2  ;;  %v9907_v8 = vld [vmem:[%s15280_s7 + $0x560] sm:$0xf0]  ;;  %v8318_v30 = vor.u32 %v9914_v27, %v8317_v0  ;;  %v8686_v18 = vor.u32 %v10002_v4, %v8683_v7  ;;  %v9876_v0 = vld [vmem:[%s15280_s7 + $0x46c] sm:$0xf]  ;;  %v8179_v27 = vld [vmem:[%s15280_s7 + $0x484] sm:$0xf0] }
 0x2b9   :  { %5844 = vmatpush.bf16.msra.mxu3 %v7986_v13  ;;  %v13578_v45 = vadd.f32 %v5578_v44, %v13457_v36  ;;  %v9921_v36 = vld [vmem:[%s15280_s7 + $0x5d0] sm:$0xf0]  ;;  %v7874_v13 = vor.u32 %v9799_v1, %v7871_v2  ;;  %v8882_v1 = vor.u32 %v10051_v31, %v8879_v34  ;;  %v9297_v2 = vld [vmem:[%s15280_s7 + $0xd28] sm:$0xf]  ;;  %v10159_v4 = vld [vmem:[%s15280_s7 + $0xd40] sm:$0xf0] }
 0x2ba   :  { %5830 = vmatpush.bf16.msra.mxu2 %v7790_v25  ;;  %v7958_v25 = vor.u32 %v9820_v19, %v7955_v20  ;;  %v8346_v60 = vor.u32 %v9921_v36, %v8345_v5  ;;  %v9381_v19 = vld [vmem:[%s15280_s7 + $0xdd0] sm:$0xf]  ;;  %v10180_v20 = vld [vmem:[%s15280_s7 + $0xde8] sm:$0xf0]  ;;  %v8238_v5 = vor.u32 %v9890_v37, %v8235_v39  ;;  %v10145_v37 = vld [vmem:[%s15280_s7 + $0xcd0] sm:$0xf0] }
 0x2bb   :  { %v9382_v32 = vor.u32 %v10180_v20, %v9381_v19  ;;  %v10044_v7 = vld [vmem:[%s15280_s7 + $0x9ac] sm:$0xf]  ;;  %v8543_v19 = vld [vmem:[%s15280_s7 + $0x75c] sm:$0xf0]  ;;  %v10037_v20 = vld [vmem:[%s15280_s7 + $0x974] sm:$0xf] }
 0x2bc   :  { %5806 = vmatpush.bf16.msra.mxu0 %v9074_v21  ;;  %5767 = vmatpush.bf16.msrb.mxu1 %v8402_v23  ;;  %v9995_v21 = vld [vmem:[%s15280_s7 + $0x824] sm:$0xf]  ;;  %v8962_v23 = vor.u32 %v10075_v10, %v8961_v9  ;;  %v9298_v9 = vor.u32 %v10159_v4, %v9297_v2  ;;  %v9869_v10 = vld [vmem:[%s15280_s7 + $0x434] sm:$0xf]  ;;  %v9960_v39 = vld [vmem:[%s15280_s7 + $0x70c] sm:$0xf] }
 0x2bd   :  { %5845 = vmatpush.bf16.msra.mxu3 %v7958_v25  ;;  %v8290_v25 = vor.u32 %v9907_v8, %v8289_v6  ;;  %v8658_v40 = vor.u32 %v9995_v21, %v8655_v29  ;;  %v8851_v6 = vld [vmem:[%s15280_s7 + $0x9c4] sm:$0xf0]  ;;  %v8823_v21 = vld [vmem:[%s15280_s7 + $0x98c] sm:$0xf0]  ;;  %v9782_v34 = vld [vmem:[%s15280_s7 + $0x178] sm:$0xf0] }
 0x2be   :  { %5831 = vmatpush.bf16.msra.mxu2 %v7762_v52  ;;  %v9806_v52 = vld [vmem:[%s15280_s7 + $0x23c] sm:$0xf]  ;;  %v10016_v2 = vld [vmem:[%s15280_s7 + $0x8cc] sm:$0xf] }
 0x2bf   :  { %v7902_v63 = vor.u32 %v9806_v52, %v7899_v53  ;;  %v8630_v52 = vor.u32 %v9988_v47, %v8627_v48  ;;  %v7821_v48 = vld [vmem:[%s15280_s7 + $0x198] sm:$0xf] }
 0x2c0   :  { %5807 = vmatpush.bf16.msra.mxu0 %v9046_v58  ;;  %5768 = vmatpush.bf16.msrb.mxu1 %v8374_v46  ;;  %v5580_v3 = vpop.f32.mrf.mxu2  ;;  %v9353_v58 = vld [vmem:[%s15280_s7 + $0xd98] sm:$0xf]  ;;  %v10173_v46 = vld [vmem:[%s15280_s7 + $0xdb0] sm:$0xf0] }
 0x2c1   :  { %5846 = vmatpush.bf16.msra.mxu3 %v7930_v43  ;;  %v8907_v43 = vld [vmem:[%s15280_s7 + $0xa34] sm:$0xf0]  ;;  %v9354_v36 = vor.u32 %v10173_v46, %v9353_v58  ;;  %v9974_v3 = vld [vmem:[%s15280_s7 + $0x77c] sm:$0xf] }
 0x2c2   :  { %5832 = vmatpush.bf16.msra.mxu2 %v7734_v42  ;;  %v8714_v42 = vor.u32 %v10009_v57, %v8711_v59  ;;  %v10166_v57 = vld [vmem:[%s15280_s7 + $0xd78] sm:$0xf0]  ;;  %v9981_v59 = vld [vmem:[%s15280_s7 + $0x7b4] sm:$0xf]  ;;  %v8795_v58 = vld [vmem:[%s15280_s7 + $0x954] sm:$0xf0] }
 0x2c4   :  { %5808 = vmatpush.bf16.msra.mxu0 %v9018_v54  ;;  %5769 = vmatpush.bf16.msrb.mxu1 %v8346_v60  ;;  %v9325_v54 = vld [vmem:[%s15280_s7 + $0xd60] sm:$0xf]  ;;  %v8599_v60 = vld [vmem:[%s15280_s7 + $0x7cc] sm:$0xf0] }
 0x2c5   :  { %5847 = vmatpush.bf16.msra.mxu3 %v7902_v63  ;;  %v9326_v63 = vor.u32 %v10166_v57, %v9325_v54  ;;  %v10023_v57 = vld [vmem:[%s15280_s7 + $0x904] sm:$0xf] }
 0x2c6   :  { %5833 = vmatpush.bf16.msra.mxu2 %v7706_v12  ;;  %v9792_v12 = vld [vmem:[%s15280_s7 + $0x1cc] sm:$0xf] }
 0x2c7   :  { %v7846_v33 = vor.u32 %v9792_v12, %v7843_v16  ;;  %v8151_v12 = vld [vmem:[%s15280_s7 + $0x44c] sm:$0xf0]  ;;  %v8854_v16 = vor.u32 %v10044_v7, %v8851_v6 }
 0x2c8   :  { %5809 = vmatpush.bf16.msra.mxu0 %v8990_v51  ;;  %5770 = vmatpush.bf16.msrb.mxu1 %v8318_v30  ;;  %v8571_v51 = vld [vmem:[%s15280_s7 + $0x794] sm:$0xf0]  ;;  %v8182_v30 = vor.u32 %v9876_v0, %v8179_v27  ;;  %v9159_v7 = vld [vmem:[%s15280_s7 + $0xc2c] sm:$0xf0] }
 0x2c9   :  { %5848 = vmatpush.bf16.msra.mxu3 %v7874_v13  ;;  %v8574_v13 = vor.u32 %v9974_v3, %v8571_v51  ;;  %v8739_v3 = vld [vmem:[%s15280_s7 + $0x8e4] sm:$0xf0]  ;;  %v10121_v51 = vld [vmem:[%s15280_s7 + $0xc14] sm:$0xf] }
 0x2ca   :  { %5834 = vmatpush.bf16.msra.mxu2 %v7678_v22  ;;  %v8935_v22 = vld [vmem:[%s15280_s7 + $0xa6c] sm:$0xf0] }
 0x2cb   :  { %v8938_v44 = vor.u32 %v10065_v24, %v8935_v22  ;;  %v9270_v24 = vor.u32 %v10152_v17, %v9269_v11  ;;  %v9862_v22 = vld [vmem:[%s15280_s7 + $0x3fc] sm:$0xf]  ;;  %v9845_v11 = vld [vmem:[%s15280_s7 + $0x370] sm:$0xf0] }
 0x2cc   :  { %5810 = vmatpush.bf16.msra.mxu0 %v8962_v23  ;;  %5771 = vmatpush.bf16.msrb.mxu1 %v8290_v25  ;;  %v8154_v23 = vor.u32 %v9869_v10, %v8151_v12  ;;  %v8123_v25 = vld [vmem:[%s15280_s7 + $0x414] sm:$0xf0]  ;;  %v7765_v10 = vld [vmem:[%s15280_s7 + $0x128] sm:$0xf] }
 0x2cd   :  { %5849 = vmatpush.bf16.msra.mxu3 %v7846_v33  ;;  %v8826_v33 = vor.u32 %v10037_v20, %v8823_v21  ;;  %v8126_v47 = vor.u32 %v9862_v22, %v8123_v25  ;;  %v10114_v21 = vld [vmem:[%s15280_s7 + $0xbdc] sm:$0xf] }
 0x2ce   :  { %5835 = vmatpush.bf16.msra.mxu2 %v7650_v49  ;;  %v10058_v49 = vld [vmem:[%s15280_s7 + $0xa1c] sm:$0xf] }
 0x2cf   :  { %v8910_v53 = vor.u32 %v10058_v49, %v8907_v43  ;;  %5772 = vmatmul.bf16.vlgmr.msrb.gmra.mxu1 %v12652_v41  ;;  %5811 = vmatmul.bf16.vlgmr.msra.gmra.mxu0 %v13126_v14  ;;  %v9789_v49 = vld [vmem:[%s15280_s7 + $0x1b0] sm:$0xf0]  ;;  %v9946_v25 = vld [vmem:[%s15280_s7 + $0x69c] sm:$0xf] }
 0x2d0   :  { %5855 = vmatpush.bf16.msrb.mxu0 %v8266_v28  ;;  %5816 = vmatpush.bf16.msra.mxu1 %v9382_v32  ;;  %v13778_v29 = vpop.f32.mrf.mxu3  ;;  %v9241_v32 = vld [vmem:[%s15280_s7 + $0xcb8] sm:$0xf]  ;;  %v7822_v54 = vor.u32 %v9789_v49, %v7821_v48 }
 0x2d1   :  { %5894 = vmatpush.bf16.msrb.mxu3 %v8938_v44  ;;  %v10030_v44 = vld [vmem:[%s15280_s7 + $0x93c] sm:$0xf]  ;;  %v9242_v43 = vor.u32 %v10145_v37, %v9241_v32  ;;  %v9768_v32 = vld [vmem:[%s15280_s7 + $0x108] sm:$0xf0]  ;;  %v8017_v37 = vld [vmem:[%s15280_s7 + $0x320] sm:$0xf] }
 0x2d2   :  { %5836 = vmatpush.bf16.msra.mxu2 %v7622_v61  ;;  %5850 = vmatmul.bf16.vlgmr.msra.gmra.mxu3 %v12533_v35  ;;  %v8210_v61 = vor.u32 %v9883_v15, %v8207_v50  ;;  %v8798_v50 = vor.u32 %v10030_v44, %v8795_v58 }
 0x2d4   :  { %5856 = vmatpush.bf16.msrb.mxu0 %v8238_v5  ;;  %5817 = vmatpush.bf16.msra.mxu1 %v9354_v36  ;;  %v9855_v5 = vld [vmem:[%s15280_s7 + $0x3c4] sm:$0xf]  ;;  %v8095_v36 = vld [vmem:[%s15280_s7 + $0x3dc] sm:$0xf0] }
 0x2d5   :  { %5837 = vmatmul.bf16.vlgmr.msra.gmra.mxu2 %v12572_v62  ;;  %5895 = vmatpush.bf16.msrb.mxu3 %v8910_v53  ;;  %v10138_v53 = vld [vmem:[%s15280_s7 + $0xc98] sm:$0xf0]  ;;  %v8098_v31 = vor.u32 %v9855_v5, %v8095_v36  ;;  %v8431_v5 = vld [vmem:[%s15280_s7 + $0x67c] sm:$0xf0]  ;;  %v7709_v36 = vld [vmem:[%s15280_s7 + $0xb8] sm:$0xf] }
 0x2d6   :  { %5881 = vmatpush.bf16.msrb.mxu2 %v8714_v42  ;;  %v8602_v42 = vor.u32 %v9981_v59, %v8599_v60  ;;  %v8767_v59 = vld [vmem:[%s15280_s7 + $0x91c] sm:$0xf0] }
 0x2d7   :  { %v7793_v60 = vld [vmem:[%s15280_s7 + $0x160] sm:$0xf]  ;;  %v8770_v4 = vor.u32 %v10023_v57, %v8767_v59  ;;  %v10100_v57 = vld [vmem:[%s15280_s7 + $0xb6c] sm:$0xf]  ;;  %v9075_v59 = vld [vmem:[%s15280_s7 + $0xb84] sm:$0xf0] }
 0x2d8   :  { %5857 = vmatpush.bf16.msrb.mxu0 %v8210_v61  ;;  %v13752_v8 = vpop.f32.mrf.mxu2  ;;  %5818 = vmatpush.bf16.msra.mxu1 %v9326_v63  ;;  %v9185_v61 = vld [vmem:[%s15280_s7 + $0xc48] sm:$0xf]  ;;  %v10131_v63 = vld [vmem:[%s15280_s7 + $0xc60] sm:$0xf0]  ;;  %v5593_v0 = vpop.f32.mrf.mxu3  ;;  %v7794_v6 = vor.u32 %v9782_v34, %v7793_v60  ;;  %v9932_v34 = vld [vmem:[%s15280_s7 + $0x62c] sm:$0xf] }
 0x2d9   :  { %5896 = vmatpush.bf16.msrb.mxu3 %v8882_v1  ;;  %v8067_v1 = vld [vmem:[%s15280_s7 + $0x3a4] sm:$0xf0]  ;;  %v9186_v17 = vor.u32 %v10131_v63, %v9185_v61  ;;  %v7681_v63 = vld [vmem:[%s15280_s7 + $0x80] sm:$0xf]  ;;  %v9754_v0 = vld [vmem:[%s15280_s7 + $0x98] sm:$0xf0] }
 0x2da   :  { %5882 = vmatpush.bf16.msrb.mxu2 %v8686_v18  ;;  %v9967_v18 = vld [vmem:[%s15280_s7 + $0x744] sm:$0xf]  ;;  %v8403_v61 = vld [vmem:[%s15280_s7 + $0x644] sm:$0xf0] }
 0x2db   :  { %v8546_v28 = vor.u32 %v9967_v18, %v8543_v19  ;;  %v9162_v18 = vor.u32 %v10121_v51, %v9159_v7  ;;  %v8742_v19 = vor.u32 %v10016_v2, %v8739_v3  ;;  %v8406_v51 = vor.u32 %v9932_v34, %v8403_v61  ;;  %v10093_v7 = vld [vmem:[%s15280_s7 + $0xb34] sm:$0xf]  ;;  %v9904_v34 = vld [vmem:[%s15280_s7 + $0x54c] sm:$0xf]  ;;  %v8291_v61 = vld [vmem:[%s15280_s7 + $0x564] sm:$0xf0] }
 0x2dc   :  { %5858 = vmatpush.bf16.msrb.mxu0 %v8182_v30  ;;  %5819 = vmatpush.bf16.msra.mxu1 %v9298_v9  ;;  %v9953_v30 = vld [vmem:[%s15280_s7 + $0x6d4] sm:$0xf]  ;;  %v8487_v9 = vld [vmem:[%s15280_s7 + $0x6ec] sm:$0xf0] }
 0x2dd   :  { %5897 = vmatpush.bf16.msrb.mxu3 %v8854_v16  ;;  %v8045_v16 = vld [vmem:[%s15280_s7 + $0x358] sm:$0xf]  ;;  %v8490_v20 = vor.u32 %v9953_v30, %v8487_v9  ;;  %v7682_v30 = vor.u32 %v9754_v0, %v7681_v63  ;;  %v10072_v0 = vld [vmem:[%s15280_s7 + $0xa8c] sm:$0xf] }
 0x2de   :  { %5883 = vmatpush.bf16.msrb.mxu2 %v8658_v40  ;;  %v8515_v40 = vld [vmem:[%s15280_s7 + $0x724] sm:$0xf0]  ;;  %v8046_v22 = vor.u32 %v9845_v11, %v8045_v16  ;;  %v9747_v16 = vld [vmem:[%s15280_s7 + $0x60] sm:$0xf0]  ;;  %v7933_v11 = vld [vmem:[%s15280_s7 + $0x278] sm:$0xf] }
 0x2df   :  { %v8518_v15 = vor.u32 %v9960_v39, %v8515_v40  ;;  %v9838_v39 = vld [vmem:[%s15280_s7 + $0x338] sm:$0xf0] }
 0x2e0   :  { %5859 = vmatpush.bf16.msrb.mxu0 %v8154_v23  ;;  %v5632_v46 = vpop.f32.mrf.mxu2  ;;  %5820 = vmatpush.bf16.msra.mxu1 %v9270_v24  ;;  %v9131_v23 = vld [vmem:[%s15280_s7 + $0xbf4] sm:$0xf0]  ;;  %v13901_v40 = vpop.f32.mrf.mxu3  ;;  %v8018_v49 = vor.u32 %v9838_v39, %v8017_v37  ;;  %v9810_v37 = vld [vmem:[%s15280_s7 + $0x258] sm:$0xf0] }
 0x2e1   :  { %5898 = vmatpush.bf16.msrb.mxu3 %v8826_v33  ;;  %v7737_v33 = vld [vmem:[%s15280_s7 + $0xf0] sm:$0xf]  ;;  %v9134_v44 = vor.u32 %v10114_v21, %v9131_v23  ;;  %v10107_v46 = vld [vmem:[%s15280_s7 + $0xba4] sm:$0xf]  ;;  %v9019_v21 = vld [vmem:[%s15280_s7 + $0xb14] sm:$0xf0] }
 0x2e2   :  { %5884 = vmatpush.bf16.msrb.mxu2 %v8630_v52  ;;  %v9213_v52 = vld [vmem:[%s15280_s7 + $0xc80] sm:$0xf]  ;;  %v7738_v48 = vor.u32 %v9768_v32, %v7737_v33  ;;  %v9740_v33 = vld [vmem:[%s15280_s7 + $0x28] sm:$0xf0] }
 0x2e3   :  { %v9214_v27 = vor.u32 %v10138_v53, %v9213_v52  ;;  %v9831_v52 = vld [vmem:[%s15280_s7 + $0x300] sm:$0xf0]  ;;  %v7905_v32 = vld [vmem:[%s15280_s7 + $0x240] sm:$0xf] }
 0x2e4   :  { %5860 = vmatpush.bf16.msrb.mxu0 %v8126_v47  ;;  %5821 = vmatpush.bf16.msra.mxu1 %v9242_v43  ;;  %v9103_v47 = vld [vmem:[%s15280_s7 + $0xbbc] sm:$0xf0]  ;;  %v9939_v43 = vld [vmem:[%s15280_s7 + $0x664] sm:$0xf] }
 0x2e5   :  { %5899 = vmatpush.bf16.msrb.mxu3 %v8798_v50  ;;  %v7989_v50 = vld [vmem:[%s15280_s7 + $0x2e8] sm:$0xf]  ;;  %v9106_v53 = vor.u32 %v10107_v46, %v9103_v47  ;;  %v8717_v46 = vld [vmem:[%s15280_s7 + $0x898] sm:$0xf]  ;;  %v10013_v47 = vld [vmem:[%s15280_s7 + $0x8b0] sm:$0xf0] }
 0x2e6   :  { %5885 = vmatpush.bf16.msrb.mxu2 %v8602_v42  ;;  %v9848_v42 = vld [vmem:[%s15280_s7 + $0x38c] sm:$0xf] }
 0x2e7   :  { %v8070_v12 = vor.u32 %v9848_v42, %v8067_v1  ;;  %v9824_v42 = vld [vmem:[%s15280_s7 + $0x2c8] sm:$0xf0] }
 0x2e8   :  { %5861 = vmatpush.bf16.msrb.mxu0 %v8098_v31  ;;  %5822 = vmatpush.bf16.msra.mxu1 %v9214_v27  ;;  %v7990_v31 = vor.u32 %v9831_v52, %v7989_v50  ;;  %v7961_v27 = vld [vmem:[%s15280_s7 + $0x2b0] sm:$0xf]  ;;  %v5645_v3 = vpop.f32.mrf.mxu3  ;;  %v9911_v50 = vld [vmem:[%s15280_s7 + $0x584] sm:$0xf]  ;;  %v8319_v52 = vld [vmem:[%s15280_s7 + $0x59c] sm:$0xf0] }
 0x2e9   :  { %5900 = vmatpush.bf16.msrb.mxu3 %v8770_v4  ;;  %v9078_v4 = vor.u32 %v10100_v57, %v9075_v59  ;;  %v7962_v9 = vor.u32 %v9824_v42, %v7961_v27  ;;  %v9803_v57 = vld [vmem:[%s15280_s7 + $0x220] sm:$0xf0]  ;;  %v8689_v59 = vld [vmem:[%s15280_s7 + $0x860] sm:$0xf]  ;;  %v8322_v63 = vor.u32 %v9911_v50, %v8319_v52  ;;  %v8963_v27 = vld [vmem:[%s15280_s7 + $0xaa4] sm:$0xf0] }
 0x2ea   :  { %5886 = vmatpush.bf16.msrb.mxu2 %v8574_v13  ;;  %v9775_v13 = vld [vmem:[%s15280_s7 + $0x140] sm:$0xf0]  ;;  %v13954_v1 = vpop.f32.mrf.mxu0  ;;  %v7849_v42 = vld [vmem:[%s15280_s7 + $0x1d0] sm:$0xf]  ;;  %v9796_v3 = vld [vmem:[%s15280_s7 + $0x1e8] sm:$0xf0] }
 0x2eb   :  { %v7766_v24 = vor.u32 %v9775_v13, %v7765_v10  ;;  %v9925_v10 = vld [vmem:[%s15280_s7 + $0x5f4] sm:$0xf]  ;;  %v7653_v13 = vld [vmem:[%s15280_s7 + $0x48] sm:$0xf]  ;;  %v9327_v50 = vld [vmem:[%s15280_s7 + $0xd7c] sm:$0xf0] }
 0x2ec   :  { %5862 = vmatpush.bf16.msrb.mxu0 %v8070_v12  ;;  %5823 = vmatpush.bf16.msra.mxu1 %v9186_v17  ;;  %v8375_v12 = vld [vmem:[%s15280_s7 + $0x60c] sm:$0xf0]  ;;  %v9817_v17 = vld [vmem:[%s15280_s7 + $0x290] sm:$0xf0]  ;;  %v7654_v23 = vor.u32 %v9747_v16, %v7653_v13  ;;  %v8966_v13 = vor.u32 %v10072_v0, %v8963_v27  ;;  %v9999_v16 = vld [vmem:[%s15280_s7 + $0x840] sm:$0xf0] }
 0x2ed   :  { %5901 = vmatpush.bf16.msrb.mxu3 %v8742_v19  ;;  %v8378_v19 = vor.u32 %v9925_v10, %v8375_v12  ;;  %v8661_v10 = vld [vmem:[%s15280_s7 + $0x828] sm:$0xf]  ;;  %v8605_v52 = vld [vmem:[%s15280_s7 + $0x7b8] sm:$0xf] }
 0x2ee   :  { %5887 = vmatpush.bf16.msrb.mxu2 %v8546_v28  ;;  %v8459_v28 = vld [vmem:[%s15280_s7 + $0x6b4] sm:$0xf0] }
 0x2ef   :  { %v8462_v58 = vor.u32 %v9946_v25, %v8459_v28  ;;  %5824 = vmatmul.bf16.vlgmr.msra.gmra.mxu1 %v13283_v56  ;;  %5863 = vmatmul.bf16.vlgmr.msrb.gmra.mxu0 %v12674_v55  ;;  %v8347_v25 = vld [vmem:[%s15280_s7 + $0x5d4] sm:$0xf0]  ;;  %v7625_v28 = vld [vmem:[%s15280_s7 + $0x10] sm:$0xf] }
 0x2f0   :  { %5907 = vmatpush.bf16.msra.mxu0 %v9162_v18  ;;  %5868 = vmatpush.bf16.msrb.mxu1 %v8490_v20  ;;  %v10086_v20 = vld [vmem:[%s15280_s7 + $0xafc] sm:$0xf] }
 0x2f1   :  { %5946 = vmatpush.bf16.msra.mxu3 %v8046_v22  ;;  %v9918_v22 = vld [vmem:[%s15280_s7 + $0x5bc] sm:$0xf] }
 0x2f2   :  { %5888 = vmatpush.bf16.msrb.mxu2 %v8518_v15  ;;  %v9761_v15 = vld [vmem:[%s15280_s7 + $0xd0] sm:$0xf0]  ;;  %5902 = vmatmul.bf16.vlgmr.msrb.gmra.mxu3 %v12958_v38  ;;  %v5606_v39 = vpop.f32.mrf.mxu0 }
 0x2f3   :  { %v7710_v60 = vor.u32 %v9761_v15, %v7709_v36  ;;  %v7626_v36 = vor.u32 %v9740_v33, %v7625_v28  ;;  %v7906_v15 = vor.u32 %v9810_v37, %v7905_v32  ;;  %v10170_v33 = vld [vmem:[%s15280_s7 + $0xd9c] sm:$0xf]  ;;  %v9355_v32 = vld [vmem:[%s15280_s7 + $0xdb4] sm:$0xf0]  ;;  %v8633_v37 = vld [vmem:[%s15280_s7 + $0x7f0] sm:$0xf] }
 0x2f4   :  { %5908 = vmatpush.bf16.msra.mxu0 %v9134_v44  ;;  %5869 = vmatpush.bf16.msrb.mxu1 %v8462_v58  ;;  %v9022_v58 = vor.u32 %v10086_v20, %v9019_v21  ;;  %v7850_v21 = vor.u32 %v9796_v3, %v7849_v42  ;;  %v9992_v39 = vld [vmem:[%s15280_s7 + $0x808] sm:$0xf0]  ;;  %v8577_v3 = vld [vmem:[%s15280_s7 + $0x780] sm:$0xf] }
 0x2f5   :  { %5889 = vmatmul.bf16.vlgmr.msrb.gmra.mxu2 %v12762_v26  ;;  %5947 = vmatpush.bf16.msra.mxu3 %v8018_v49  ;;  %v8350_v49 = vor.u32 %v9918_v22, %v8347_v25  ;;  %v9894_v22 = vld [vmem:[%s15280_s7 + $0x4f8] sm:$0xf0]  ;;  %v8662_v25 = vor.u32 %v9999_v16, %v8661_v10  ;;  %v10156_v42 = vld [vmem:[%s15280_s7 + $0xd2c] sm:$0xf]  ;;  %v9873_v16 = vld [vmem:[%s15280_s7 + $0x450] sm:$0xf0] }
 0x2f6   :  { %5933 = vmatpush.bf16.msra.mxu2 %v7822_v54  ;;  %v8434_v54 = vor.u32 %v9939_v43, %v8431_v5  ;;  %v10079_v43 = vld [vmem:[%s15280_s7 + $0xac4] sm:$0xf]  ;;  %v8991_v5 = vld [vmem:[%s15280_s7 + $0xadc] sm:$0xf0] }
 0x2f8   :  { %5909 = vmatpush.bf16.msra.mxu0 %v9106_v53  ;;  %v13956_v2 = vpop.f32.mrf.mxu2  ;;  %5870 = vmatpush.bf16.msrb.mxu1 %v8434_v54  ;;  %v8718_v53 = vor.u32 %v10013_v47, %v8717_v46  ;;  %v7877_v54 = vld [vmem:[%s15280_s7 + $0x208] sm:$0xf]  ;;  %v9358_v47 = vor.u32 %v10170_v33, %v9355_v32 }
 0x2f9   :  { %5948 = vmatpush.bf16.msra.mxu3 %v7990_v31  ;;  %v10006_v31 = vld [vmem:[%s15280_s7 + $0x878] sm:$0xf0] }
 0x2fa   :  { %5934 = vmatpush.bf16.msra.mxu2 %v7794_v6  ;;  %v9047_v6 = vld [vmem:[%s15280_s7 + $0xb4c] sm:$0xf0]  ;;  %v14071_v12 = vpop.f32.mrf.mxu0 }
 0x2fb   :  { %v9050_v18 = vor.u32 %v10093_v7, %v9047_v6  ;;  %v9901_v7 = vld [vmem:[%s15280_s7 + $0x530] sm:$0xf0]  ;;  %v8690_v6 = vor.u32 %v10006_v31, %v8689_v59  ;;  %v10055_v59 = vld [vmem:[%s15280_s7 + $0xa00] sm:$0xf0] }
 0x2fc   :  { %5910 = vmatpush.bf16.msra.mxu0 %v9078_v4  ;;  %5871 = vmatpush.bf16.msrb.mxu1 %v8406_v51  ;;  %v7878_v4 = vor.u32 %v9803_v57, %v7877_v54  ;;  %v8269_v51 = vld [vmem:[%s15280_s7 + $0x518] sm:$0xf]  ;;  %v9985_v54 = vld [vmem:[%s15280_s7 + $0x7d0] sm:$0xf0]  ;;  %v8885_v57 = vld [vmem:[%s15280_s7 + $0x9e8] sm:$0xf] }
 0x2fd   :  { %5949 = vmatpush.bf16.msra.mxu3 %v7962_v9  ;;  %v9383_v9 = vld [vmem:[%s15280_s7 + $0xdec] sm:$0xf0]  ;;  %v8270_v20 = vor.u32 %v9901_v7, %v8269_v51  ;;  %v8606_v0 = vor.u32 %v9985_v54, %v8605_v52  ;;  %v8886_v27 = vor.u32 %v10055_v59, %v8885_v57  ;;  %v10048_v51 = vld [vmem:[%s15280_s7 + $0x9c8] sm:$0xf0]  ;;  %v9786_v52 = vld [vmem:[%s15280_s7 + $0x19c] sm:$0xf] }
 0x2fe   :  { %5935 = vmatpush.bf16.msra.mxu2 %v7766_v24  ;;  %v7934_v24 = vor.u32 %v9817_v17, %v7933_v11  ;;  %v8941_v11 = vld [vmem:[%s15280_s7 + $0xa58] sm:$0xf]  ;;  %v10069_v17 = vld [vmem:[%s15280_s7 + $0xa70] sm:$0xf0] }
 0x2ff   :  { %v8942_v28 = vor.u32 %v10069_v17, %v8941_v11 }
 0x300   :  { %5911 = vmatpush.bf16.msra.mxu0 %v9050_v18  ;;  %v5684_v44 = vpop.f32.mrf.mxu2  ;;  %5872 = vmatpush.bf16.msrb.mxu1 %v8378_v19  ;;  %v8294_v19 = vor.u32 %v9904_v34, %v8291_v61  ;;  %v8185_v34 = vld [vmem:[%s15280_s7 + $0x470] sm:$0xf]  ;;  %v9880_v61 = vld [vmem:[%s15280_s7 + $0x488] sm:$0xf0] }
 0x301   :  { %5950 = vmatpush.bf16.msra.mxu3 %v7934_v24  ;;  %v8241_v24 = vld [vmem:[%s15280_s7 + $0x4e0] sm:$0xf] }
 0x302   :  { %5936 = vmatpush.bf16.msra.mxu2 %v7738_v48  ;;  %v14012_v48 = vpop.f32.mrf.mxu3  ;;  %v8913_v44 = vld [vmem:[%s15280_s7 + $0xa20] sm:$0xf]  ;;  %v8242_v46 = vor.u32 %v9894_v22, %v8241_v24  ;;  %v8829_v24 = vld [vmem:[%s15280_s7 + $0x978] sm:$0xf]  ;;  %v10041_v22 = vld [vmem:[%s15280_s7 + $0x990] sm:$0xf0] }
 0x304   :  { %5912 = vmatpush.bf16.msra.mxu0 %v9022_v58  ;;  %5873 = vmatpush.bf16.msrb.mxu1 %v8350_v49  ;;  %v10062_v58 = vld [vmem:[%s15280_s7 + $0xa38] sm:$0xf0]  ;;  %v8213_v49 = vld [vmem:[%s15280_s7 + $0x4a8] sm:$0xf] }
 0x305   :  { %5951 = vmatpush.bf16.msra.mxu3 %v7906_v15  ;;  %v10163_v15 = vld [vmem:[%s15280_s7 + $0xd64] sm:$0xf] }
 0x306   :  { %5937 = vmatpush.bf16.msra.mxu2 %v7710_v60  ;;  %v8994_v60 = vor.u32 %v10079_v43, %v8991_v5  ;;  %v9887_v43 = vld [vmem:[%s15280_s7 + $0x4c0] sm:$0xf0]  ;;  %v8634_v5 = vor.u32 %v9992_v39, %v8633_v37  ;;  %v9330_v31 = vor.u32 %v10163_v15, %v9327_v50  ;;  %v8129_v37 = vld [vmem:[%s15280_s7 + $0x400] sm:$0xf]  ;;  %v9866_v39 = vld [vmem:[%s15280_s7 + $0x418] sm:$0xf0] }
 0x307   :  { %v8130_v50 = vor.u32 %v9866_v39, %v8129_v37  ;;  %v7767_v39 = vld [vmem:[%s15280_s7 + $0x144] sm:$0xf0] }
 0x308   :  { %5913 = vmatpush.bf16.msra.mxu0 %v8994_v60  ;;  %5874 = vmatpush.bf16.msrb.mxu1 %v8322_v63  ;;  %v8214_v60 = vor.u32 %v9887_v43, %v8213_v49  ;;  %v5592_v63 = vadd.f32 %v13778_v29, %v13578_v45  ;;  %v9978_v45 = vld [vmem:[%s15280_s7 + $0x798] sm:$0xf0]  ;;  %v8857_v29 = vld [vmem:[%s15280_s7 + $0x9b0] sm:$0xf]  ;;  %v9964_v43 = vld [vmem:[%s15280_s7 + $0x728] sm:$0xf0] }
 0x309   :  { %5952 = vmatpush.bf16.msra.mxu3 %v7878_v4  ;;  %v9299_v4 = vld [vmem:[%s15280_s7 + $0xd44] sm:$0xf0]  ;;  %v8578_v17 = vor.u32 %v9978_v45, %v8577_v3  ;;  %v8521_v49 = vld [vmem:[%s15280_s7 + $0x710] sm:$0xf] }
 0x30a   :  { %5938 = vmatpush.bf16.msra.mxu2 %v7682_v30  ;;  %v10177_v30 = vld [vmem:[%s15280_s7 + $0xdd4] sm:$0xf]  ;;  %v5697_v18 = vpop.f32.mrf.mxu3  ;;  %v5605_v7 = vadd.f32 %v13954_v1, %v5592_v63  ;;  %v9302_v10 = vor.u32 %v10156_v42, %v9299_v4  ;;  %v10135_v42 = vld [vmem:[%s15280_s7 + $0xc84] sm:$0xf]  ;;  %v9215_v4 = vld [vmem:[%s15280_s7 + $0xc9c] sm:$0xf0] }
 0x30b   :  { %v8858_v18 = vor.u32 %v10048_v51, %v8857_v29  ;;  %v10149_v1 = vld [vmem:[%s15280_s7 + $0xcf4] sm:$0xf]  ;;  %v8773_v51 = vld [vmem:[%s15280_s7 + $0x908] sm:$0xf] }
 0x30c   :  { %5914 = vmatpush.bf16.msra.mxu0 %v8966_v13  ;;  %5875 = vmatpush.bf16.msrb.mxu1 %v8294_v19  ;;  %v8157_v13 = vld [vmem:[%s15280_s7 + $0x438] sm:$0xf]  ;;  %v9271_v19 = vld [vmem:[%s15280_s7 + $0xd0c] sm:$0xf0] }
 0x30d   :  { %5953 = vmatpush.bf16.msra.mxu3 %v7850_v21  ;;  %v9274_v32 = vor.u32 %v10149_v1, %v9271_v19 }
 0x30e   :  { %5939 = vmatpush.bf16.msra.mxu2 %v7654_v23  ;;  %v9386_v23 = vor.u32 %v10177_v30, %v9383_v9  ;;  %v8186_v30 = vor.u32 %v9880_v61, %v8185_v34  ;;  %v5617_v9 = vpop.f32.mrf.mxu1 }
 0x30f   :  { %5876 = vmatmul.bf16.vlgmr.msrb.gmra.mxu1 %v12652_v41  ;;  %5915 = vmatmul.bf16.vlgmr.msra.gmra.mxu0 %v13126_v14  ;;  %v5618_v11 = vadd.f32 %v5617_v9, %v5605_v7  ;;  %v10027_v7 = vld [vmem:[%s15280_s7 + $0x920] sm:$0xf0]  ;;  %v7795_v9 = vld [vmem:[%s15280_s7 + $0x17c] sm:$0xf0] }
 0x310   :  { %5959 = vmatpush.bf16.msrb.mxu0 %v8270_v20  ;;  %5920 = vmatpush.bf16.msra.mxu1 %v9386_v23  ;;  %v8549_v20 = vld [vmem:[%s15280_s7 + $0x748] sm:$0xf]  ;;  %v9971_v23 = vld [vmem:[%s15280_s7 + $0x760] sm:$0xf0]  ;;  %v8774_v19 = vor.u32 %v10027_v7, %v8773_v51  ;;  %v9758_v51 = vld [vmem:[%s15280_s7 + $0xbc] sm:$0xf] }
 0x311   :  { %5998 = vmatpush.bf16.msrb.mxu3 %v8942_v28  ;;  %10183 = vtanh.f32 %v5618_v11  ;;  %v14190_v28 = vld [vmem:[%s15281_s8] sm:$0xff]  ;;  %v8073_v11 = vld [vmem:[%s15280_s7 + $0x390] sm:$0xf] }
 0x312   :  { %5940 = vmatpush.bf16.msra.mxu2 %v7626_v36  ;;  %v8914_v36 = vor.u32 %v10062_v58, %v8913_v44  ;;  %5954 = vmatmul.bf16.vlgmr.msra.gmra.mxu3 %v12533_v35  ;;  %v3201_v33 = vperm.slane %v14190_v28, 2  ;;  %v8550_v44 = vor.u32 %v9971_v23, %v8549_v20  ;;  %v8830_v58 = vor.u32 %v10041_v22, %v8829_v24  ;;  %v5747_v63 = vpop.f32.mrf.mxu3  ;;  %v10020_v20 = vld [vmem:[%s15280_s7 + $0x8e8] sm:$0xf0]  ;;  %v9165_v23 = vld [vmem:[%s15280_s7 + $0xc18] sm:$0xf] }
 0x313   :  { %v3200_v61 = vperm.slane %v14190_v28, 1  ;;  %v10125_v24 = vld [vmem:[%s15280_s7 + $0xc30] sm:$0xf0] }
 0x314   :  { %5960 = vmatpush.bf16.msrb.mxu0 %v8242_v46  ;;  %5921 = vmatpush.bf16.msra.mxu1 %v9358_v47  ;;  %v10142_v46 = vld [vmem:[%s15280_s7 + $0xcbc] sm:$0xf]  ;;  %v9243_v47 = vld [vmem:[%s15280_s7 + $0xcd4] sm:$0xf0] }
 0x315   :  { %5941 = vmatmul.bf16.vlgmr.msra.gmra.mxu2 %v12572_v62  ;;  %5999 = vmatpush.bf16.msrb.mxu3 %v8914_v36  ;;  %v10034_v36 = vld [vmem:[%s15280_s7 + $0x958] sm:$0xf0]  ;;  %v9246_v59 = vor.u32 %v10142_v46, %v9243_v47  ;;  %v5631_v1 = vadd.f32 %v13752_v8, %v3200_v61  ;;  %v8493_v8 = vld [vmem:[%s15280_s7 + $0x6d8] sm:$0xf] }
 0x316   :  { %5985 = vmatpush.bf16.msrb.mxu2 %v8718_v53  ;;  %v5658_v53 = vpop.f32.mrf.mxu0  ;;  %v5619_v57 = vpop.f32.mrf.mxu1 }
 0x317   :  { %v7823_v53 = vld [vmem:[%s15280_s7 + $0x1b4] sm:$0xf0]  ;;  %v10184_v34 = vpop.eup %10183  ;;  %v9765_v57 = vld [vmem:[%s15280_s7 + $0xf4] sm:$0xf] }
 0x318   :  { %5961 = vmatpush.bf16.msrb.mxu0 %v8214_v60  ;;  %5922 = vmatpush.bf16.msra.mxu1 %v9330_v31  ;;  %v8101_v60 = vld [vmem:[%s15280_s7 + $0x3c8] sm:$0xf]  ;;  %v9859_v31 = vld [vmem:[%s15280_s7 + $0x3e0] sm:$0xf0]  ;;  %6252 = vst [vmem:[%s15282_s9] sm:$0xff] %v10184_v34  ;;  %v7826_v29 = vor.u32 %v9786_v52, %v7823_v53  ;;  %v8019_v34 = vld [vmem:[%s15280_s7 + $0x33c] sm:$0xf0] }
 0x319   :  { %6000 = vmatpush.bf16.msrb.mxu3 %v8886_v27 }
 0x31a   :  { %5986 = vmatpush.bf16.msrb.mxu2 %v8690_v6  ;;  %v5734_v6 = vpop.f32.mrf.mxu2 }
 0x31b   :  { %v5735_v54 = vadd.f32 %v5734_v6, %v3201_v33  ;;  %v9779_v6 = vld [vmem:[%s15280_s7 + $0x164] sm:$0xf]  ;;  %v9772_v33 = vld [vmem:[%s15280_s7 + $0x12c] sm:$0xf] }
 0x31c   :  { %5962 = vmatpush.bf16.msrb.mxu0 %v8186_v30  ;;  %5923 = vmatpush.bf16.msra.mxu1 %v9302_v10  ;;  %v8102_v30 = vor.u32 %v9859_v31, %v8101_v60  ;;  %v10128_v10 = vld [vmem:[%s15280_s7 + $0xc4c] sm:$0xf]  ;;  %v7798_v22 = vor.u32 %v9779_v6, %v7795_v9  ;;  %v7770_v52 = vor.u32 %v9772_v33, %v7767_v39  ;;  %v7739_v60 = vld [vmem:[%s15280_s7 + $0x10c] sm:$0xf0]  ;;  %v9835_v31 = vld [vmem:[%s15280_s7 + $0x324] sm:$0xf] }
 0x31d   :  { %6001 = vmatpush.bf16.msrb.mxu3 %v8858_v18  ;;  %v14239_v3 = vadd.f32 %v5747_v63, %v5735_v54  ;;  %v8745_v18 = vld [vmem:[%s15280_s7 + $0x8d0] sm:$0xf]  ;;  %v8465_v54 = vld [vmem:[%s15280_s7 + $0x6a0] sm:$0xf]  ;;  %v7711_v6 = vld [vmem:[%s15280_s7 + $0xd4] sm:$0xf0] }
 0x31e   :  { %5987 = vmatpush.bf16.msrb.mxu2 %v8662_v25  ;;  %v14176_v21 = vpop.f32.mrf.mxu0  ;;  %v8158_v25 = vor.u32 %v9873_v16, %v8157_v13  ;;  %v9187_v13 = vld [vmem:[%s15280_s7 + $0xc64] sm:$0xf0]  ;;  %v9218_v16 = vor.u32 %v10135_v42, %v9215_v4  ;;  %v5669_v46 = vpop.f32.mrf.mxu1  ;;  %v7742_v42 = vor.u32 %v9765_v57, %v7739_v60  ;;  %v8022_v4 = vor.u32 %v9835_v31, %v8019_v34  ;;  %v9922_v60 = vld [vmem:[%s15280_s7 + $0x5d8] sm:$0xf0]  ;;  %v9737_v31 = vld [vmem:[%s15280_s7 + $0x14] sm:$0xf] }
 0x31f   :  { %v9190_v47 = vor.u32 %v10128_v10, %v9187_v13  ;;  %v7991_v9 = vld [vmem:[%s15280_s7 + $0x304] sm:$0xf0]  ;;  %v7627_v34 = vld [vmem:[%s15280_s7 + $0x2c] sm:$0xf0] }
 0x320   :  { %5963 = vmatpush.bf16.msrb.mxu0 %v8158_v25  ;;  %5924 = vmatpush.bf16.msra.mxu1 %v9274_v32  ;;  %v9957_v25 = vld [vmem:[%s15280_s7 + $0x6f0] sm:$0xf0]  ;;  %v5644_v32 = vadd.f32 %v13901_v40, %v5631_v1  ;;  %v9166_v40 = vor.u32 %v10125_v24, %v9165_v23  ;;  %v8409_v1 = vld [vmem:[%s15280_s7 + $0x630] sm:$0xf]  ;;  %v7683_v24 = vld [vmem:[%s15280_s7 + $0x9c] sm:$0xf0] }
 0x321   :  { %6002 = vmatpush.bf16.msrb.mxu3 %v8830_v58  ;;  %v8047_v58 = vld [vmem:[%s15280_s7 + $0x374] sm:$0xf0] }
 0x322   :  { %5988 = vmatpush.bf16.msrb.mxu2 %v8634_v5  ;;  %v8801_v5 = vld [vmem:[%s15280_s7 + $0x940] sm:$0xf]  ;;  %v5736_v15 = vpop.f32.mrf.mxu2 }
 0x323   :  { %v8802_v27 = vor.u32 %v10034_v36, %v8801_v5  ;;  %v8746_v5 = vor.u32 %v10020_v20, %v8745_v18  ;;  %v8494_v36 = vor.u32 %v9957_v25, %v8493_v8  ;;  %v9137_v15 = vld [vmem:[%s15280_s7 + $0xbe0] sm:$0xf]  ;;  %v9751_v20 = vld [vmem:[%s15280_s7 + $0x84] sm:$0xf]  ;;  %v7963_v8 = vld [vmem:[%s15280_s7 + $0x2cc] sm:$0xf0] }
 0x324   :  { %5964 = vmatpush.bf16.msrb.mxu0 %v8130_v50  ;;  %5925 = vmatpush.bf16.msra.mxu1 %v9246_v59  ;;  %v10118_v50 = vld [vmem:[%s15280_s7 + $0xbf8] sm:$0xf0]  ;;  %v7686_v39 = vor.u32 %v9751_v20, %v7683_v24  ;;  %v8297_v20 = vld [vmem:[%s15280_s7 + $0x550] sm:$0xf] }
 0x325   :  { %6003 = vmatpush.bf16.msrb.mxu3 %v8802_v27  ;;  %v9138_v61 = vor.u32 %v10118_v50, %v9137_v15  ;;  %v10111_v27 = vld [vmem:[%s15280_s7 + $0xbc0] sm:$0xf0]  ;;  %v8969_v24 = vld [vmem:[%s15280_s7 + $0xa90] sm:$0xf] }
 0x326   :  { %5989 = vmatpush.bf16.msrb.mxu2 %v8606_v0  ;;  %v8522_v0 = vor.u32 %v9964_v43, %v8521_v49  ;;  %v5710_v45 = vpop.f32.mrf.mxu0  ;;  %v5657_v49 = vadd.f32 %v14071_v12, %v5644_v32  ;;  %v5749_v43 = vpop.f32.mrf.mxu3  ;;  %v9950_v12 = vld [vmem:[%s15280_s7 + $0x6b8] sm:$0xf0]  ;;  %v10097_v32 = vld [vmem:[%s15280_s7 + $0xb50] sm:$0xf0] }
 0x327   :  { %v8466_v63 = vor.u32 %v9950_v12, %v8465_v54  ;;  %v8437_v45 = vld [vmem:[%s15280_s7 + $0x668] sm:$0xf]  ;;  %v5671_v10 = vpop.f32.mrf.mxu1  ;;  %v9814_v43 = vld [vmem:[%s15280_s7 + $0x27c] sm:$0xf] }
 0x328   :  { %5965 = vmatpush.bf16.msrb.mxu0 %v8102_v30  ;;  %5926 = vmatpush.bf16.msra.mxu1 %v9218_v16  ;;  %v5670_v59 = vadd.f32 %v5669_v46, %v5657_v49  ;;  %v9828_v30 = vld [vmem:[%s15280_s7 + $0x2ec] sm:$0xf]  ;;  %v9081_v16 = vld [vmem:[%s15280_s7 + $0xb70] sm:$0xf]  ;;  %v9929_v46 = vld [vmem:[%s15280_s7 + $0x610] sm:$0xf0] }
 0x329   :  { %6004 = vmatpush.bf16.msrb.mxu3 %v8774_v19  ;;  %v7994_v18 = vor.u32 %v9828_v30, %v7991_v9  ;;  %v9936_v19 = vld [vmem:[%s15280_s7 + $0x648] sm:$0xf0]  ;;  %v7655_v49 = vld [vmem:[%s15280_s7 + $0x64] sm:$0xf0]  ;;  %v10090_v54 = vld [vmem:[%s15280_s7 + $0xb18] sm:$0xf0] }
 0x32a   :  { %5990 = vmatpush.bf16.msrb.mxu2 %v8578_v17  ;;  %v9852_v17 = vld [vmem:[%s15280_s7 + $0x3a8] sm:$0xf0]  ;;  %v5683_v7 = vadd.f32 %v13956_v2, %v5670_v59  ;;  %v8410_v33 = vor.u32 %v9936_v19, %v8409_v1  ;;  %v8353_v59 = vld [vmem:[%s15280_s7 + $0x5c0] sm:$0xf]  ;;  %v8325_v30 = vld [vmem:[%s15280_s7 + $0x588] sm:$0xf] }
 0x32b   :  { %v8074_v37 = vor.u32 %v9852_v17, %v8073_v11  ;;  %v10104_v11 = vld [vmem:[%s15280_s7 + $0xb88] sm:$0xf0]  ;;  %v7714_v17 = vor.u32 %v9758_v51, %v7711_v6  ;;  %v9915_v9 = vld [vmem:[%s15280_s7 + $0x5a0] sm:$0xf0] }
 0x32c   :  { %5927 = vmatpush.bf16.msra.mxu1 %v9190_v47  ;;  %v5696_v23 = vadd.f32 %v14012_v48, %v5683_v7  ;;  %v9082_v25 = vor.u32 %v10104_v11, %v9081_v16  ;;  %v9053_v48 = vld [vmem:[%s15280_s7 + $0xb38] sm:$0xf]  ;;  %v9744_v47 = vld [vmem:[%s15280_s7 + $0x4c] sm:$0xf]  ;;  %v7630_v7 = vor.u32 %v9737_v31, %v7627_v34  ;;  %v7879_v16 = vld [vmem:[%s15280_s7 + $0x224] sm:$0xf0] }
 0x32d   :  { %5966 = vmatpush.bf16.msrb.mxu0 %v8074_v37  ;;  %6005 = vmatpush.bf16.msrb.mxu3 %v8746_v5  ;;  %v7935_v5 = vld [vmem:[%s15280_s7 + $0x294] sm:$0xf0]  ;;  %v9054_v50 = vor.u32 %v10097_v32, %v9053_v48  ;;  %v7658_v12 = vor.u32 %v9744_v47, %v7655_v49  ;;  %v9800_v10 = vld [vmem:[%s15280_s7 + $0x20c] sm:$0xf]  ;;  %v10003_v11 = vld [vmem:[%s15280_s7 + $0x864] sm:$0xf] }
 0x32e   :  { %5991 = vmatpush.bf16.msrb.mxu2 %v8550_v44  ;;  %v9842_v44 = vld [vmem:[%s15280_s7 + $0x35c] sm:$0xf]  ;;  %v7938_v57 = vor.u32 %v9814_v43, %v7935_v5  ;;  %v7851_v48 = vld [vmem:[%s15280_s7 + $0x1ec] sm:$0xf0]  ;;  %v7882_v32 = vor.u32 %v9800_v10, %v7879_v16  ;;  %v10181_v47 = vld [vmem:[%s15280_s7 + $0xdf0] sm:$0xf0] }
 0x32f   :  { %v8050_v53 = vor.u32 %v9842_v44, %v8047_v58  ;;  %5928 = vmatmul.bf16.vlgmr.msra.gmra.mxu1 %v13283_v56  ;;  %v8381_v58 = vld [vmem:[%s15280_s7 + $0x5f8] sm:$0xf]  ;;  %v5721_v15 = vpop.f32.mrf.mxu1  ;;  %v8663_v43 = vld [vmem:[%s15280_s7 + $0x844] sm:$0xf0]  ;;  %v10066_v5 = vld [vmem:[%s15280_s7 + $0xa5c] sm:$0xf] }
 0x330   :  { %5972 = vmatpush.bf16.msrb.mxu1 %v8494_v36  ;;  %5967 = vmatmul.bf16.vlgmr.msrb.gmra.mxu0 %v12674_v55  ;;  %v14403_v36 = vpop.f32.mrf.mxu0  ;;  %v9361_v31 = vld [vmem:[%s15280_s7 + $0xda0] sm:$0xf]  ;;  %v10174_v34 = vld [vmem:[%s15280_s7 + $0xdb8] sm:$0xf0]  ;;  %v8607_v10 = vld [vmem:[%s15280_s7 + $0x7d4] sm:$0xf0] }
 0x331   :  { %6011 = vmatpush.bf16.msra.mxu0 %v9166_v40  ;;  %6050 = vmatpush.bf16.msra.mxu3 %v8050_v53  ;;  %v5709_v40 = vadd.f32 %v14176_v21, %v5696_v23  ;;  %v8382_v21 = vor.u32 %v9929_v46, %v8381_v58  ;;  %v9025_v53 = vld [vmem:[%s15280_s7 + $0xb00] sm:$0xf]  ;;  %v9908_v23 = vld [vmem:[%s15280_s7 + $0x568] sm:$0xf0]  ;;  %v9389_v46 = vld [vmem:[%s15280_s7 + $0xdd8] sm:$0xf] }
 0x332   :  { %5992 = vmatpush.bf16.msrb.mxu2 %v8522_v0  ;;  %v9109_v0 = vld [vmem:[%s15280_s7 + $0xba8] sm:$0xf]  ;;  %6006 = vmatmul.bf16.vlgmr.msrb.gmra.mxu3 %v12958_v38 }
 0x333   :  { %v9110_v2 = vor.u32 %v10111_v27, %v9109_v0  ;;  %v9026_v0 = vor.u32 %v10090_v54, %v9025_v53  ;;  %v10010_v27 = vld [vmem:[%s15280_s7 + $0x89c] sm:$0xf]  ;;  %v9390_v53 = vor.u32 %v10181_v47, %v9389_v46  ;;  %v9891_v54 = vld [vmem:[%s15280_s7 + $0x4e4] sm:$0xf]  ;;  %v8887_v16 = vld [vmem:[%s15280_s7 + $0xa04] sm:$0xf0] }
 0x334   :  { %5973 = vmatpush.bf16.msrb.mxu1 %v8466_v63  ;;  %v7907_v63 = vld [vmem:[%s15280_s7 + $0x25c] sm:$0xf0]  ;;  %v9277_v47 = vld [vmem:[%s15280_s7 + $0xcf8] sm:$0xf] }
 0x335   :  { %5993 = vmatmul.bf16.vlgmr.msrb.gmra.mxu2 %v12762_v26  ;;  %6012 = vmatpush.bf16.msra.mxu0 %v9138_v61  ;;  %v9807_v61 = vld [vmem:[%s15280_s7 + $0x244] sm:$0xf] }
 0x336   :  { %6037 = vmatpush.bf16.msra.mxu2 %v7826_v29  ;;  %v9943_v29 = vld [vmem:[%s15280_s7 + $0x680] sm:$0xf0]  ;;  %6051 = vmatpush.bf16.msra.mxu3 %v8022_v4  ;;  %v8354_v4 = vor.u32 %v9922_v60, %v8353_v59  ;;  %v7910_v6 = vor.u32 %v9807_v61, %v7907_v63  ;;  %v9989_v61 = vld [vmem:[%s15280_s7 + $0x7f4] sm:$0xf]  ;;  %v8635_v63 = vld [vmem:[%s15280_s7 + $0x80c] sm:$0xf0] }
 0x337   :  { %v8438_v13 = vor.u32 %v9943_v29, %v8437_v45  ;;  %v8997_v45 = vld [vmem:[%s15280_s7 + $0xac8] sm:$0xf]  ;;  %v10083_v29 = vld [vmem:[%s15280_s7 + $0xae0] sm:$0xf0]  ;;  %v5723_v1 = vpop.f32.mrf.mxu1 }
 0x338   :  { %v14382_v37 = vpop.f32.mrf.mxu2  ;;  %v8998_v19 = vor.u32 %v10083_v29, %v8997_v45  ;;  %v9884_v45 = vld [vmem:[%s15280_s7 + $0x4ac] sm:$0xf]  ;;  %v8215_v29 = vld [vmem:[%s15280_s7 + $0x4c4] sm:$0xf0]  ;;  %v8187_v1 = vld [vmem:[%s15280_s7 + $0x48c] sm:$0xf0] }
 0x339   :  { %6013 = vmatpush.bf16.msra.mxu0 %v9110_v2  ;;  %5974 = vmatpush.bf16.msrb.mxu1 %v8438_v13  ;;  %v14450_v2 = vpop.f32.mrf.mxu3 }
 0x33a   :  { %6038 = vmatpush.bf16.msra.mxu2 %v7798_v22  ;;  %v9821_v22 = vld [vmem:[%s15280_s7 + $0x2b4] sm:$0xf]  ;;  %6052 = vmatpush.bf16.msra.mxu3 %v7994_v18  ;;  %v5762_v18 = vpop.f32.mrf.mxu0 }
 0x33b   :  { %v7966_v44 = vor.u32 %v9821_v22, %v7963_v8  ;;  %v8326_v8 = vor.u32 %v9915_v9, %v8325_v30  ;;  %v10167_v30 = vld [vmem:[%s15280_s7 + $0xd80] sm:$0xf0]  ;;  %v9982_v9 = vld [vmem:[%s15280_s7 + $0x7bc] sm:$0xf]  ;;  %v9877_v18 = vld [vmem:[%s15280_s7 + $0x474] sm:$0xf] }
 0x33d   :  { %6014 = vmatpush.bf16.msra.mxu0 %v9082_v25  ;;  %5975 = vmatpush.bf16.msrb.mxu1 %v8410_v33  ;;  %v10076_v25 = vld [vmem:[%s15280_s7 + $0xaa8] sm:$0xf0]  ;;  %v9793_v33 = vld [vmem:[%s15280_s7 + $0x1d4] sm:$0xf] }
 0x33e   :  { %6039 = vmatpush.bf16.msra.mxu2 %v7770_v52  ;;  %v5722_v52 = vadd.f32 %v5721_v15, %v5709_v40  ;;  %6053 = vmatpush.bf16.msra.mxu3 %v7966_v44  ;;  %v8271_v44 = vld [vmem:[%s15280_s7 + $0x534] sm:$0xf0]  ;;  %v9996_v40 = vld [vmem:[%s15280_s7 + $0x82c] sm:$0xf]  ;;  %v8970_v49 = vor.u32 %v10076_v25, %v8969_v24  ;;  %v10045_v25 = vld [vmem:[%s15280_s7 + $0x9b4] sm:$0xf] }
 0x33f   :  { %v8943_v15 = vld [vmem:[%s15280_s7 + $0xa74] sm:$0xf0]  ;;  %v8666_v59 = vor.u32 %v9996_v40, %v8663_v43  ;;  %v10160_v24 = vld [vmem:[%s15280_s7 + $0xd48] sm:$0xf0]  ;;  %v10153_v40 = vld [vmem:[%s15280_s7 + $0xd10] sm:$0xf0] }
 0x340   :  { %10185 = vtanh.f32 %v5722_v52  ;;  %v5788_v51 = vpop.f32.mrf.mxu2  ;;  %v8946_v60 = vor.u32 %v10066_v5, %v8943_v15  ;;  %v8551_v5 = vld [vmem:[%s15280_s7 + $0x764] sm:$0xf0]  ;;  %v10038_v15 = vld [vmem:[%s15280_s7 + $0x97c] sm:$0xf] }
 0x341   :  { %6015 = vmatpush.bf16.msra.mxu0 %v9054_v50  ;;  %5976 = vmatpush.bf16.msrb.mxu1 %v8382_v21  ;;  %v8298_v50 = vor.u32 %v9908_v23, %v8297_v20  ;;  %v7854_v21 = vor.u32 %v9793_v33, %v7851_v48  ;;  %v8638_v51 = vor.u32 %v9989_v61, %v8635_v63  ;;  %v9305_v23 = vld [vmem:[%s15280_s7 + $0xd30] sm:$0xf]  ;;  %v9961_v61 = vld [vmem:[%s15280_s7 + $0x714] sm:$0xf] }
 0x342   :  { %6040 = vmatpush.bf16.msra.mxu2 %v7742_v42  ;;  %v8719_v42 = vld [vmem:[%s15280_s7 + $0x8b4] sm:$0xf0]  ;;  %6054 = vmatpush.bf16.msra.mxu3 %v7938_v57  ;;  %v5801_v57 = vpop.f32.mrf.mxu3  ;;  %v8859_v33 = vld [vmem:[%s15280_s7 + $0x9cc] sm:$0xf0]  ;;  %v8190_v48 = vor.u32 %v9877_v18, %v8187_v1  ;;  %v10024_v18 = vld [vmem:[%s15280_s7 + $0x90c] sm:$0xf] }
 0x343   :  { %v8722_v13 = vor.u32 %v10010_v27, %v8719_v42  ;;  %v8915_v27 = vld [vmem:[%s15280_s7 + $0xa3c] sm:$0xf0]  ;;  %v8862_v46 = vor.u32 %v10045_v25, %v8859_v33  ;;  %v9863_v57 = vld [vmem:[%s15280_s7 + $0x404] sm:$0xf]  ;;  %v8523_v63 = vld [vmem:[%s15280_s7 + $0x72c] sm:$0xf0] }
 0x344   :  { %v8775_v1 = vld [vmem:[%s15280_s7 + $0x924] sm:$0xf0]  ;;  %v9193_v25 = vld [vmem:[%s15280_s7 + $0xc50] sm:$0xf]  ;;  %v10132_v33 = vld [vmem:[%s15280_s7 + $0xc68] sm:$0xf0] }
 0x345   :  { %6016 = vmatpush.bf16.msra.mxu0 %v9026_v0  ;;  %5977 = vmatpush.bf16.msrb.mxu1 %v8354_v4  ;;  %v10059_v0 = vld [vmem:[%s15280_s7 + $0xa24] sm:$0xf]  ;;  %v9362_v4 = vor.u32 %v10174_v34, %v9361_v31  ;;  %v9249_v34 = vld [vmem:[%s15280_s7 + $0xcc0] sm:$0xf] }
 0x346   :  { %6041 = vmatpush.bf16.msra.mxu2 %v7714_v17  ;;  %v8691_v17 = vld [vmem:[%s15280_s7 + $0x87c] sm:$0xf0]  ;;  %v10186_v22 = vpop.eup %10185  ;;  %6055 = vmatpush.bf16.msra.mxu3 %v7910_v6  ;;  %v9333_v6 = vld [vmem:[%s15280_s7 + $0xd68] sm:$0xf] }
 0x347   :  { %6253 = vst [vmem:[%s15282_s9 + $0x8] sm:$0xff] %v10186_v22  ;;  %v8694_v58 = vor.u32 %v10003_v11, %v8691_v17  ;;  %v8218_v11 = vor.u32 %v9884_v45, %v8215_v29  ;;  %v9334_v17 = vor.u32 %v10167_v30, %v9333_v6  ;;  %v9975_v22 = vld [vmem:[%s15280_s7 + $0x784] sm:$0xf]  ;;  %v9790_v45 = vld [vmem:[%s15280_s7 + $0x1b8] sm:$0xf0]  ;;  %v8526_v30 = vor.u32 %v9961_v61, %v8523_v63 }
 0x348   :  { %v9139_v61 = vld [vmem:[%s15280_s7 + $0xbfc] sm:$0xf0] }
 0x349   :  { %6017 = vmatpush.bf16.msra.mxu0 %v8998_v19  ;;  %5978 = vmatpush.bf16.msrb.mxu1 %v8326_v8  ;;  %v8610_v19 = vor.u32 %v9982_v9, %v8607_v10  ;;  %v8579_v8 = vld [vmem:[%s15280_s7 + $0x79c] sm:$0xf0]  ;;  %v9221_v10 = vld [vmem:[%s15280_s7 + $0xc88] sm:$0xf] }
 0x34a   :  { %6042 = vmatpush.bf16.msra.mxu2 %v7686_v39  ;;  %v9898_v39 = vld [vmem:[%s15280_s7 + $0x51c] sm:$0xf]  ;;  %6056 = vmatpush.bf16.msra.mxu3 %v7882_v32  ;;  %v9306_v32 = vor.u32 %v10160_v24, %v9305_v23 }
 0x34b   :  { %v8274_v52 = vor.u32 %v9898_v39, %v8271_v44  ;;  %v9870_v39 = vld [vmem:[%s15280_s7 + $0x43c] sm:$0xf]  ;;  %v8159_v44 = vld [vmem:[%s15280_s7 + $0x454] sm:$0xf0] }
 0x34d   :  { %6018 = vmatpush.bf16.msra.mxu0 %v8970_v49  ;;  %5979 = vmatpush.bf16.msrb.mxu1 %v8298_v50  ;;  %v9968_v49 = vld [vmem:[%s15280_s7 + $0x74c] sm:$0xf]  ;;  %v8831_v50 = vld [vmem:[%s15280_s7 + $0x994] sm:$0xf0] }
 0x34e   :  { %6043 = vmatpush.bf16.msra.mxu2 %v7658_v12  ;;  %v8243_v12 = vld [vmem:[%s15280_s7 + $0x4fc] sm:$0xf0]  ;;  %6057 = vmatpush.bf16.msra.mxu3 %v7854_v21  ;;  %v14608_v21 = vpop.f32.mrf.mxu0  ;;  %v8834_v31 = vor.u32 %v10038_v15, %v8831_v50  ;;  %v7773_v15 = vld [vmem:[%s15280_s7 + $0x130] sm:$0xf] }
 0x34f   :  { %v8246_v42 = vor.u32 %v9891_v54, %v8243_v12  ;;  %v3202_v54 = vperm.slane %v14190_v28, 3  ;;  %v9278_v12 = vor.u32 %v10153_v40, %v9277_v47  ;;  %v10146_v28 = vld [vmem:[%s15280_s7 + $0xcd8] sm:$0xf0]  ;;  %v9167_v40 = vld [vmem:[%s15280_s7 + $0xc34] sm:$0xf0] }
 0x350   :  { %5980 = vmatmul.bf16.vlgmr.msrb.gmra.mxu1 %v12652_v41  ;;  %6019 = vmatmul.bf16.vlgmr.msra.gmra.mxu0 %v13126_v14  ;;  %v9250_v29 = vor.u32 %v10146_v28, %v9249_v34  ;;  %v10122_v47 = vld [vmem:[%s15280_s7 + $0xc1c] sm:$0xf]  ;;  %v10115_v28 = vld [vmem:[%s15280_s7 + $0xbe4] sm:$0xf] }
 0x351   :  { %6063 = vmatpush.bf16.msrb.mxu0 %v8274_v52  ;;  %6024 = vmatpush.bf16.msra.mxu1 %v9390_v53  ;;  %v14606_v52 = vpop.f32.mrf.mxu1  ;;  %v8162_v53 = vor.u32 %v9870_v39, %v8159_v44  ;;  %v8075_v39 = vld [vmem:[%s15280_s7 + $0x3ac] sm:$0xf0]  ;;  %v10017_v44 = vld [vmem:[%s15280_s7 + $0x8d4] sm:$0xf] }
 0x352   :  { %6044 = vmatpush.bf16.msra.mxu2 %v7630_v7  ;;  %6102 = vmatpush.bf16.msrb.mxu3 %v8946_v60  ;;  %v8918_v7 = vor.u32 %v10059_v0, %v8915_v27  ;;  %v8554_v60 = vor.u32 %v9968_v49, %v8551_v5  ;;  %v10031_v0 = vld [vmem:[%s15280_s7 + $0x944] sm:$0xf]  ;;  %v8803_v27 = vld [vmem:[%s15280_s7 + $0x95c] sm:$0xf0]  ;;  %v8495_v5 = vld [vmem:[%s15280_s7 + $0x6f4] sm:$0xf0] }
 0x353   :  { %6058 = vmatmul.bf16.vlgmr.msra.gmra.mxu3 %v12533_v35  ;;  %v8806_v9 = vor.u32 %v10031_v0, %v8803_v27 }
 0x355   :  { %6045 = vmatmul.bf16.vlgmr.msra.gmra.mxu2 %v12572_v62  ;;  %6064 = vmatpush.bf16.msrb.mxu0 %v8246_v42 }
 0x356   :  { %6089 = vmatpush.bf16.msrb.mxu2 %v8722_v13  ;;  %v10052_v13 = vld [vmem:[%s15280_s7 + $0x9ec] sm:$0xf]  ;;  %6025 = vmatpush.bf16.msra.mxu1 %v9362_v4  ;;  %v7829_v4 = vld [vmem:[%s15280_s7 + $0x1a0] sm:$0xf]  ;;  %v5814_v24 = vpop.f32.mrf.mxu0 }
 0x357   :  { %6103 = vmatpush.bf16.msrb.mxu3 %v8918_v7  ;;  %v8890_v20 = vor.u32 %v10052_v13, %v8887_v16  ;;  %v8103_v7 = vld [vmem:[%s15280_s7 + $0x3e4] sm:$0xf0]  ;;  %v10139_v13 = vld [vmem:[%s15280_s7 + $0xca0] sm:$0xf0]  ;;  %v10101_v24 = vld [vmem:[%s15280_s7 + $0xb74] sm:$0xf] }
 0x358   :  { %v5838_v43 = vpop.f32.mrf.mxu2 }
 0x359   :  { %6065 = vmatpush.bf16.msrb.mxu0 %v8218_v11  ;;  %v5839_v6 = vadd.f32 %v5838_v43, %v3202_v54  ;;  %v5851_v11 = vpop.f32.mrf.mxu3  ;;  %v5775_v23 = vpop.f32.mrf.mxu1  ;;  %v9954_v43 = vld [vmem:[%s15280_s7 + $0x6dc] sm:$0xf]  ;;  %v8053_v54 = vld [vmem:[%s15280_s7 + $0x360] sm:$0xf] }
 0x35a   :  { %6090 = vmatpush.bf16.msrb.mxu2 %v8694_v58  ;;  %6026 = vmatpush.bf16.msra.mxu1 %v9334_v17  ;;  %v8582_v58 = vor.u32 %v9975_v22, %v8579_v8  ;;  %v7830_v17 = vor.u32 %v9790_v45, %v7829_v4  ;;  %v9783_v8 = vld [vmem:[%s15280_s7 + $0x180] sm:$0xf0]  ;;  %v8498_v34 = vor.u32 %v9954_v43, %v8495_v5  ;;  %v9769_v45 = vld [vmem:[%s15280_s7 + $0x110] sm:$0xf0] }
 0x35b   :  { %6104 = vmatpush.bf16.msrb.mxu3 %v8890_v20  ;;  %v14662_v20 = vadd.f32 %v5851_v11, %v5839_v6  ;;  %v7717_v11 = vld [vmem:[%s15280_s7 + $0xc0] sm:$0xf] }
 0x35d   :  { %6066 = vmatpush.bf16.msrb.mxu0 %v8190_v48  ;;  %v9222_v48 = vor.u32 %v10139_v13, %v9221_v10  ;;  %v9940_v13 = vld [vmem:[%s15280_s7 + $0x66c] sm:$0xf] }
 0x35e   :  { %6091 = vmatpush.bf16.msrb.mxu2 %v8666_v59  ;;  %6027 = vmatpush.bf16.msra.mxu1 %v9306_v32  ;;  %v8131_v59 = vld [vmem:[%s15280_s7 + $0x41c] sm:$0xf0]  ;;  %v9849_v32 = vld [vmem:[%s15280_s7 + $0x394] sm:$0xf] }
 0x35f   :  { %6105 = vmatpush.bf16.msrb.mxu3 %v8862_v46  ;;  %v8134_v42 = vor.u32 %v9863_v57, %v8131_v59  ;;  %v8747_v46 = vld [vmem:[%s15280_s7 + $0x8ec] sm:$0xf0]  ;;  %v8078_v50 = vor.u32 %v9849_v32, %v8075_v39  ;;  %v9194_v57 = vor.u32 %v10132_v33, %v9193_v25  ;;  %v9170_v59 = vor.u32 %v10122_v47, %v9167_v40  ;;  %v9933_v33 = vld [vmem:[%s15280_s7 + $0x634] sm:$0xf]  ;;  %v7689_v32 = vld [vmem:[%s15280_s7 + $0x88] sm:$0xf] }
 0x360   :  { %v5840_v16 = vpop.f32.mrf.mxu2 }
 0x361   :  { %6067 = vmatpush.bf16.msrb.mxu0 %v8162_v53  ;;  %v9776_v53 = vld [vmem:[%s15280_s7 + $0x148] sm:$0xf0]  ;;  %v5853_v63 = vpop.f32.mrf.mxu3  ;;  %v8439_v16 = vld [vmem:[%s15280_s7 + $0x684] sm:$0xf0] }
 0x362   :  { %6092 = vmatpush.bf16.msrb.mxu2 %v8638_v51  ;;  %6028 = vmatpush.bf16.msra.mxu1 %v9278_v12  ;;  %v9856_v51 = vld [vmem:[%s15280_s7 + $0x3cc] sm:$0xf]  ;;  %v9846_v12 = vld [vmem:[%s15280_s7 + $0x378] sm:$0xf0]  ;;  %v7774_v0 = vor.u32 %v9776_v53, %v7773_v15  ;;  %v8442_v23 = vor.u32 %v9940_v13, %v8439_v16  ;;  %v7661_v53 = vld [vmem:[%s15280_s7 + $0x50] sm:$0xf] }
 0x363   :  { %6106 = vmatpush.bf16.msrb.mxu3 %v8834_v31  ;;  %v8106_v22 = vor.u32 %v9856_v51, %v8103_v7  ;;  %v8750_v31 = vor.u32 %v10017_v44, %v8747_v46  ;;  %v8054_v27 = vor.u32 %v9846_v12, %v8053_v54  ;;  %v9839_v51 = vld [vmem:[%s15280_s7 + $0x340] sm:$0xf0]  ;;  %v9142_v7 = vor.u32 %v10115_v28, %v9139_v61  ;;  %v9825_v46 = vld [vmem:[%s15280_s7 + $0x2d0] sm:$0xf0]  ;;  %v9926_v15 = vld [vmem:[%s15280_s7 + $0x5fc] sm:$0xf] }
 0x364   :  { %v9755_v44 = vld [vmem:[%s15280_s7 + $0xa0] sm:$0xf0] }
 0x365   :  { %6068 = vmatpush.bf16.msrb.mxu0 %v8134_v42  ;;  %v9947_v42 = vld [vmem:[%s15280_s7 + $0x6a4] sm:$0xf]  ;;  %v7690_v43 = vor.u32 %v9755_v44, %v7689_v32  ;;  %v8299_v32 = vld [vmem:[%s15280_s7 + $0x56c] sm:$0xf0] }
 0x366   :  { %6093 = vmatpush.bf16.msrb.mxu2 %v8610_v19  ;;  %v7801_v19 = vld [vmem:[%s15280_s7 + $0x168] sm:$0xf]  ;;  %6029 = vmatpush.bf16.msra.mxu1 %v9250_v29  ;;  %v10087_v63 = vld [vmem:[%s15280_s7 + $0xb04] sm:$0xf] }
 0x367   :  { %6107 = vmatpush.bf16.msrb.mxu3 %v8806_v9  ;;  %v7802_v49 = vor.u32 %v9783_v8, %v7801_v19  ;;  %v8025_v29 = vld [vmem:[%s15280_s7 + $0x328] sm:$0xf]  ;;  %v9832_v19 = vld [vmem:[%s15280_s7 + $0x308] sm:$0xf0] }
 0x368   :  { %v8026_v10 = vor.u32 %v9839_v51, %v8025_v29  ;;  %v7913_v29 = vld [vmem:[%s15280_s7 + $0x248] sm:$0xf]  ;;  %v9811_v51 = vld [vmem:[%s15280_s7 + $0x260] sm:$0xf0] }
 0x369   :  { %6069 = vmatpush.bf16.msrb.mxu0 %v8106_v22  ;;  %v9083_v22 = vld [vmem:[%s15280_s7 + $0xb8c] sm:$0xf0]  ;;  %v7914_v16 = vor.u32 %v9811_v51, %v7913_v29  ;;  %v8921_v29 = vld [vmem:[%s15280_s7 + $0xa28] sm:$0xf]  ;;  %v10063_v51 = vld [vmem:[%s15280_s7 + $0xa40] sm:$0xf0] }
 0x36a   :  { %6094 = vmatpush.bf16.msrb.mxu2 %v8582_v58  ;;  %v8778_v58 = vor.u32 %v10024_v18, %v8775_v1  ;;  %6030 = vmatpush.bf16.msra.mxu1 %v9222_v48  ;;  %v9762_v18 = vld [vmem:[%s15280_s7 + $0xd8] sm:$0xf0]  ;;  %v7997_v1 = vld [vmem:[%s15280_s7 + $0x2f0] sm:$0xf]  ;;  %v9086_v47 = vor.u32 %v10101_v24, %v9083_v22  ;;  %v8697_v24 = vld [vmem:[%s15280_s7 + $0x868] sm:$0xf] }
 0x36b   :  { %v7718_v8 = vor.u32 %v9762_v18, %v7717_v11  ;;  %v7998_v25 = vor.u32 %v9832_v19, %v7997_v1  ;;  %v8411_v48 = vld [vmem:[%s15280_s7 + $0x64c] sm:$0xf0]  ;;  %v9912_v11 = vld [vmem:[%s15280_s7 + $0x58c] sm:$0xf]  ;;  %v10007_v22 = vld [vmem:[%s15280_s7 + $0x880] sm:$0xf0] }
 0x36c   :  { %6108 = vmatpush.bf16.msrb.mxu3 %v8778_v58  ;;  %v7969_v58 = vld [vmem:[%s15280_s7 + $0x2b8] sm:$0xf]  ;;  %v8414_v40 = vor.u32 %v9933_v33, %v8411_v48  ;;  %v7885_v18 = vld [vmem:[%s15280_s7 + $0x210] sm:$0xf]  ;;  %v9905_v48 = vld [vmem:[%s15280_s7 + $0x554] sm:$0xf] }
 0x36d   :  { %6070 = vmatpush.bf16.msrb.mxu0 %v8078_v50  ;;  %v7970_v5 = vor.u32 %v9825_v46, %v7969_v58  ;;  %v8383_v50 = vld [vmem:[%s15280_s7 + $0x614] sm:$0xf0]  ;;  %v8971_v46 = vld [vmem:[%s15280_s7 + $0xaac] sm:$0xf0] }
 0x36e   :  { %6095 = vmatpush.bf16.msrb.mxu2 %v8554_v60  ;;  %v5761_v60 = vadd.f32 %v14403_v36, %v14239_v3  ;;  %v8467_v3 = vld [vmem:[%s15280_s7 + $0x6bc] sm:$0xf0]  ;;  %v7745_v36 = vld [vmem:[%s15280_s7 + $0xf8] sm:$0xf]  ;;  %6031 = vmatpush.bf16.msra.mxu1 %v9194_v57  ;;  %v9748_v57 = vld [vmem:[%s15280_s7 + $0x68] sm:$0xf0]  ;;  %v8386_v61 = vor.u32 %v9926_v15, %v8383_v50 }
 0x36f   :  { %v8470_v6 = vor.u32 %v9947_v42, %v8467_v3  ;;  %v7746_v9 = vor.u32 %v9769_v45, %v7745_v36  ;;  %v9919_v3 = vld [vmem:[%s15280_s7 + $0x5c4] sm:$0xf]  ;;  %v8355_v36 = vld [vmem:[%s15280_s7 + $0x5dc] sm:$0xf0]  ;;  %v9741_v45 = vld [vmem:[%s15280_s7 + $0x30] sm:$0xf0] }
 0x370   :  { %v5774_v4 = vadd.f32 %v14606_v52, %v5761_v60  ;;  %6109 = vmatpush.bf16.msrb.mxu3 %v8750_v31  ;;  %v10108_v52 = vld [vmem:[%s15280_s7 + $0xbac] sm:$0xf]  ;;  %6071 = vmatmul.bf16.vlgmr.msrb.gmra.mxu0 %v12674_v55  ;;  %v9818_v60 = vld [vmem:[%s15280_s7 + $0x298] sm:$0xf0]  ;;  %v5825_v31 = vpop.f32.mrf.mxu1  ;;  %v9391_v50 = vld [vmem:[%s15280_s7 + $0xdf4] sm:$0xf0] }
 0x371   :  { %6115 = vmatpush.bf16.msra.mxu0 %v9170_v59  ;;  %6032 = vmatmul.bf16.vlgmr.msra.gmra.mxu1 %v13283_v56  ;;  %v7941_v59 = vld [vmem:[%s15280_s7 + $0x280] sm:$0xf]  ;;  %v10178_v15 = vld [vmem:[%s15280_s7 + $0xddc] sm:$0xf] }
 0x372   :  { %6096 = vmatpush.bf16.msrb.mxu2 %v8526_v30  ;;  %6076 = vmatpush.bf16.msrb.mxu1 %v8498_v34  ;;  %v9111_v30 = vld [vmem:[%s15280_s7 + $0xbc4] sm:$0xf0]  ;;  %v14817_v34 = vpop.f32.mrf.mxu0  ;;  %v7942_v42 = vor.u32 %v9818_v60, %v7941_v59  ;;  %v8949_v59 = vld [vmem:[%s15280_s7 + $0xa60] sm:$0xf]  ;;  %v10070_v60 = vld [vmem:[%s15280_s7 + $0xa78] sm:$0xf0] }
 0x373   :  { %6110 = vmatmul.bf16.vlgmr.msrb.gmra.mxu3 %v12958_v38 }
 0x374   :  { %6154 = vmatpush.bf16.msra.mxu3 %v8054_v27  ;;  %v7662_v27 = vor.u32 %v9748_v57, %v7661_v53  ;;  %v8669_v53 = vld [vmem:[%s15280_s7 + $0x830] sm:$0xf]  ;;  %v10000_v57 = vld [vmem:[%s15280_s7 + $0x848] sm:$0xf0] }
 0x375   :  { %6097 = vmatmul.bf16.vlgmr.msrb.gmra.mxu2 %v12762_v26  ;;  %6116 = vmatpush.bf16.msra.mxu0 %v9142_v7  ;;  %v14864_v19 = vpop.f32.mrf.mxu3 }
 0x376   :  { %6141 = vmatpush.bf16.msra.mxu2 %v7830_v17  ;;  %v5787_v17 = vadd.f32 %v14382_v37, %v5774_v4  ;;  %v9114_v37 = vor.u32 %v10108_v52, %v9111_v30  ;;  %6077 = vmatpush.bf16.msrb.mxu1 %v8470_v6  ;;  %v7633_v4 = vld [vmem:[%s15280_s7 + $0x18] sm:$0xf]  ;;  %v8725_v6 = vld [vmem:[%s15280_s7 + $0x8a0] sm:$0xf]  ;;  %v10014_v52 = vld [vmem:[%s15280_s7 + $0x8b8] sm:$0xf0]  ;;  %v8358_v30 = vor.u32 %v9919_v3, %v8355_v36 }
 0x377   :  { %v7634_v13 = vor.u32 %v9741_v45, %v7633_v4  ;;  %v8950_v3 = vor.u32 %v10070_v60, %v8949_v59  ;;  %v9363_v36 = vld [vmem:[%s15280_s7 + $0xdbc] sm:$0xf0]  ;;  %v8641_v4 = vld [vmem:[%s15280_s7 + $0x7f8] sm:$0xf]  ;;  %v9993_v45 = vld [vmem:[%s15280_s7 + $0x810] sm:$0xf0] }
 0x378   :  { %6155 = vmatpush.bf16.msra.mxu3 %v8026_v10  ;;  %v5800_v39 = vadd.f32 %v14450_v2, %v5787_v17  ;;  %v10094_v2 = vld [vmem:[%s15280_s7 + $0xb3c] sm:$0xf]  ;;  %v14806_v12 = vpop.f32.mrf.mxu2  ;;  %v8999_v10 = vld [vmem:[%s15280_s7 + $0xae4] sm:$0xf0] }
 0x379   :  { %6117 = vmatpush.bf16.msra.mxu0 %v9114_v37  ;;  %v8327_v17 = vld [vmem:[%s15280_s7 + $0x5a4] sm:$0xf0]  ;;  %v8726_v37 = vor.u32 %v10014_v52, %v8725_v6  ;;  %v8221_v52 = vld [vmem:[%s15280_s7 + $0x4b0] sm:$0xf] }
 0x37a   :  { %6142 = vmatpush.bf16.msra.mxu2 %v7802_v49  ;;  %6078 = vmatpush.bf16.msrb.mxu1 %v8442_v23  ;;  %v9055_v49 = vld [vmem:[%s15280_s7 + $0xb54] sm:$0xf0]  ;;  %v5813_v54 = vadd.f32 %v14608_v21, %v5800_v39  ;;  %v9804_v23 = vld [vmem:[%s15280_s7 + $0x228] sm:$0xf0]  ;;  %v10073_v39 = vld [vmem:[%s15280_s7 + $0xa94] sm:$0xf]  ;;  %v8330_v58 = vor.u32 %v9912_v11, %v8327_v17 }
 0x37b   :  { %v9058_v28 = vor.u32 %v10094_v2, %v9055_v49  ;;  %v7886_v2 = vor.u32 %v9804_v23, %v7885_v18  ;;  %v8277_v49 = vld [vmem:[%s15280_s7 + $0x520] sm:$0xf]  ;;  %v9986_v17 = vld [vmem:[%s15280_s7 + $0x7d8] sm:$0xf0]  ;;  %v8893_v18 = vld [vmem:[%s15280_s7 + $0x9f0] sm:$0xf] }
 0x37c   :  { %6156 = vmatpush.bf16.msra.mxu3 %v7998_v25  ;;  %v5826_v21 = vadd.f32 %v5825_v31, %v5813_v54  ;;  %v5866_v25 = vpop.f32.mrf.mxu0  ;;  %v8974_v54 = vor.u32 %v10073_v39, %v8971_v46  ;;  %v8302_v31 = vor.u32 %v9905_v48, %v8299_v32  ;;  %v8613_v11 = vld [vmem:[%s15280_s7 + $0x7c0] sm:$0xf]  ;;  %v8585_v48 = vld [vmem:[%s15280_s7 + $0x788] sm:$0xf]  ;;  %v9979_v32 = vld [vmem:[%s15280_s7 + $0x7a0] sm:$0xf0] }
 0x37d   :  { %6118 = vmatpush.bf16.msra.mxu0 %v9086_v47  ;;  %v7857_v47 = vld [vmem:[%s15280_s7 + $0x1d8] sm:$0xf] }
 0x37e   :  { %6143 = vmatpush.bf16.msra.mxu2 %v7774_v0  ;;  %6079 = vmatpush.bf16.msrb.mxu1 %v8414_v40  ;;  %v9027_v0 = vld [vmem:[%s15280_s7 + $0xb1c] sm:$0xf0]  ;;  %10187 = vtanh.f32 %v5826_v21  ;;  %v9797_v40 = vld [vmem:[%s15280_s7 + $0x1f0] sm:$0xf0]  ;;  %v8865_v39 = vld [vmem:[%s15280_s7 + $0x9b8] sm:$0xf] }
 0x37f   :  { %v9030_v7 = vor.u32 %v10087_v63, %v9027_v0  ;;  %v7858_v21 = vor.u32 %v9797_v40, %v7857_v47  ;;  %v8249_v63 = vld [vmem:[%s15280_s7 + $0x4e8] sm:$0xf]  ;;  %v9895_v0 = vld [vmem:[%s15280_s7 + $0x500] sm:$0xf0]  ;;  %v8165_v47 = vld [vmem:[%s15280_s7 + $0x440] sm:$0xf] }
 0x380   :  { %6157 = vmatpush.bf16.msra.mxu3 %v7970_v5  ;;  %v5892_v1 = vpop.f32.mrf.mxu2  ;;  %v8698_v5 = vor.u32 %v10007_v22, %v8697_v24  ;;  %v8193_v24 = vld [vmem:[%s15280_s7 + $0x478] sm:$0xf]  ;;  %v9881_v22 = vld [vmem:[%s15280_s7 + $0x490] sm:$0xf0]  ;;  %v9874_v40 = vld [vmem:[%s15280_s7 + $0x458] sm:$0xf0] }
 0x381   :  { %6119 = vmatpush.bf16.msra.mxu0 %v9058_v28  ;;  %v10056_v1 = vld [vmem:[%s15280_s7 + $0xa08] sm:$0xf0] }
 0x382   :  { %6144 = vmatpush.bf16.msra.mxu2 %v7746_v9  ;;  %6080 = vmatpush.bf16.msrb.mxu1 %v8386_v61  ;;  %v10080_v9 = vld [vmem:[%s15280_s7 + $0xacc] sm:$0xf]  ;;  %v9394_v61 = vor.u32 %v10178_v15, %v9391_v50  ;;  %v8894_v25 = vor.u32 %v10056_v1, %v8893_v18  ;;  %v8557_v15 = vld [vmem:[%s15280_s7 + $0x750] sm:$0xf] }
 0x383   :  { %v9002_v33 = vor.u32 %v10080_v9, %v8999_v10  ;;  %v8642_v9 = vor.u32 %v9993_v45, %v8641_v4  ;;  %v8922_v10 = vor.u32 %v10063_v51, %v8921_v29  ;;  %v9965_v4 = vld [vmem:[%s15280_s7 + $0x730] sm:$0xf0]  ;;  %v8809_v45 = vld [vmem:[%s15280_s7 + $0x948] sm:$0xf]  ;;  %v10035_v29 = vld [vmem:[%s15280_s7 + $0x960] sm:$0xf0] }
 0x384   :  { %6158 = vmatpush.bf16.msra.mxu3 %v7942_v42  ;;  %v10188_v44 = vpop.eup %10187  ;;  %v8670_v42 = vor.u32 %v10000_v57, %v8669_v53  ;;  %v9972_v53 = vld [vmem:[%s15280_s7 + $0x768] sm:$0xf0]  ;;  %v10042_v57 = vld [vmem:[%s15280_s7 + $0x998] sm:$0xf0]  ;;  %v8781_v18 = vld [vmem:[%s15280_s7 + $0x910] sm:$0xf] }
 0x385   :  { %6120 = vmatpush.bf16.msra.mxu0 %v9030_v7  ;;  %6254 = vst [vmem:[%s15282_s9 + $0x10] sm:$0xff] %v10188_v44  ;;  %v8250_v7 = vor.u32 %v9895_v0, %v8249_v63  ;;  %v10049_v44 = vld [vmem:[%s15280_s7 + $0x9d0] sm:$0xf0]  ;;  %v8137_v63 = vld [vmem:[%s15280_s7 + $0x408] sm:$0xf] }
 0x386   :  { %6145 = vmatpush.bf16.msra.mxu2 %v7718_v8  ;;  %v5827_v8 = vpop.f32.mrf.mxu1  ;;  %6081 = vmatpush.bf16.msrb.mxu1 %v8358_v30  ;;  %v9888_v30 = vld [vmem:[%s15280_s7 + $0x4c8] sm:$0xf0]  ;;  %v9867_v0 = vld [vmem:[%s15280_s7 + $0x420] sm:$0xf0] }
 0x387   :  { %v8614_v8 = vor.u32 %v9986_v17, %v8613_v11  ;;  %v8138_v51 = vor.u32 %v9867_v0, %v8137_v63  ;;  %v10028_v1 = vld [vmem:[%s15280_s7 + $0x928] sm:$0xf0] }
 0x388   :  { %6159 = vmatpush.bf16.msra.mxu3 %v7914_v16  ;;  %v9335_v16 = vld [vmem:[%s15280_s7 + $0xd84] sm:$0xf0]  ;;  %v10112_v63 = vld [vmem:[%s15280_s7 + $0xbc8] sm:$0xf0] }
 0x389   :  { %6121 = vmatpush.bf16.msra.mxu0 %v9002_v33  ;;  %v9307_v33 = vld [vmem:[%s15280_s7 + $0xd4c] sm:$0xf0]  ;;  %v9944_v0 = vld [vmem:[%s15280_s7 + $0x688] sm:$0xf0] }
 0x38a   :  { %6146 = vmatpush.bf16.msra.mxu2 %v7690_v43  ;;  %v9902_v43 = vld [vmem:[%s15280_s7 + $0x538] sm:$0xf0]  ;;  %6082 = vmatpush.bf16.msrb.mxu1 %v8330_v58  ;;  %v8194_v58 = vor.u32 %v9881_v22, %v8193_v24 }
 0x38b   :  { %v8278_v28 = vor.u32 %v9902_v43, %v8277_v49  ;;  %v8866_v49 = vor.u32 %v10049_v44, %v8865_v39  ;;  %v10150_v43 = vld [vmem:[%s15280_s7 + $0xcfc] sm:$0xf]  ;;  %v8753_v39 = vld [vmem:[%s15280_s7 + $0x8d8] sm:$0xf]  ;;  %v9173_v44 = vld [vmem:[%s15280_s7 + $0xc20] sm:$0xf] }
 0x38c   :  { %6160 = vmatpush.bf16.msra.mxu3 %v7886_v2  ;;  %v8586_v2 = vor.u32 %v9979_v32, %v8585_v48  ;;  %v15022_v60 = vpop.f32.mrf.mxu0  ;;  %v9853_v48 = vld [vmem:[%s15280_s7 + $0x3b0] sm:$0xf0]  ;;  %v8782_v32 = vor.u32 %v10028_v1, %v8781_v18  ;;  %v9923_v18 = vld [vmem:[%s15280_s7 + $0x5e0] sm:$0xf0] }
 0x38d   :  { %6122 = vmatpush.bf16.msra.mxu0 %v8974_v54  ;;  %v8837_v54 = vld [vmem:[%s15280_s7 + $0x980] sm:$0xf] }
 0x38e   :  { %6147 = vmatpush.bf16.msra.mxu2 %v7662_v27  ;;  %v5905_v27 = vpop.f32.mrf.mxu3  ;;  %6083 = vmatpush.bf16.msrb.mxu1 %v8302_v31  ;;  %v15020_v59 = vpop.f32.mrf.mxu1  ;;  %v8166_v31 = vor.u32 %v9874_v40, %v8165_v47  ;;  %v8501_v47 = vld [vmem:[%s15280_s7 + $0x6e0] sm:$0xf]  ;;  %v9958_v40 = vld [vmem:[%s15280_s7 + $0x6f8] sm:$0xf0] }
 0x38f   :  { %v8558_v27 = vor.u32 %v9972_v53, %v8557_v15  ;;  %v9145_v53 = vld [vmem:[%s15280_s7 + $0xbe8] sm:$0xf] }
 0x390   :  { %6161 = vmatpush.bf16.msra.mxu3 %v7858_v21  ;;  %6123 = vmatmul.bf16.vlgmr.msra.gmra.mxu0 %v13126_v14 }
 0x391   :  { %6167 = vmatpush.bf16.msrb.mxu0 %v8278_v28  ;;  %6084 = vmatmul.bf16.vlgmr.msrb.gmra.mxu1 %v12652_v41  ;;  %v15027_v28 = vld [vmem:[%s15281_s8] sm:$0xff] }
 0x392   :  { %6148 = vmatpush.bf16.msra.mxu2 %v7634_v13  ;;  %6128 = vmatpush.bf16.msra.mxu1 %v9394_v61  ;;  %v10164_v13 = vld [vmem:[%s15280_s7 + $0xd6c] sm:$0xf]  ;;  %v3203_v21 = vperm.slane %v15027_v28, 4 }
 0x393   :  { %6162 = vmatmul.bf16.vlgmr.msra.gmra.mxu3 %v12533_v35  ;;  %v9338_v23 = vor.u32 %v10164_v13, %v9335_v16  ;;  %v10157_v35 = vld [vmem:[%s15280_s7 + $0xd34] sm:$0xf]  ;;  %v10136_v13 = vld [vmem:[%s15280_s7 + $0xc8c] sm:$0xf]  ;;  %v9223_v16 = vld [vmem:[%s15280_s7 + $0xca4] sm:$0xf0] }
 0x394   :  { %6206 = vmatpush.bf16.msrb.mxu3 %v8950_v3  ;;  %v9310_v46 = vor.u32 %v10157_v35, %v9307_v33  ;;  %v10143_v3 = vld [vmem:[%s15280_s7 + $0xcc4] sm:$0xf]  ;;  %v5918_v24 = vpop.f32.mrf.mxu0  ;;  %v9195_v35 = vld [vmem:[%s15280_s7 + $0xc6c] sm:$0xf0]  ;;  %v8081_v33 = vld [vmem:[%s15280_s7 + $0x398] sm:$0xf] }
 0x395   :  { %6149 = vmatmul.bf16.vlgmr.msra.gmra.mxu2 %v12572_v62  ;;  %v10171_v62 = vld [vmem:[%s15280_s7 + $0xda4] sm:$0xf]  ;;  %6168 = vmatpush.bf16.msrb.mxu0 %v8250_v7  ;;  %v9005_v24 = vld [vmem:[%s15280_s7 + $0xad0] sm:$0xf] }
 0x396   :  { %6193 = vmatpush.bf16.msrb.mxu2 %v8726_v37  ;;  %v9366_v6 = vor.u32 %v10171_v62, %v9363_v36  ;;  %v8222_v37 = vor.u32 %v9888_v30, %v8221_v52  ;;  %v9251_v62 = vld [vmem:[%s15280_s7 + $0xcdc] sm:$0xf0]  ;;  %v8529_v36 = vld [vmem:[%s15280_s7 + $0x718] sm:$0xf]  ;;  %v9860_v52 = vld [vmem:[%s15280_s7 + $0x3e8] sm:$0xf0]  ;;  %v5955_v17 = vpop.f32.mrf.mxu3 }
 0x397   :  { %v9254_v7 = vor.u32 %v10143_v3, %v9251_v62  ;;  %v10105_v62 = vld [vmem:[%s15280_s7 + $0xb90] sm:$0xf0] }
 0x398   :  { %6129 = vmatpush.bf16.msra.mxu1 %v9366_v6  ;;  %6207 = vmatpush.bf16.msrb.mxu3 %v8922_v10  ;;  %v5942_v50 = vpop.f32.mrf.mxu2  ;;  %v8109_v6 = vld [vmem:[%s15280_s7 + $0x3d0] sm:$0xf]  ;;  %v8810_v10 = vor.u32 %v10035_v29, %v8809_v45  ;;  %v9061_v29 = vld [vmem:[%s15280_s7 + $0xb40] sm:$0xf] }
 0x399   :  { %6169 = vmatpush.bf16.msrb.mxu0 %v8222_v37  ;;  %v5943_v30 = vadd.f32 %v5942_v50, %v3203_v21  ;;  %v8110_v22 = vor.u32 %v9860_v52, %v8109_v6  ;;  %v8502_v50 = vor.u32 %v9958_v40, %v8501_v47  ;;  %v10077_v47 = vld [vmem:[%s15280_s7 + $0xab0] sm:$0xf0]  ;;  %v8305_v40 = vld [vmem:[%s15280_s7 + $0x558] sm:$0xf] }
 0x39a   :  { %6194 = vmatpush.bf16.msrb.mxu2 %v8698_v5  ;;  %v9279_v5 = vld [vmem:[%s15280_s7 + $0xd14] sm:$0xf0] }
 0x39b   :  { %v9282_v61 = vor.u32 %v10150_v43, %v9279_v5  ;;  %v15072_v37 = vadd.f32 %v5955_v17, %v5943_v30  ;;  %v5865_v5 = vadd.f32 %v14817_v34, %v14662_v20  ;;  %v9951_v20 = vld [vmem:[%s15280_s7 + $0x6c0] sm:$0xf0] }
 0x39c   :  { %6130 = vmatpush.bf16.msra.mxu1 %v9338_v23  ;;  %6208 = vmatpush.bf16.msrb.mxu3 %v8894_v25  ;;  %v5879_v23 = vpop.f32.mrf.mxu1  ;;  %v9226_v25 = vor.u32 %v10136_v13, %v9223_v16  ;;  %v10091_v17 = vld [vmem:[%s15280_s7 + $0xb20] sm:$0xf0] }
 0x39d   :  { %6170 = vmatpush.bf16.msrb.mxu0 %v8194_v58  ;;  %v10126_v58 = vld [vmem:[%s15280_s7 + $0xc38] sm:$0xf0]  ;;  %v5878_v34 = vadd.f32 %v15020_v59, %v5865_v5  ;;  %v8445_v59 = vld [vmem:[%s15280_s7 + $0x670] sm:$0xf] }
 0x39e   :  { %6195 = vmatpush.bf16.msrb.mxu2 %v8670_v42  ;;  %v8838_v42 = vor.u32 %v10042_v57, %v8837_v54  ;;  %v9174_v43 = vor.u32 %v10126_v58, %v9173_v44  ;;  %v10119_v54 = vld [vmem:[%s15280_s7 + $0xc00] sm:$0xf0]  ;;  %v5957_v57 = vpop.f32.mrf.mxu3  ;;  %v8446_v3 = vor.u32 %v9944_v0, %v8445_v59 }
 0x39f   :  { %v10175_v57 = vld [vmem:[%s15280_s7 + $0xdc0] sm:$0xf0] }
 0x3a0   :  { %6131 = vmatpush.bf16.msra.mxu1 %v9310_v46  ;;  %6209 = vmatpush.bf16.msrb.mxu3 %v8866_v49  ;;  %v5944_v11 = vpop.f32.mrf.mxu2  ;;  %v10021_v46 = vld [vmem:[%s15280_s7 + $0x8f0] sm:$0xf0] }
 0x3a1   :  { %6171 = vmatpush.bf16.msrb.mxu0 %v8166_v31  ;;  %v8754_v15 = vor.u32 %v10021_v46, %v8753_v39  ;;  %v9146_v31 = vor.u32 %v10119_v54, %v9145_v53  ;;  %v9033_v11 = vld [vmem:[%s15280_s7 + $0xb08] sm:$0xf]  ;;  %v8977_v46 = vld [vmem:[%s15280_s7 + $0xa98] sm:$0xf] }
 0x3a2   :  { %6196 = vmatpush.bf16.msrb.mxu2 %v8642_v9  ;;  %v8530_v9 = vor.u32 %v9965_v4, %v8529_v36  ;;  %v9034_v1 = vor.u32 %v10091_v17, %v9033_v11  ;;  %v8978_v5 = vor.u32 %v10077_v47, %v8977_v46  ;;  %v9369_v54 = vld [vmem:[%s15280_s7 + $0xda8] sm:$0xf] }
 0x3a4   :  { %6132 = vmatpush.bf16.msra.mxu1 %v9282_v61  ;;  %6210 = vmatpush.bf16.msrb.mxu3 %v8838_v42  ;;  %v9117_v61 = vld [vmem:[%s15280_s7 + $0xbb0] sm:$0xf] }
 0x3a5   :  { %6172 = vmatpush.bf16.msrb.mxu0 %v8138_v51  ;;  %v9118_v42 = vor.u32 %v10112_v63, %v9117_v61  ;;  %v10098_v51 = vld [vmem:[%s15280_s7 + $0xb58] sm:$0xf0]  ;;  %v9285_v63 = vld [vmem:[%s15280_s7 + $0xd00] sm:$0xf] }
 0x3a6   :  { %6197 = vmatpush.bf16.msrb.mxu2 %v8614_v8  ;;  %v10129_v8 = vld [vmem:[%s15280_s7 + $0xc54] sm:$0xf] }
 0x3a7   :  { %v9198_v49 = vor.u32 %v10129_v8, %v9195_v35  ;;  %v8333_v8 = vld [vmem:[%s15280_s7 + $0x590] sm:$0xf] }
 0x3a8   :  { %6133 = vmatpush.bf16.msra.mxu1 %v9254_v7  ;;  %6211 = vmatpush.bf16.msrb.mxu3 %v8810_v10  ;;  %v8389_v7 = vld [vmem:[%s15280_s7 + $0x600] sm:$0xf]  ;;  %v9062_v10 = vor.u32 %v10098_v51, %v9061_v29 }
 0x3a9   :  { %6173 = vmatpush.bf16.msrb.mxu0 %v8110_v22  ;;  %v10084_v22 = vld [vmem:[%s15280_s7 + $0xae8] sm:$0xf0] }
 0x3aa   :  { %6198 = vmatpush.bf16.msrb.mxu2 %v8586_v2  ;;  %v8082_v2 = vor.u32 %v9853_v48, %v8081_v33  ;;  %v9006_v39 = vor.u32 %v10084_v22, %v9005_v24 }
 0x3ac   :  { %6134 = vmatpush.bf16.msra.mxu1 %v9226_v25  ;;  %6212 = vmatpush.bf16.msrb.mxu3 %v8782_v32  ;;  %v5929_v30 = vpop.f32.mrf.mxu1  ;;  %v9916_v25 = vld [vmem:[%s15280_s7 + $0x5a8] sm:$0xf0] }
 0x3ad   :  { %6174 = vmatpush.bf16.msrb.mxu0 %v8082_v2  ;;  %v8334_v58 = vor.u32 %v9916_v25, %v8333_v8  ;;  %v9909_v2 = vld [vmem:[%s15280_s7 + $0x570] sm:$0xf0] }
 0x3ae   :  { %6199 = vmatpush.bf16.msrb.mxu2 %v8558_v27  ;;  %v5891_v27 = vadd.f32 %v14806_v12, %v5878_v34  ;;  %v8417_v12 = vld [vmem:[%s15280_s7 + $0x638] sm:$0xf]  ;;  %v10168_v34 = vld [vmem:[%s15280_s7 + $0xd88] sm:$0xf0] }
 0x3b0   :  { %6135 = vmatpush.bf16.msra.mxu1 %v9198_v49  ;;  %6213 = vmatpush.bf16.msrb.mxu3 %v8754_v15  ;;  %v5904_v36 = vadd.f32 %v14864_v19, %v5891_v27  ;;  %v9930_v19 = vld [vmem:[%s15280_s7 + $0x618] sm:$0xf0]  ;;  %v9397_v49 = vld [vmem:[%s15280_s7 + $0xde0] sm:$0xf]  ;;  %v8306_v15 = vor.u32 %v9909_v2, %v8305_v40 }
 0x3b1   :  { %6219 = vmatpush.bf16.msra.mxu0 %v9174_v43  ;;  %v8390_v16 = vor.u32 %v9930_v19, %v8389_v7  ;;  %v10182_v43 = vld [vmem:[%s15280_s7 + $0xdf8] sm:$0xf0] }
 0x3b2   :  { %6200 = vmatpush.bf16.msrb.mxu2 %v8530_v9  ;;  %6175 = vmatmul.bf16.vlgmr.msrb.gmra.mxu0 %v12674_v55  ;;  %v9089_v55 = vld [vmem:[%s15280_s7 + $0xb78] sm:$0xf]  ;;  %v5917_v6 = vadd.f32 %v15022_v60, %v5904_v36  ;;  %v15164_v9 = vpop.f32.mrf.mxu0  ;;  %v8361_v60 = vld [vmem:[%s15280_s7 + $0x5c8] sm:$0xf]  ;;  %v9229_v36 = vld [vmem:[%s15280_s7 + $0xc90] sm:$0xf] }
 0x3b3   :  { %6136 = vmatmul.bf16.vlgmr.msra.gmra.mxu1 %v13283_v56  ;;  %6214 = vmatmul.bf16.vlgmr.msrb.gmra.mxu3 %v12958_v38  ;;  %v9937_v38 = vld [vmem:[%s15280_s7 + $0x650] sm:$0xf0]  ;;  %v9090_v4 = vor.u32 %v10105_v62, %v9089_v55  ;;  %v8362_v23 = vor.u32 %v9923_v18, %v8361_v60  ;;  %v9257_v55 = vld [vmem:[%s15280_s7 + $0xcc8] sm:$0xf]  ;;  %v10147_v62 = vld [vmem:[%s15280_s7 + $0xce0] sm:$0xf0] }
 0x3b4   :  { %6180 = vmatpush.bf16.msrb.mxu1 %v8502_v50  ;;  %v8418_v45 = vor.u32 %v9937_v38, %v8417_v12  ;;  %v5930_v13 = vadd.f32 %v5929_v30, %v5917_v6  ;;  %v5931_v48 = vpop.f32.mrf.mxu1  ;;  %v9398_v50 = vor.u32 %v10182_v43, %v9397_v49  ;;  %v9258_v12 = vor.u32 %v10147_v62, %v9257_v55  ;;  %v9201_v30 = vld [vmem:[%s15280_s7 + $0xc58] sm:$0xf] }
 0x3b5   :  { %6201 = vmatmul.bf16.vlgmr.msrb.gmra.mxu2 %v12762_v26  ;;  %v8473_v26 = vld [vmem:[%s15280_s7 + $0x6a8] sm:$0xf]  ;;  %6220 = vmatpush.bf16.msra.mxu0 %v9146_v31  ;;  %v15190_v33 = vpop.f32.mrf.mxu3 }
 0x3b6   :  { %v8474_v21 = vor.u32 %v9951_v20, %v8473_v26  ;;  %10189 = vtanh.f32 %v5930_v13  ;;  %v9370_v26 = vor.u32 %v10175_v57, %v9369_v54  ;;  %v9341_v20 = vld [vmem:[%s15280_s7 + $0xd70] sm:$0xf] }
 0x3b7   :  { %v9342_v31 = vor.u32 %v10168_v34, %v9341_v20 }
 0x3b8   :  { %6181 = vmatpush.bf16.msrb.mxu1 %v8474_v21  ;;  %v15162_v52 = vpop.f32.mrf.mxu2  ;;  %v9313_v21 = vld [vmem:[%s15280_s7 + $0xd38] sm:$0xf] }
 0x3b9   :  { %6221 = vmatpush.bf16.msra.mxu0 %v9118_v42 }
 0x3ba   :  { %v5970_v32 = vpop.f32.mrf.mxu0 }
 0x3bc   :  { %6182 = vmatpush.bf16.msrb.mxu1 %v8446_v3  ;;  %v10190_v44 = vpop.eup %10189  ;;  %v3204_v3 = vperm.slane %v15027_v28, 5 }
 0x3bd   :  { %6222 = vmatpush.bf16.msra.mxu0 %v9090_v4  ;;  %6255 = vst [vmem:[%s15282_s9 + $0x18] sm:$0xff] %v10190_v44  ;;  %v6009_v53 = vpop.f32.mrf.mxu3  ;;  %v10140_v4 = vld [vmem:[%s15280_s7 + $0xca8] sm:$0xf0] }
 0x3be   :  { %v9230_v6 = vor.u32 %v10140_v4, %v9229_v36 }
 0x3c0   :  { %6183 = vmatpush.bf16.msrb.mxu1 %v8418_v45  ;;  %v5996_v35 = vpop.f32.mrf.mxu2 }
 0x3c1   :  { %6223 = vmatpush.bf16.msra.mxu0 %v9062_v10  ;;  %v10133_v10 = vld [vmem:[%s15280_s7 + $0xc70] sm:$0xf0] }
 0x3c2   :  { %v9202_v13 = vor.u32 %v10133_v10, %v9201_v30 }
 0x3c4   :  { %6184 = vmatpush.bf16.msrb.mxu1 %v8390_v16  ;;  %v5969_v16 = vadd.f32 %v15164_v9, %v15072_v37 }
 0x3c5   :  { %6224 = vmatpush.bf16.msra.mxu0 %v9034_v1 }
 0x3c8   :  { %6185 = vmatpush.bf16.msrb.mxu1 %v8362_v23 }
 0x3c9   :  { %6225 = vmatpush.bf16.msra.mxu0 %v9006_v39 }
 0x3cc   :  { %6186 = vmatpush.bf16.msrb.mxu1 %v8334_v58 }
 0x3cd   :  { %6226 = vmatpush.bf16.msra.mxu0 %v8978_v5  ;;  %v5981_v0 = vpop.f32.mrf.mxu1  ;;  %v6020_v27 = vpop.f32.mrf.mxu0 }
 0x3ce   :  { %v5982_v17 = vadd.f32 %v5981_v0, %v5969_v16 }
 0x3d0   :  { %6187 = vmatpush.bf16.msrb.mxu1 %v8306_v15  ;;  %6227 = vmatmul.bf16.vlgmr.msra.gmra.mxu0 %v13126_v14  ;;  %v10161_v14 = vld [vmem:[%s15280_s7 + $0xd50] sm:$0xf0]  ;;  %v5995_v60 = vadd.f32 %v15162_v52, %v5982_v17 }
 0x3d1   :  { %v9314_v61 = vor.u32 %v10161_v14, %v9313_v21 }
 0x3d2   :  { %v6008_v18 = vadd.f32 %v15190_v33, %v5995_v60  ;;  %v3205_v33 = vperm.slane %v15027_v28, 6 }
 0x3d3   :  { %6188 = vmatmul.bf16.vlgmr.msrb.gmra.mxu1 %v12652_v41  ;;  %v10154_v41 = vld [vmem:[%s15280_s7 + $0xd18] sm:$0xf0] }
 0x3d4   :  { %6232 = vmatpush.bf16.msra.mxu1 %v9398_v50  ;;  %v9286_v42 = vor.u32 %v10154_v41, %v9285_v63  ;;  %v6021_v1 = vadd.f32 %v6020_v27, %v6008_v18 }
 0x3d5   :  { %v5983_v7 = vpop.f32.mrf.mxu1  ;;  %v6022_v19 = vpop.f32.mrf.mxu0 }
 0x3d6   :  { %v6059_v29 = vpop.f32.mrf.mxu3 }
 0x3d8   :  { %6233 = vmatpush.bf16.msra.mxu1 %v9370_v26  ;;  %v6046_v59 = vpop.f32.mrf.mxu2 }
 0x3d9   :  { %v6047_v38 = vadd.f32 %v6046_v59, %v3204_v3 }
 0x3db   :  { %v6060_v51 = vadd.f32 %v6059_v29, %v6047_v38 }
 0x3dc   :  { %6234 = vmatpush.bf16.msra.mxu1 %v9342_v31 }
 0x3de   :  { %v6061_v11 = vpop.f32.mrf.mxu3 }
 0x3e0   :  { %6235 = vmatpush.bf16.msra.mxu1 %v9314_v61  ;;  %v6048_v45 = vpop.f32.mrf.mxu2 }
 0x3e4   :  { %6236 = vmatpush.bf16.msra.mxu1 %v9286_v42 }
 0x3e8   :  { %6237 = vmatpush.bf16.msra.mxu1 %v9258_v12 }
 0x3ec   :  { %6238 = vmatpush.bf16.msra.mxu1 %v9230_v6 }
 0x3ed   :  { %v6072_v22 = vpop.f32.mrf.mxu0 }
 0x3ee   :  { %v6033_v24 = vpop.f32.mrf.mxu1  ;;  %v6073_v49 = vadd.f32 %v6072_v22, %v6060_v51 }
 0x3ef   :  { %v6034_v8 = vadd.f32 %v6033_v24, %v6021_v1 }
 0x3f0   :  { %6239 = vmatpush.bf16.msra.mxu1 %v9202_v13 }
 0x3f1   :  { %10191 = vtanh.f32 %v6034_v8 }
 0x3f3   :  { %6240 = vmatmul.bf16.vlgmr.msra.gmra.mxu1 %v13283_v56 }
 0x3f5   :  { %v6074_v32 = vpop.f32.mrf.mxu0 }
 0x3f6   :  { %v6111_v35 = vpop.f32.mrf.mxu3  ;;  %v6035_v48 = vpop.f32.mrf.mxu1 }
 0x3f7   :  { %v10192_v37 = vpop.eup %10191 }
 0x3f8   :  { %v6098_v23 = vpop.f32.mrf.mxu2  ;;  %6256 = vst [vmem:[%s15282_s9 + $0x20] sm:$0xff] %v10192_v37 }
 0x3fe   :  { %v6113_v52 = vpop.f32.mrf.mxu3 }
 0x400   :  { %v6100_v25 = vpop.f32.mrf.mxu2 }
 0x40d   :  { %v6124_v39 = vpop.f32.mrf.mxu0 }
 0x40e   :  { %v6085_v56 = vpop.f32.mrf.mxu1 }
 0x40f   :  { %v6086_v5 = vadd.f32 %v6085_v56, %v6073_v49 }
 0x411   :  { %v6099_v15 = vadd.f32 %v6098_v23, %v6086_v5 }
 0x413   :  { %v6112_v50 = vadd.f32 %v6111_v35, %v6099_v15 }
 0x415   :  { %v6126_v2 = vpop.f32.mrf.mxu0  ;;  %v6125_v53 = vadd.f32 %v6124_v39, %v6112_v50 }
 0x416   :  { %v6163_v46 = vpop.f32.mrf.mxu3  ;;  %v6087_v40 = vpop.f32.mrf.mxu1 }
 0x418   :  { %v6150_v9 = vpop.f32.mrf.mxu2 }
 0x419   :  { %v6151_v44 = vadd.f32 %v6150_v9, %v3205_v33 }
 0x41b   :  { %v6164_v47 = vadd.f32 %v6163_v46, %v6151_v44 }
 0x41e   :  { %v6165_v43 = vpop.f32.mrf.mxu3 }
 0x420   :  { %v6152_v58 = vpop.f32.mrf.mxu2 }
 0x42f   :  { %v6176_v57 = vpop.f32.mrf.mxu0 }
 0x430   :  { %v6137_v26 = vpop.f32.mrf.mxu1  ;;  %v6177_v27 = vadd.f32 %v6176_v57, %v6164_v47 }
 0x431   :  { %v6138_v20 = vadd.f32 %v6137_v26, %v6125_v53 }
 0x433   :  { %10193 = vtanh.f32 %v6138_v20 }
 0x436   :  { %v6215_v31 = vpop.f32.mrf.mxu3 }
 0x437   :  { %v6178_v21 = vpop.f32.mrf.mxu0 }
 0x438   :  { %v6202_v54 = vpop.f32.mrf.mxu2  ;;  %v6139_v28 = vpop.f32.mrf.mxu1 }
 0x439   :  { %v10194_v14 = vpop.eup %10193 }
 0x43a   :  { %6257 = vst [vmem:[%s15282_s9 + $0x28] sm:$0xff] %v10194_v14 }
 0x43e   :  { %v6217_v61 = vpop.f32.mrf.mxu3 }
 0x440   :  { %v6204_v34 = vpop.f32.mrf.mxu2 }
 0x44d   :  { %v6228_v63 = vpop.f32.mrf.mxu0 }
 0x450   :  { %v6189_v41 = vpop.f32.mrf.mxu1 }
 0x451   :  { %v6190_v42 = vadd.f32 %v6189_v41, %v6177_v27 }
 0x453   :  { %v6203_v3 = vadd.f32 %v6202_v54, %v6190_v42 }
 0x455   :  { %v6230_v59 = vpop.f32.mrf.mxu0  ;;  %v6216_v55 = vadd.f32 %v6215_v31, %v6203_v3 }
 0x457   :  { %v6229_v62 = vadd.f32 %v6228_v63, %v6216_v55 }
 0x458   :  { %v6191_v0 = vpop.f32.mrf.mxu1 }
 0x470   :  { %v6241_v12 = vpop.f32.mrf.mxu1 }
 0x471   :  { %v6242_v38 = vadd.f32 %v6241_v12, %v6229_v62 }
 0x473   :  { %10195 = vtanh.f32 %v6242_v38 }
 0x478   :  { %v6243_v36 = vpop.f32.mrf.mxu1 }
 0x479   :  { %v10196_v4 = vpop.eup %10195 }
 0x47a   :  { %6258 = vst [vmem:[%s15282_s9 + $0x30] sm:$0xff] %v10196_v4 }

</bundles_post_ra>
